<compile_context>
chip_gen: v7x
topology: tpu7x:2x2x1
jax: 0.10.0
libtpu: 0.0.40
codegen_flags: <defaults>
</compile_context>

<pallas_src>
import jax
import jax.numpy as jnp
from jax.experimental import pallas as pl
from jax.experimental.pallas import tpu as pltpu


def _round_up(x: int, m: int) -> int:
    return ((x + m - 1) // m) * m


def _pick_vocab_tile(vocab_size: int):
    """Pick a large lane-dense vocab tile with bounded padding waste."""
    v128 = _round_up(vocab_size, 128)
    for tile in (4096, 2048, 1024, 512, 256, 128):
        if tile <= v128:
            v_pad = _round_up(v128, tile)
            if v_pad * 4 <= v128 * 5 or tile == 128:   # <= 25% padding waste
                return tile, v_pad
    return v128, v128   # vocab smaller than one 128-lane tile


def prepare_word2vec_params(emb, w, bias):
    """One-time layout prep (hoisted out of the per-call path).

    emb:  (V, H) f32 embedding table (row 0 = padding_idx)
    w:    (V, H) f32 Linear weight (PyTorch layout)
    bias: (V,)   f32 Linear bias
    """
    V, H = emb.shape
    assert w.shape == (V, H) and bias.shape == (V,)
    H_pad = _round_up(H, 128)
    _, V_pad = _pick_vocab_tile(V)
    emb_p = jnp.zeros((V, H_pad), jnp.float32).at[:, :H].set(emb.astype(jnp.float32))
    w_t_bf16 = w.astype(jnp.bfloat16).T                       # cast BEFORE padding
    w_t_p = jnp.zeros((H_pad, V_pad), jnp.bfloat16).at[:H, :V].set(w_t_bf16)
    bias_p = jnp.zeros((1, V_pad), jnp.float32).at[0, :V].set(bias.astype(jnp.float32))
    return emb_p, w_t_p, bias_p


def _word2vec_forward(ids, emb_p, w_t_p, bias_p, *, vocab_size):
    B, L = ids.shape
    _, H_pad = emb_p.shape
    TILE_V, V_pad = _pick_vocab_tile(vocab_size)
    assert w_t_p.shape == (H_pad, V_pad) and bias_p.shape == (1, V_pad)

    B_pad = _round_up(B, 8)                    # f32 sublane alignment
    L_CHUNK = min(L, 32)                       # bounds gather VMEM for large L
    n_chunks = (L + L_CHUNK - 1) // L_CHUNK
    inv_L = 1.0 / L
    n_v_tiles = V_pad // TILE_V

    def kernel(ids_ref, emb_hbm, w_ref, b_ref, o_ref, gbuf, sem, xmean):
        j = pl.program_id(0)

        # --- gather + mean, once; result persists in `xmean` VMEM scratch ---
        @pl.when(j == 0)
        def _gather_mean():
            tok_sum = None
            for c in range(n_chunks):
                l0 = c * L_CHUNK
                lc = min(L_CHUNK, L - l0)
                copies = []
                for b in range(B):                 # only real batch rows
                    for dl in range(lc):
                        rid = ids_ref[b * L + l0 + dl]
                        rid = jnp.minimum(jnp.maximum(rid, 0), vocab_size - 1)
                        cp = pltpu.make_async_copy(
                            emb_hbm.at[rid],       # (H_pad,) row in HBM
                            gbuf.at[dl, b],        # (H_pad,) row in VMEM
                            sem)                   # shared scalar DMA sem
                        cp.start()
                        copies.append(cp)
                for cp in copies:                  # all ids read before waits
                    cp.wait()
                part = gbuf[...] if lc == L_CHUNK else gbuf[0:lc]
                s = jnp.sum(part, axis=0)          # tree reduce over tokens
                tok_sum = s if tok_sum is None else tok_sum + s
            row = jax.lax.broadcasted_iota(jnp.int32, (B_pad, H_pad), 0)
            # Zero padded batch sublanes (their gbuf rows were never DMA'd).
            xmean[...] = jnp.where(row < B, tok_sum * inv_L, 0.0)

        # --- vocab-tiled linear: pred_tile = x @ W^T_tile + b_tile ----------
        o_ref[...] = (
            jnp.dot(xmean[...].astype(jnp.bfloat16), w_ref[...],
                    preferred_element_type=jnp.float32)
            + b_ref[...])

    grid_spec = pltpu.PrefetchScalarGridSpec(
        num_scalar_prefetch=1,                    # flattened token ids -> SMEM
        grid=(n_v_tiles,),
        in_specs=[
            pl.BlockSpec(memory_space=pl.ANY),                     # emb in HBM
            pl.BlockSpec((H_pad, TILE_V), lambda j, ids: (0, j)),  # W^T tile (bf16)
            pl.BlockSpec((1, TILE_V), lambda j, ids: (0, j)),      # bias tile
        ],
        out_specs=pl.BlockSpec((B_pad, TILE_V), lambda j, ids: (0, j)),
        scratch_shapes=[
            pltpu.VMEM((L_CHUNK, B_pad, H_pad), jnp.float32),  # gather buffer
            pltpu.SemaphoreType.DMA(()),                       # shared DMA sem
            pltpu.VMEM((B_pad, H_pad), jnp.float32),           # mean embedding
        ],
    )

    pred = pl.pallas_call(
        kernel,
        out_shape=jax.ShapeDtypeStruct((B_pad, V_pad), jnp.float32),
        grid_spec=grid_spec,
        compiler_params=pltpu.CompilerParams(
            # Gather runs only at j == 0 and persists across the grid, so the
            # vocab axis must stay sequential (see v7x TODO above).
            dimension_semantics=("arbitrary",)),
    )(ids.astype(jnp.int32).reshape(-1), emb_p, w_t_p, bias_p)

    return pred[:B, :vocab_size]


word2vec_predict = jax.jit(_word2vec_forward, static_argnames=("vocab_size",))


if __name__ == "__main__":
    # Small shapes consistent with the module (hidden_size = module default 120).
    vocab_size = 500
    hidden_size = 120
    batch = 4
    seq_len = 8

    key = jax.random.PRNGKey(0)
    k_emb, k_w, k_b, k_ids = jax.random.split(key, 4)

    # nn.Embedding default init N(0,1), padding_idx=0 row zeroed.
    emb = jax.random.normal(k_emb, (vocab_size, hidden_size), dtype=jnp.float32)
    emb = emb.at[0].set(0.0)

    # nn.Linear default init U(-1/sqrt(H), 1/sqrt(H)).
    bound = 1.0 / (hidden_size ** 0.5)
    w = jax.random.uniform(k_w, (vocab_size, hidden_size),
                           minval=-bound, maxval=bound, dtype=jnp.float32)
    b = jax.random.uniform(k_b, (vocab_size,),
                           minval=-bound, maxval=bound, dtype=jnp.float32)

    ids = jax.random.randint(k_ids, (batch, seq_len), 0, vocab_size,
                             dtype=jnp.int32)

    # One-time parameter prep (pad + bf16 cast), hoisted out of the call path.
    emb_p, w_t_p, bias_p = jax.block_until_ready(
        prepare_word2vec_params(emb, w, b))

    pred = word2vec_predict(ids, emb_p, w_t_p, bias_p, vocab_size=vocab_size)
    pred = jax.block_until_ready(pred)

    # Pure-JAX f32 reference (embedding gather + mean + linear).
    ref = jnp.take(emb, ids, axis=0).mean(axis=1) @ w.T + b
    assert pred.shape == (batch, vocab_size)
    # Loosened tolerance: Linear weights/activations run in bf16 on the MXU.
    assert jnp.allclose(pred, ref, atol=2e-2, rtol=2e-2), "mismatch vs reference"

    print("KERNEL_OK")
</pallas_src>

<mosaic_0001>
module attributes {stable_mosaic.version = 11 : i64} {
  func.func @kernel(%arg0: i32, %arg1: memref<32xi32, #tpu.memory_space<smem>>, %arg2: memref<500x128xf32, #tpu.memory_space<any>>, %arg3: memref<128x512xbf16, #tpu.memory_space<vmem>>, %arg4: memref<1x512xf32, #tpu.memory_space<vmem>>, %arg5: memref<8x512xf32, #tpu.memory_space<vmem>>, %arg6: memref<8x8x128xf32, #tpu.memory_space<vmem>>, %arg7: memref<!tpu.dma_semaphore, #tpu.memory_space<semaphore_mem>>, %arg8: memref<8x128xf32, #tpu.memory_space<vmem>>) attributes {dimension_semantics = [#tpu.dimension_semantics<arbitrary>], iteration_bounds = array<i64: 1>, scalar_prefetch = 1 : i64, scratch_operands = 3 : i64, tpu.core_type = #tpu.core_type<tc>, window_params = [{}, {transform_indices = @transform_1, window_bounds = array<i64: 128, 512>}, {transform_indices = @transform_2, window_bounds = array<i64: 1, 512>}, {transform_indices = @transform_3, window_bounds = array<i64: 8, 512>}]} {
    %c0_i32 = arith.constant 0 : i32
    %0 = arith.cmpi eq, %arg0, %c0_i32 : i32
    %1 = arith.extui %0 : i1 to i32
    %c0_i32_0 = arith.constant 0 : i32
    %2 = arith.cmpi ne, %1, %c0_i32_0 : i32
    scf.if %2 {
      %c0_8 = arith.constant 0 : index
      %11 = memref.load %arg1[%c0_8] : memref<32xi32, #tpu.memory_space<smem>>
      %c0_i32_9 = arith.constant 0 : i32
      %12 = arith.maxsi %11, %c0_i32_9 : i32
      %c499_i32 = arith.constant 499 : i32
      %13 = arith.minsi %12, %c499_i32 : i32
      %c0_i32_10 = arith.constant 0 : i32
      %c0_i32_11 = arith.constant 0 : i32
      %c0_i32_12 = arith.constant 0 : i32
      %14 = tpu.memref_slice %arg2[%13, %c0_i32_12] : memref<500x128xf32, #tpu.memory_space<any>> -> memref<1x128xf32, #tpu.memory_space<any>>
      %15 = tpu.memref_squeeze %14 : memref<1x128xf32, #tpu.memory_space<any>> -> memref<128xf32, #tpu.memory_space<any>>
      %c0_i32_13 = arith.constant 0 : i32
      %16 = tpu.memref_slice %arg6[%c0_i32_10, %c0_i32_11, %c0_i32_13] : memref<8x8x128xf32, #tpu.memory_space<vmem>> -> memref<1x1x128xf32, #tpu.memory_space<vmem>>
      %17 = tpu.memref_squeeze %16 : memref<1x1x128xf32, #tpu.memory_space<vmem>> -> memref<128xf32, #tpu.memory_space<vmem>>
      tpu.enqueue_dma source(%15 : memref<128xf32, #tpu.memory_space<any>>) target(%17 : memref<128xf32, #tpu.memory_space<vmem>>) target_semaphore(%arg7 : memref<!tpu.dma_semaphore, #tpu.memory_space<semaphore_mem>>)
      %c1 = arith.constant 1 : index
      %18 = memref.load %arg1[%c1] : memref<32xi32, #tpu.memory_space<smem>>
      %c0_i32_14 = arith.constant 0 : i32
      %19 = arith.maxsi %18, %c0_i32_14 : i32
      %c499_i32_15 = arith.constant 499 : i32
      %20 = arith.minsi %19, %c499_i32_15 : i32
      %c1_i32 = arith.constant 1 : i32
      %c0_i32_16 = arith.constant 0 : i32
      %c0_i32_17 = arith.constant 0 : i32
      %21 = tpu.memref_slice %arg2[%20, %c0_i32_17] : memref<500x128xf32, #tpu.memory_space<any>> -> memref<1x128xf32, #tpu.memory_space<any>>
      %22 = tpu.memref_squeeze %21 : memref<1x128xf32, #tpu.memory_space<any>> -> memref<128xf32, #tpu.memory_space<any>>
      %c0_i32_18 = arith.constant 0 : i32
      %23 = tpu.memref_slice %arg6[%c1_i32, %c0_i32_16, %c0_i32_18] : memref<8x8x128xf32, #tpu.memory_space<vmem>> -> memref<1x1x128xf32, #tpu.memory_space<vmem>>
      %24 = tpu.memref_squeeze %23 : memref<1x1x128xf32, #tpu.memory_space<vmem>> -> memref<128xf32, #tpu.memory_space<vmem>>
      tpu.enqueue_dma source(%22 : memref<128xf32, #tpu.memory_space<any>>) target(%24 : memref<128xf32, #tpu.memory_space<vmem>>) target_semaphore(%arg7 : memref<!tpu.dma_semaphore, #tpu.memory_space<semaphore_mem>>)
      %c2 = arith.constant 2 : index
      %25 = memref.load %arg1[%c2] : memref<32xi32, #tpu.memory_space<smem>>
      %c0_i32_19 = arith.constant 0 : i32
      %26 = arith.maxsi %25, %c0_i32_19 : i32
      %c499_i32_20 = arith.constant 499 : i32
      %27 = arith.minsi %26, %c499_i32_20 : i32
      %c2_i32 = arith.constant 2 : i32
      %c0_i32_21 = arith.constant 0 : i32
      %c0_i32_22 = arith.constant 0 : i32
      %28 = tpu.memref_slice %arg2[%27, %c0_i32_22] : memref<500x128xf32, #tpu.memory_space<any>> -> memref<1x128xf32, #tpu.memory_space<any>>
      %29 = tpu.memref_squeeze %28 : memref<1x128xf32, #tpu.memory_space<any>> -> memref<128xf32, #tpu.memory_space<any>>
      %c0_i32_23 = arith.constant 0 : i32
      %30 = tpu.memref_slice %arg6[%c2_i32, %c0_i32_21, %c0_i32_23] : memref<8x8x128xf32, #tpu.memory_space<vmem>> -> memref<1x1x128xf32, #tpu.memory_space<vmem>>
      %31 = tpu.memref_squeeze %30 : memref<1x1x128xf32, #tpu.memory_space<vmem>> -> memref<128xf32, #tpu.memory_space<vmem>>
      tpu.enqueue_dma source(%29 : memref<128xf32, #tpu.memory_space<any>>) target(%31 : memref<128xf32, #tpu.memory_space<vmem>>) target_semaphore(%arg7 : memref<!tpu.dma_semaphore, #tpu.memory_space<semaphore_mem>>)
      %c3 = arith.constant 3 : index
      %32 = memref.load %arg1[%c3] : memref<32xi32, #tpu.memory_space<smem>>
      %c0_i32_24 = arith.constant 0 : i32
      %33 = arith.maxsi %32, %c0_i32_24 : i32
      %c499_i32_25 = arith.constant 499 : i32
      %34 = arith.minsi %33, %c499_i32_25 : i32
      %c3_i32 = arith.constant 3 : i32
      %c0_i32_26 = arith.constant 0 : i32
      %c0_i32_27 = arith.constant 0 : i32
      %35 = tpu.memref_slice %arg2[%34, %c0_i32_27] : memref<500x128xf32, #tpu.memory_space<any>> -> memref<1x128xf32, #tpu.memory_space<any>>
      %36 = tpu.memref_squeeze %35 : memref<1x128xf32, #tpu.memory_space<any>> -> memref<128xf32, #tpu.memory_space<any>>
      %c0_i32_28 = arith.constant 0 : i32
      %37 = tpu.memref_slice %arg6[%c3_i32, %c0_i32_26, %c0_i32_28] : memref<8x8x128xf32, #tpu.memory_space<vmem>> -> memref<1x1x128xf32, #tpu.memory_space<vmem>>
      %38 = tpu.memref_squeeze %37 : memref<1x1x128xf32, #tpu.memory_space<vmem>> -> memref<128xf32, #tpu.memory_space<vmem>>
      tpu.enqueue_dma source(%36 : memref<128xf32, #tpu.memory_space<any>>) target(%38 : memref<128xf32, #tpu.memory_space<vmem>>) target_semaphore(%arg7 : memref<!tpu.dma_semaphore, #tpu.memory_space<semaphore_mem>>)
      %c4 = arith.constant 4 : index
      %39 = memref.load %arg1[%c4] : memref<32xi32, #tpu.memory_space<smem>>
      %c0_i32_29 = arith.constant 0 : i32
      %40 = arith.maxsi %39, %c0_i32_29 : i32
      %c499_i32_30 = arith.constant 499 : i32
      %41 = arith.minsi %40, %c499_i32_30 : i32
      %c4_i32 = arith.constant 4 : i32
      %c0_i32_31 = arith.constant 0 : i32
      %c0_i32_32 = arith.constant 0 : i32
      %42 = tpu.memref_slice %arg2[%41, %c0_i32_32] : memref<500x128xf32, #tpu.memory_space<any>> -> memref<1x128xf32, #tpu.memory_space<any>>
      %43 = tpu.memref_squeeze %42 : memref<1x128xf32, #tpu.memory_space<any>> -> memref<128xf32, #tpu.memory_space<any>>
      %c0_i32_33 = arith.constant 0 : i32
      %44 = tpu.memref_slice %arg6[%c4_i32, %c0_i32_31, %c0_i32_33] : memref<8x8x128xf32, #tpu.memory_space<vmem>> -> memref<1x1x128xf32, #tpu.memory_space<vmem>>
      %45 = tpu.memref_squeeze %44 : memref<1x1x128xf32, #tpu.memory_space<vmem>> -> memref<128xf32, #tpu.memory_space<vmem>>
      tpu.enqueue_dma source(%43 : memref<128xf32, #tpu.memory_space<any>>) target(%45 : memref<128xf32, #tpu.memory_space<vmem>>) target_semaphore(%arg7 : memref<!tpu.dma_semaphore, #tpu.memory_space<semaphore_mem>>)
      %c5 = arith.constant 5 : index
      %46 = memref.load %arg1[%c5] : memref<32xi32, #tpu.memory_space<smem>>
      %c0_i32_34 = arith.constant 0 : i32
      %47 = arith.maxsi %46, %c0_i32_34 : i32
      %c499_i32_35 = arith.constant 499 : i32
      %48 = arith.minsi %47, %c499_i32_35 : i32
      %c5_i32 = arith.constant 5 : i32
      %c0_i32_36 = arith.constant 0 : i32
      %c0_i32_37 = arith.constant 0 : i32
      %49 = tpu.memref_slice %arg2[%48, %c0_i32_37] : memref<500x128xf32, #tpu.memory_space<any>> -> memref<1x128xf32, #tpu.memory_space<any>>
      %50 = tpu.memref_squeeze %49 : memref<1x128xf32, #tpu.memory_space<any>> -> memref<128xf32, #tpu.memory_space<any>>
      %c0_i32_38 = arith.constant 0 : i32
      %51 = tpu.memref_slice %arg6[%c5_i32, %c0_i32_36, %c0_i32_38] : memref<8x8x128xf32, #tpu.memory_space<vmem>> -> memref<1x1x128xf32, #tpu.memory_space<vmem>>
      %52 = tpu.memref_squeeze %51 : memref<1x1x128xf32, #tpu.memory_space<vmem>> -> memref<128xf32, #tpu.memory_space<vmem>>
      tpu.enqueue_dma source(%50 : memref<128xf32, #tpu.memory_space<any>>) target(%52 : memref<128xf32, #tpu.memory_space<vmem>>) target_semaphore(%arg7 : memref<!tpu.dma_semaphore, #tpu.memory_space<semaphore_mem>>)
      %c6 = arith.constant 6 : index
      %53 = memref.load %arg1[%c6] : memref<32xi32, #tpu.memory_space<smem>>
      %c0_i32_39 = arith.constant 0 : i32
      %54 = arith.maxsi %53, %c0_i32_39 : i32
      %c499_i32_40 = arith.constant 499 : i32
      %55 = arith.minsi %54, %c499_i32_40 : i32
      %c6_i32 = arith.constant 6 : i32
      %c0_i32_41 = arith.constant 0 : i32
      %c0_i32_42 = arith.constant 0 : i32
      %56 = tpu.memref_slice %arg2[%55, %c0_i32_42] : memref<500x128xf32, #tpu.memory_space<any>> -> memref<1x128xf32, #tpu.memory_space<any>>
      %57 = tpu.memref_squeeze %56 : memref<1x128xf32, #tpu.memory_space<any>> -> memref<128xf32, #tpu.memory_space<any>>
      %c0_i32_43 = arith.constant 0 : i32
      %58 = tpu.memref_slice %arg6[%c6_i32, %c0_i32_41, %c0_i32_43] : memref<8x8x128xf32, #tpu.memory_space<vmem>> -> memref<1x1x128xf32, #tpu.memory_space<vmem>>
      %59 = tpu.memref_squeeze %58 : memref<1x1x128xf32, #tpu.memory_space<vmem>> -> memref<128xf32, #tpu.memory_space<vmem>>
      tpu.enqueue_dma source(%57 : memref<128xf32, #tpu.memory_space<any>>) target(%59 : memref<128xf32, #tpu.memory_space<vmem>>) target_semaphore(%arg7 : memref<!tpu.dma_semaphore, #tpu.memory_space<semaphore_mem>>)
      %c7 = arith.constant 7 : index
      %60 = memref.load %arg1[%c7] : memref<32xi32, #tpu.memory_space<smem>>
      %c0_i32_44 = arith.constant 0 : i32
      %61 = arith.maxsi %60, %c0_i32_44 : i32
      %c499_i32_45 = arith.constant 499 : i32
      %62 = arith.minsi %61, %c499_i32_45 : i32
      %c7_i32 = arith.constant 7 : i32
      %c0_i32_46 = arith.constant 0 : i32
      %c0_i32_47 = arith.constant 0 : i32
      %63 = tpu.memref_slice %arg2[%62, %c0_i32_47] : memref<500x128xf32, #tpu.memory_space<any>> -> memref<1x128xf32, #tpu.memory_space<any>>
      %64 = tpu.memref_squeeze %63 : memref<1x128xf32, #tpu.memory_space<any>> -> memref<128xf32, #tpu.memory_space<any>>
      %c0_i32_48 = arith.constant 0 : i32
      %65 = tpu.memref_slice %arg6[%c7_i32, %c0_i32_46, %c0_i32_48] : memref<8x8x128xf32, #tpu.memory_space<vmem>> -> memref<1x1x128xf32, #tpu.memory_space<vmem>>
      %66 = tpu.memref_squeeze %65 : memref<1x1x128xf32, #tpu.memory_space<vmem>> -> memref<128xf32, #tpu.memory_space<vmem>>
      tpu.enqueue_dma source(%64 : memref<128xf32, #tpu.memory_space<any>>) target(%66 : memref<128xf32, #tpu.memory_space<vmem>>) target_semaphore(%arg7 : memref<!tpu.dma_semaphore, #tpu.memory_space<semaphore_mem>>)
      %c8 = arith.constant 8 : index
      %67 = memref.load %arg1[%c8] : memref<32xi32, #tpu.memory_space<smem>>
      %c0_i32_49 = arith.constant 0 : i32
      %68 = arith.maxsi %67, %c0_i32_49 : i32
      %c499_i32_50 = arith.constant 499 : i32
      %69 = arith.minsi %68, %c499_i32_50 : i32
      %c0_i32_51 = arith.constant 0 : i32
      %c1_i32_52 = arith.constant 1 : i32
      %c0_i32_53 = arith.constant 0 : i32
      %70 = tpu.memref_slice %arg2[%69, %c0_i32_53] : memref<500x128xf32, #tpu.memory_space<any>> -> memref<1x128xf32, #tpu.memory_space<any>>
      %71 = tpu.memref_squeeze %70 : memref<1x128xf32, #tpu.memory_space<any>> -> memref<128xf32, #tpu.memory_space<any>>
      %c0_i32_54 = arith.constant 0 : i32
      %72 = tpu.memref_slice %arg6[%c0_i32_51, %c1_i32_52, %c0_i32_54] : memref<8x8x128xf32, #tpu.memory_space<vmem>> -> memref<1x1x128xf32, #tpu.memory_space<vmem>>
      %73 = tpu.memref_squeeze %72 : memref<1x1x128xf32, #tpu.memory_space<vmem>> -> memref<128xf32, #tpu.memory_space<vmem>>
      tpu.enqueue_dma source(%71 : memref<128xf32, #tpu.memory_space<any>>) target(%73 : memref<128xf32, #tpu.memory_space<vmem>>) target_semaphore(%arg7 : memref<!tpu.dma_semaphore, #tpu.memory_space<semaphore_mem>>)
      %c9 = arith.constant 9 : index
      %74 = memref.load %arg1[%c9] : memref<32xi32, #tpu.memory_space<smem>>
      %c0_i32_55 = arith.constant 0 : i32
      %75 = arith.maxsi %74, %c0_i32_55 : i32
      %c499_i32_56 = arith.constant 499 : i32
      %76 = arith.minsi %75, %c499_i32_56 : i32
      %c1_i32_57 = arith.constant 1 : i32
      %c1_i32_58 = arith.constant 1 : i32
      %c0_i32_59 = arith.constant 0 : i32
      %77 = tpu.memref_slice %arg2[%76, %c0_i32_59] : memref<500x128xf32, #tpu.memory_space<any>> -> memref<1x128xf32, #tpu.memory_space<any>>
      %78 = tpu.memref_squeeze %77 : memref<1x128xf32, #tpu.memory_space<any>> -> memref<128xf32, #tpu.memory_space<any>>
      %c0_i32_60 = arith.constant 0 : i32
      %79 = tpu.memref_slice %arg6[%c1_i32_57, %c1_i32_58, %c0_i32_60] : memref<8x8x128xf32, #tpu.memory_space<vmem>> -> memref<1x1x128xf32, #tpu.memory_space<vmem>>
      %80 = tpu.memref_squeeze %79 : memref<1x1x128xf32, #tpu.memory_space<vmem>> -> memref<128xf32, #tpu.memory_space<vmem>>
      tpu.enqueue_dma source(%78 : memref<128xf32, #tpu.memory_space<any>>) target(%80 : memref<128xf32, #tpu.memory_space<vmem>>) target_semaphore(%arg7 : memref<!tpu.dma_semaphore, #tpu.memory_space<semaphore_mem>>)
      %c10 = arith.constant 10 : index
      %81 = memref.load %arg1[%c10] : memref<32xi32, #tpu.memory_space<smem>>
      %c0_i32_61 = arith.constant 0 : i32
      %82 = arith.maxsi %81, %c0_i32_61 : i32
      %c499_i32_62 = arith.constant 499 : i32
      %83 = arith.minsi %82, %c499_i32_62 : i32
      %c2_i32_63 = arith.constant 2 : i32
      %c1_i32_64 = arith.constant 1 : i32
      %c0_i32_65 = arith.constant 0 : i32
      %84 = tpu.memref_slice %arg2[%83, %c0_i32_65] : memref<500x128xf32, #tpu.memory_space<any>> -> memref<1x128xf32, #tpu.memory_space<any>>
      %85 = tpu.memref_squeeze %84 : memref<1x128xf32, #tpu.memory_space<any>> -> memref<128xf32, #tpu.memory_space<any>>
      %c0_i32_66 = arith.constant 0 : i32
      %86 = tpu.memref_slice %arg6[%c2_i32_63, %c1_i32_64, %c0_i32_66] : memref<8x8x128xf32, #tpu.memory_space<vmem>> -> memref<1x1x128xf32, #tpu.memory_space<vmem>>
      %87 = tpu.memref_squeeze %86 : memref<1x1x128xf32, #tpu.memory_space<vmem>> -> memref<128xf32, #tpu.memory_space<vmem>>
      tpu.enqueue_dma source(%85 : memref<128xf32, #tpu.memory_space<any>>) target(%87 : memref<128xf32, #tpu.memory_space<vmem>>) target_semaphore(%arg7 : memref<!tpu.dma_semaphore, #tpu.memory_space<semaphore_mem>>)
      %c11 = arith.constant 11 : index
      %88 = memref.load %arg1[%c11] : memref<32xi32, #tpu.memory_space<smem>>
      %c0_i32_67 = arith.constant 0 : i32
      %89 = arith.maxsi %88, %c0_i32_67 : i32
      %c499_i32_68 = arith.constant 499 : i32
      %90 = arith.minsi %89, %c499_i32_68 : i32
      %c3_i32_69 = arith.constant 3 : i32
      %c1_i32_70 = arith.constant 1 : i32
      %c0_i32_71 = arith.constant 0 : i32
      %91 = tpu.memref_slice %arg2[%90, %c0_i32_71] : memref<500x128xf32, #tpu.memory_space<any>> -> memref<1x128xf32, #tpu.memory_space<any>>
      %92 = tpu.memref_squeeze %91 : memref<1x128xf32, #tpu.memory_space<any>> -> memref<128xf32, #tpu.memory_space<any>>
      %c0_i32_72 = arith.constant 0 : i32
      %93 = tpu.memref_slice %arg6[%c3_i32_69, %c1_i32_70, %c0_i32_72] : memref<8x8x128xf32, #tpu.memory_space<vmem>> -> memref<1x1x128xf32, #tpu.memory_space<vmem>>
      %94 = tpu.memref_squeeze %93 : memref<1x1x128xf32, #tpu.memory_space<vmem>> -> memref<128xf32, #tpu.memory_space<vmem>>
      tpu.enqueue_dma source(%92 : memref<128xf32, #tpu.memory_space<any>>) target(%94 : memref<128xf32, #tpu.memory_space<vmem>>) target_semaphore(%arg7 : memref<!tpu.dma_semaphore, #tpu.memory_space<semaphore_mem>>)
      %c12 = arith.constant 12 : index
      %95 = memref.load %arg1[%c12] : memref<32xi32, #tpu.memory_space<smem>>
      %c0_i32_73 = arith.constant 0 : i32
      %96 = arith.maxsi %95, %c0_i32_73 : i32
      %c499_i32_74 = arith.constant 499 : i32
      %97 = arith.minsi %96, %c499_i32_74 : i32
      %c4_i32_75 = arith.constant 4 : i32
      %c1_i32_76 = arith.constant 1 : i32
      %c0_i32_77 = arith.constant 0 : i32
      %98 = tpu.memref_slice %arg2[%97, %c0_i32_77] : memref<500x128xf32, #tpu.memory_space<any>> -> memref<1x128xf32, #tpu.memory_space<any>>
      %99 = tpu.memref_squeeze %98 : memref<1x128xf32, #tpu.memory_space<any>> -> memref<128xf32, #tpu.memory_space<any>>
      %c0_i32_78 = arith.constant 0 : i32
      %100 = tpu.memref_slice %arg6[%c4_i32_75, %c1_i32_76, %c0_i32_78] : memref<8x8x128xf32, #tpu.memory_space<vmem>> -> memref<1x1x128xf32, #tpu.memory_space<vmem>>
      %101 = tpu.memref_squeeze %100 : memref<1x1x128xf32, #tpu.memory_space<vmem>> -> memref<128xf32, #tpu.memory_space<vmem>>
      tpu.enqueue_dma source(%99 : memref<128xf32, #tpu.memory_space<any>>) target(%101 : memref<128xf32, #tpu.memory_space<vmem>>) target_semaphore(%arg7 : memref<!tpu.dma_semaphore, #tpu.memory_space<semaphore_mem>>)
      %c13 = arith.constant 13 : index
      %102 = memref.load %arg1[%c13] : memref<32xi32, #tpu.memory_space<smem>>
      %c0_i32_79 = arith.constant 0 : i32
      %103 = arith.maxsi %102, %c0_i32_79 : i32
      %c499_i32_80 = arith.constant 499 : i32
      %104 = arith.minsi %103, %c499_i32_80 : i32
      %c5_i32_81 = arith.constant 5 : i32
      %c1_i32_82 = arith.constant 1 : i32
      %c0_i32_83 = arith.constant 0 : i32
      %105 = tpu.memref_slice %arg2[%104, %c0_i32_83] : memref<500x128xf32, #tpu.memory_space<any>> -> memref<1x128xf32, #tpu.memory_space<any>>
      %106 = tpu.memref_squeeze %105 : memref<1x128xf32, #tpu.memory_space<any>> -> memref<128xf32, #tpu.memory_space<any>>
      %c0_i32_84 = arith.constant 0 : i32
      %107 = tpu.memref_slice %arg6[%c5_i32_81, %c1_i32_82, %c0_i32_84] : memref<8x8x128xf32, #tpu.memory_space<vmem>> -> memref<1x1x128xf32, #tpu.memory_space<vmem>>
      %108 = tpu.memref_squeeze %107 : memref<1x1x128xf32, #tpu.memory_space<vmem>> -> memref<128xf32, #tpu.memory_space<vmem>>
      tpu.enqueue_dma source(%106 : memref<128xf32, #tpu.memory_space<any>>) target(%108 : memref<128xf32, #tpu.memory_space<vmem>>) target_semaphore(%arg7 : memref<!tpu.dma_semaphore, #tpu.memory_space<semaphore_mem>>)
      %c14 = arith.constant 14 : index
      %109 = memref.load %arg1[%c14] : memref<32xi32, #tpu.memory_space<smem>>
      %c0_i32_85 = arith.constant 0 : i32
      %110 = arith.maxsi %109, %c0_i32_85 : i32
      %c499_i32_86 = arith.constant 499 : i32
      %111 = arith.minsi %110, %c499_i32_86 : i32
      %c6_i32_87 = arith.constant 6 : i32
      %c1_i32_88 = arith.constant 1 : i32
      %c0_i32_89 = arith.constant 0 : i32
      %112 = tpu.memref_slice %arg2[%111, %c0_i32_89] : memref<500x128xf32, #tpu.memory_space<any>> -> memref<1x128xf32, #tpu.memory_space<any>>
      %113 = tpu.memref_squeeze %112 : memref<1x128xf32, #tpu.memory_space<any>> -> memref<128xf32, #tpu.memory_space<any>>
      %c0_i32_90 = arith.constant 0 : i32
      %114 = tpu.memref_slice %arg6[%c6_i32_87, %c1_i32_88, %c0_i32_90] : memref<8x8x128xf32, #tpu.memory_space<vmem>> -> memref<1x1x128xf32, #tpu.memory_space<vmem>>
      %115 = tpu.memref_squeeze %114 : memref<1x1x128xf32, #tpu.memory_space<vmem>> -> memref<128xf32, #tpu.memory_space<vmem>>
      tpu.enqueue_dma source(%113 : memref<128xf32, #tpu.memory_space<any>>) target(%115 : memref<128xf32, #tpu.memory_space<vmem>>) target_semaphore(%arg7 : memref<!tpu.dma_semaphore, #tpu.memory_space<semaphore_mem>>)
      %c15 = arith.constant 15 : index
      %116 = memref.load %arg1[%c15] : memref<32xi32, #tpu.memory_space<smem>>
      %c0_i32_91 = arith.constant 0 : i32
      %117 = arith.maxsi %116, %c0_i32_91 : i32
      %c499_i32_92 = arith.constant 499 : i32
      %118 = arith.minsi %117, %c499_i32_92 : i32
      %c7_i32_93 = arith.constant 7 : i32
      %c1_i32_94 = arith.constant 1 : i32
      %c0_i32_95 = arith.constant 0 : i32
      %119 = tpu.memref_slice %arg2[%118, %c0_i32_95] : memref<500x128xf32, #tpu.memory_space<any>> -> memref<1x128xf32, #tpu.memory_space<any>>
      %120 = tpu.memref_squeeze %119 : memref<1x128xf32, #tpu.memory_space<any>> -> memref<128xf32, #tpu.memory_space<any>>
      %c0_i32_96 = arith.constant 0 : i32
      %121 = tpu.memref_slice %arg6[%c7_i32_93, %c1_i32_94, %c0_i32_96] : memref<8x8x128xf32, #tpu.memory_space<vmem>> -> memref<1x1x128xf32, #tpu.memory_space<vmem>>
      %122 = tpu.memref_squeeze %121 : memref<1x1x128xf32, #tpu.memory_space<vmem>> -> memref<128xf32, #tpu.memory_space<vmem>>
      tpu.enqueue_dma source(%120 : memref<128xf32, #tpu.memory_space<any>>) target(%122 : memref<128xf32, #tpu.memory_space<vmem>>) target_semaphore(%arg7 : memref<!tpu.dma_semaphore, #tpu.memory_space<semaphore_mem>>)
      %c16 = arith.constant 16 : index
      %123 = memref.load %arg1[%c16] : memref<32xi32, #tpu.memory_space<smem>>
      %c0_i32_97 = arith.constant 0 : i32
      %124 = arith.maxsi %123, %c0_i32_97 : i32
      %c499_i32_98 = arith.constant 499 : i32
      %125 = arith.minsi %124, %c499_i32_98 : i32
      %c0_i32_99 = arith.constant 0 : i32
      %c2_i32_100 = arith.constant 2 : i32
      %c0_i32_101 = arith.constant 0 : i32
      %126 = tpu.memref_slice %arg2[%125, %c0_i32_101] : memref<500x128xf32, #tpu.memory_space<any>> -> memref<1x128xf32, #tpu.memory_space<any>>
      %127 = tpu.memref_squeeze %126 : memref<1x128xf32, #tpu.memory_space<any>> -> memref<128xf32, #tpu.memory_space<any>>
      %c0_i32_102 = arith.constant 0 : i32
      %128 = tpu.memref_slice %arg6[%c0_i32_99, %c2_i32_100, %c0_i32_102] : memref<8x8x128xf32, #tpu.memory_space<vmem>> -> memref<1x1x128xf32, #tpu.memory_space<vmem>>
      %129 = tpu.memref_squeeze %128 : memref<1x1x128xf32, #tpu.memory_space<vmem>> -> memref<128xf32, #tpu.memory_space<vmem>>
      tpu.enqueue_dma source(%127 : memref<128xf32, #tpu.memory_space<any>>) target(%129 : memref<128xf32, #tpu.memory_space<vmem>>) target_semaphore(%arg7 : memref<!tpu.dma_semaphore, #tpu.memory_space<semaphore_mem>>)
      %c17 = arith.constant 17 : index
      %130 = memref.load %arg1[%c17] : memref<32xi32, #tpu.memory_space<smem>>
      %c0_i32_103 = arith.constant 0 : i32
      %131 = arith.maxsi %130, %c0_i32_103 : i32
      %c499_i32_104 = arith.constant 499 : i32
      %132 = arith.minsi %131, %c499_i32_104 : i32
      %c1_i32_105 = arith.constant 1 : i32
      %c2_i32_106 = arith.constant 2 : i32
      %c0_i32_107 = arith.constant 0 : i32
      %133 = tpu.memref_slice %arg2[%132, %c0_i32_107] : memref<500x128xf32, #tpu.memory_space<any>> -> memref<1x128xf32, #tpu.memory_space<any>>
      %134 = tpu.memref_squeeze %133 : memref<1x128xf32, #tpu.memory_space<any>> -> memref<128xf32, #tpu.memory_space<any>>
      %c0_i32_108 = arith.constant 0 : i32
      %135 = tpu.memref_slice %arg6[%c1_i32_105, %c2_i32_106, %c0_i32_108] : memref<8x8x128xf32, #tpu.memory_space<vmem>> -> memref<1x1x128xf32, #tpu.memory_space<vmem>>
      %136 = tpu.memref_squeeze %135 : memref<1x1x128xf32, #tpu.memory_space<vmem>> -> memref<128xf32, #tpu.memory_space<vmem>>
      tpu.enqueue_dma source(%134 : memref<128xf32, #tpu.memory_space<any>>) target(%136 : memref<128xf32, #tpu.memory_space<vmem>>) target_semaphore(%arg7 : memref<!tpu.dma_semaphore, #tpu.memory_space<semaphore_mem>>)
      %c18 = arith.constant 18 : index
      %137 = memref.load %arg1[%c18] : memref<32xi32, #tpu.memory_space<smem>>
      %c0_i32_109 = arith.constant 0 : i32
      %138 = arith.maxsi %137, %c0_i32_109 : i32
      %c499_i32_110 = arith.constant 499 : i32
      %139 = arith.minsi %138, %c499_i32_110 : i32
      %c2_i32_111 = arith.constant 2 : i32
      %c2_i32_112 = arith.constant 2 : i32
      %c0_i32_113 = arith.constant 0 : i32
      %140 = tpu.memref_slice %arg2[%139, %c0_i32_113] : memref<500x128xf32, #tpu.memory_space<any>> -> memref<1x128xf32, #tpu.memory_space<any>>
      %141 = tpu.memref_squeeze %140 : memref<1x128xf32, #tpu.memory_space<any>> -> memref<128xf32, #tpu.memory_space<any>>
      %c0_i32_114 = arith.constant 0 : i32
      %142 = tpu.memref_slice %arg6[%c2_i32_111, %c2_i32_112, %c0_i32_114] : memref<8x8x128xf32, #tpu.memory_space<vmem>> -> memref<1x1x128xf32, #tpu.memory_space<vmem>>
      %143 = tpu.memref_squeeze %142 : memref<1x1x128xf32, #tpu.memory_space<vmem>> -> memref<128xf32, #tpu.memory_space<vmem>>
      tpu.enqueue_dma source(%141 : memref<128xf32, #tpu.memory_space<any>>) target(%143 : memref<128xf32, #tpu.memory_space<vmem>>) target_semaphore(%arg7 : memref<!tpu.dma_semaphore, #tpu.memory_space<semaphore_mem>>)
      %c19 = arith.constant 19 : index
      %144 = memref.load %arg1[%c19] : memref<32xi32, #tpu.memory_space<smem>>
      %c0_i32_115 = arith.constant 0 : i32
      %145 = arith.maxsi %144, %c0_i32_115 : i32
      %c499_i32_116 = arith.constant 499 : i32
      %146 = arith.minsi %145, %c499_i32_116 : i32
      %c3_i32_117 = arith.constant 3 : i32
      %c2_i32_118 = arith.constant 2 : i32
      %c0_i32_119 = arith.constant 0 : i32
      %147 = tpu.memref_slice %arg2[%146, %c0_i32_119] : memref<500x128xf32, #tpu.memory_space<any>> -> memref<1x128xf32, #tpu.memory_space<any>>
      %148 = tpu.memref_squeeze %147 : memref<1x128xf32, #tpu.memory_space<any>> -> memref<128xf32, #tpu.memory_space<any>>
      %c0_i32_120 = arith.constant 0 : i32
      %149 = tpu.memref_slice %arg6[%c3_i32_117, %c2_i32_118, %c0_i32_120] : memref<8x8x128xf32, #tpu.memory_space<vmem>> -> memref<1x1x128xf32, #tpu.memory_space<vmem>>
      %150 = tpu.memref_squeeze %149 : memref<1x1x128xf32, #tpu.memory_space<vmem>> -> memref<128xf32, #tpu.memory_space<vmem>>
      tpu.enqueue_dma source(%148 : memref<128xf32, #tpu.memory_space<any>>) target(%150 : memref<128xf32, #tpu.memory_space<vmem>>) target_semaphore(%arg7 : memref<!tpu.dma_semaphore, #tpu.memory_space<semaphore_mem>>)
      %c20 = arith.constant 20 : index
      %151 = memref.load %arg1[%c20] : memref<32xi32, #tpu.memory_space<smem>>
      %c0_i32_121 = arith.constant 0 : i32
      %152 = arith.maxsi %151, %c0_i32_121 : i32
      %c499_i32_122 = arith.constant 499 : i32
      %153 = arith.minsi %152, %c499_i32_122 : i32
      %c4_i32_123 = arith.constant 4 : i32
      %c2_i32_124 = arith.constant 2 : i32
      %c0_i32_125 = arith.constant 0 : i32
      %154 = tpu.memref_slice %arg2[%153, %c0_i32_125] : memref<500x128xf32, #tpu.memory_space<any>> -> memref<1x128xf32, #tpu.memory_space<any>>
      %155 = tpu.memref_squeeze %154 : memref<1x128xf32, #tpu.memory_space<any>> -> memref<128xf32, #tpu.memory_space<any>>
      %c0_i32_126 = arith.constant 0 : i32
      %156 = tpu.memref_slice %arg6[%c4_i32_123, %c2_i32_124, %c0_i32_126] : memref<8x8x128xf32, #tpu.memory_space<vmem>> -> memref<1x1x128xf32, #tpu.memory_space<vmem>>
      %157 = tpu.memref_squeeze %156 : memref<1x1x128xf32, #tpu.memory_space<vmem>> -> memref<128xf32, #tpu.memory_space<vmem>>
      tpu.enqueue_dma source(%155 : memref<128xf32, #tpu.memory_space<any>>) target(%157 : memref<128xf32, #tpu.memory_space<vmem>>) target_semaphore(%arg7 : memref<!tpu.dma_semaphore, #tpu.memory_space<semaphore_mem>>)
      %c21 = arith.constant 21 : index
      %158 = memref.load %arg1[%c21] : memref<32xi32, #tpu.memory_space<smem>>
      %c0_i32_127 = arith.constant 0 : i32
      %159 = arith.maxsi %158, %c0_i32_127 : i32
      %c499_i32_128 = arith.constant 499 : i32
      %160 = arith.minsi %159, %c499_i32_128 : i32
      %c5_i32_129 = arith.constant 5 : i32
      %c2_i32_130 = arith.constant 2 : i32
      %c0_i32_131 = arith.constant 0 : i32
      %161 = tpu.memref_slice %arg2[%160, %c0_i32_131] : memref<500x128xf32, #tpu.memory_space<any>> -> memref<1x128xf32, #tpu.memory_space<any>>
      %162 = tpu.memref_squeeze %161 : memref<1x128xf32, #tpu.memory_space<any>> -> memref<128xf32, #tpu.memory_space<any>>
      %c0_i32_132 = arith.constant 0 : i32
      %163 = tpu.memref_slice %arg6[%c5_i32_129, %c2_i32_130, %c0_i32_132] : memref<8x8x128xf32, #tpu.memory_space<vmem>> -> memref<1x1x128xf32, #tpu.memory_space<vmem>>
      %164 = tpu.memref_squeeze %163 : memref<1x1x128xf32, #tpu.memory_space<vmem>> -> memref<128xf32, #tpu.memory_space<vmem>>
      tpu.enqueue_dma source(%162 : memref<128xf32, #tpu.memory_space<any>>) target(%164 : memref<128xf32, #tpu.memory_space<vmem>>) target_semaphore(%arg7 : memref<!tpu.dma_semaphore, #tpu.memory_space<semaphore_mem>>)
      %c22 = arith.constant 22 : index
      %165 = memref.load %arg1[%c22] : memref<32xi32, #tpu.memory_space<smem>>
      %c0_i32_133 = arith.constant 0 : i32
      %166 = arith.maxsi %165, %c0_i32_133 : i32
      %c499_i32_134 = arith.constant 499 : i32
      %167 = arith.minsi %166, %c499_i32_134 : i32
      %c6_i32_135 = arith.constant 6 : i32
      %c2_i32_136 = arith.constant 2 : i32
      %c0_i32_137 = arith.constant 0 : i32
      %168 = tpu.memref_slice %arg2[%167, %c0_i32_137] : memref<500x128xf32, #tpu.memory_space<any>> -> memref<1x128xf32, #tpu.memory_space<any>>
      %169 = tpu.memref_squeeze %168 : memref<1x128xf32, #tpu.memory_space<any>> -> memref<128xf32, #tpu.memory_space<any>>
      %c0_i32_138 = arith.constant 0 : i32
      %170 = tpu.memref_slice %arg6[%c6_i32_135, %c2_i32_136, %c0_i32_138] : memref<8x8x128xf32, #tpu.memory_space<vmem>> -> memref<1x1x128xf32, #tpu.memory_space<vmem>>
      %171 = tpu.memref_squeeze %170 : memref<1x1x128xf32, #tpu.memory_space<vmem>> -> memref<128xf32, #tpu.memory_space<vmem>>
      tpu.enqueue_dma source(%169 : memref<128xf32, #tpu.memory_space<any>>) target(%171 : memref<128xf32, #tpu.memory_space<vmem>>) target_semaphore(%arg7 : memref<!tpu.dma_semaphore, #tpu.memory_space<semaphore_mem>>)
      %c23 = arith.constant 23 : index
      %172 = memref.load %arg1[%c23] : memref<32xi32, #tpu.memory_space<smem>>
      %c0_i32_139 = arith.constant 0 : i32
      %173 = arith.maxsi %172, %c0_i32_139 : i32
      %c499_i32_140 = arith.constant 499 : i32
      %174 = arith.minsi %173, %c499_i32_140 : i32
      %c7_i32_141 = arith.constant 7 : i32
      %c2_i32_142 = arith.constant 2 : i32
      %c0_i32_143 = arith.constant 0 : i32
      %175 = tpu.memref_slice %arg2[%174, %c0_i32_143] : memref<500x128xf32, #tpu.memory_space<any>> -> memref<1x128xf32, #tpu.memory_space<any>>
      %176 = tpu.memref_squeeze %175 : memref<1x128xf32, #tpu.memory_space<any>> -> memref<128xf32, #tpu.memory_space<any>>
      %c0_i32_144 = arith.constant 0 : i32
      %177 = tpu.memref_slice %arg6[%c7_i32_141, %c2_i32_142, %c0_i32_144] : memref<8x8x128xf32, #tpu.memory_space<vmem>> -> memref<1x1x128xf32, #tpu.memory_space<vmem>>
      %178 = tpu.memref_squeeze %177 : memref<1x1x128xf32, #tpu.memory_space<vmem>> -> memref<128xf32, #tpu.memory_space<vmem>>
      tpu.enqueue_dma source(%176 : memref<128xf32, #tpu.memory_space<any>>) target(%178 : memref<128xf32, #tpu.memory_space<vmem>>) target_semaphore(%arg7 : memref<!tpu.dma_semaphore, #tpu.memory_space<semaphore_mem>>)
      %c24 = arith.constant 24 : index
      %179 = memref.load %arg1[%c24] : memref<32xi32, #tpu.memory_space<smem>>
      %c0_i32_145 = arith.constant 0 : i32
      %180 = arith.maxsi %179, %c0_i32_145 : i32
      %c499_i32_146 = arith.constant 499 : i32
      %181 = arith.minsi %180, %c499_i32_146 : i32
      %c0_i32_147 = arith.constant 0 : i32
      %c3_i32_148 = arith.constant 3 : i32
      %c0_i32_149 = arith.constant 0 : i32
      %182 = tpu.memref_slice %arg2[%181, %c0_i32_149] : memref<500x128xf32, #tpu.memory_space<any>> -> memref<1x128xf32, #tpu.memory_space<any>>
      %183 = tpu.memref_squeeze %182 : memref<1x128xf32, #tpu.memory_space<any>> -> memref<128xf32, #tpu.memory_space<any>>
      %c0_i32_150 = arith.constant 0 : i32
      %184 = tpu.memref_slice %arg6[%c0_i32_147, %c3_i32_148, %c0_i32_150] : memref<8x8x128xf32, #tpu.memory_space<vmem>> -> memref<1x1x128xf32, #tpu.memory_space<vmem>>
      %185 = tpu.memref_squeeze %184 : memref<1x1x128xf32, #tpu.memory_space<vmem>> -> memref<128xf32, #tpu.memory_space<vmem>>
      tpu.enqueue_dma source(%183 : memref<128xf32, #tpu.memory_space<any>>) target(%185 : memref<128xf32, #tpu.memory_space<vmem>>) target_semaphore(%arg7 : memref<!tpu.dma_semaphore, #tpu.memory_space<semaphore_mem>>)
      %c25 = arith.constant 25 : index
      %186 = memref.load %arg1[%c25] : memref<32xi32, #tpu.memory_space<smem>>
      %c0_i32_151 = arith.constant 0 : i32
      %187 = arith.maxsi %186, %c0_i32_151 : i32
      %c499_i32_152 = arith.constant 499 : i32
      %188 = arith.minsi %187, %c499_i32_152 : i32
      %c1_i32_153 = arith.constant 1 : i32
      %c3_i32_154 = arith.constant 3 : i32
      %c0_i32_155 = arith.constant 0 : i32
      %189 = tpu.memref_slice %arg2[%188, %c0_i32_155] : memref<500x128xf32, #tpu.memory_space<any>> -> memref<1x128xf32, #tpu.memory_space<any>>
      %190 = tpu.memref_squeeze %189 : memref<1x128xf32, #tpu.memory_space<any>> -> memref<128xf32, #tpu.memory_space<any>>
      %c0_i32_156 = arith.constant 0 : i32
      %191 = tpu.memref_slice %arg6[%c1_i32_153, %c3_i32_154, %c0_i32_156] : memref<8x8x128xf32, #tpu.memory_space<vmem>> -> memref<1x1x128xf32, #tpu.memory_space<vmem>>
      %192 = tpu.memref_squeeze %191 : memref<1x1x128xf32, #tpu.memory_space<vmem>> -> memref<128xf32, #tpu.memory_space<vmem>>
      tpu.enqueue_dma source(%190 : memref<128xf32, #tpu.memory_space<any>>) target(%192 : memref<128xf32, #tpu.memory_space<vmem>>) target_semaphore(%arg7 : memref<!tpu.dma_semaphore, #tpu.memory_space<semaphore_mem>>)
      %c26 = arith.constant 26 : index
      %193 = memref.load %arg1[%c26] : memref<32xi32, #tpu.memory_space<smem>>
      %c0_i32_157 = arith.constant 0 : i32
      %194 = arith.maxsi %193, %c0_i32_157 : i32
      %c499_i32_158 = arith.constant 499 : i32
      %195 = arith.minsi %194, %c499_i32_158 : i32
      %c2_i32_159 = arith.constant 2 : i32
      %c3_i32_160 = arith.constant 3 : i32
      %c0_i32_161 = arith.constant 0 : i32
      %196 = tpu.memref_slice %arg2[%195, %c0_i32_161] : memref<500x128xf32, #tpu.memory_space<any>> -> memref<1x128xf32, #tpu.memory_space<any>>
      %197 = tpu.memref_squeeze %196 : memref<1x128xf32, #tpu.memory_space<any>> -> memref<128xf32, #tpu.memory_space<any>>
      %c0_i32_162 = arith.constant 0 : i32
      %198 = tpu.memref_slice %arg6[%c2_i32_159, %c3_i32_160, %c0_i32_162] : memref<8x8x128xf32, #tpu.memory_space<vmem>> -> memref<1x1x128xf32, #tpu.memory_space<vmem>>
      %199 = tpu.memref_squeeze %198 : memref<1x1x128xf32, #tpu.memory_space<vmem>> -> memref<128xf32, #tpu.memory_space<vmem>>
      tpu.enqueue_dma source(%197 : memref<128xf32, #tpu.memory_space<any>>) target(%199 : memref<128xf32, #tpu.memory_space<vmem>>) target_semaphore(%arg7 : memref<!tpu.dma_semaphore, #tpu.memory_space<semaphore_mem>>)
      %c27 = arith.constant 27 : index
      %200 = memref.load %arg1[%c27] : memref<32xi32, #tpu.memory_space<smem>>
      %c0_i32_163 = arith.constant 0 : i32
      %201 = arith.maxsi %200, %c0_i32_163 : i32
      %c499_i32_164 = arith.constant 499 : i32
      %202 = arith.minsi %201, %c499_i32_164 : i32
      %c3_i32_165 = arith.constant 3 : i32
      %c3_i32_166 = arith.constant 3 : i32
      %c0_i32_167 = arith.constant 0 : i32
      %203 = tpu.memref_slice %arg2[%202, %c0_i32_167] : memref<500x128xf32, #tpu.memory_space<any>> -> memref<1x128xf32, #tpu.memory_space<any>>
      %204 = tpu.memref_squeeze %203 : memref<1x128xf32, #tpu.memory_space<any>> -> memref<128xf32, #tpu.memory_space<any>>
      %c0_i32_168 = arith.constant 0 : i32
      %205 = tpu.memref_slice %arg6[%c3_i32_165, %c3_i32_166, %c0_i32_168] : memref<8x8x128xf32, #tpu.memory_space<vmem>> -> memref<1x1x128xf32, #tpu.memory_space<vmem>>
      %206 = tpu.memref_squeeze %205 : memref<1x1x128xf32, #tpu.memory_space<vmem>> -> memref<128xf32, #tpu.memory_space<vmem>>
      tpu.enqueue_dma source(%204 : memref<128xf32, #tpu.memory_space<any>>) target(%206 : memref<128xf32, #tpu.memory_space<vmem>>) target_semaphore(%arg7 : memref<!tpu.dma_semaphore, #tpu.memory_space<semaphore_mem>>)
      %c28 = arith.constant 28 : index
      %207 = memref.load %arg1[%c28] : memref<32xi32, #tpu.memory_space<smem>>
      %c0_i32_169 = arith.constant 0 : i32
      %208 = arith.maxsi %207, %c0_i32_169 : i32
      %c499_i32_170 = arith.constant 499 : i32
      %209 = arith.minsi %208, %c499_i32_170 : i32
      %c4_i32_171 = arith.constant 4 : i32
      %c3_i32_172 = arith.constant 3 : i32
      %c0_i32_173 = arith.constant 0 : i32
      %210 = tpu.memref_slice %arg2[%209, %c0_i32_173] : memref<500x128xf32, #tpu.memory_space<any>> -> memref<1x128xf32, #tpu.memory_space<any>>
      %211 = tpu.memref_squeeze %210 : memref<1x128xf32, #tpu.memory_space<any>> -> memref<128xf32, #tpu.memory_space<any>>
      %c0_i32_174 = arith.constant 0 : i32
      %212 = tpu.memref_slice %arg6[%c4_i32_171, %c3_i32_172, %c0_i32_174] : memref<8x8x128xf32, #tpu.memory_space<vmem>> -> memref<1x1x128xf32, #tpu.memory_space<vmem>>
      %213 = tpu.memref_squeeze %212 : memref<1x1x128xf32, #tpu.memory_space<vmem>> -> memref<128xf32, #tpu.memory_space<vmem>>
      tpu.enqueue_dma source(%211 : memref<128xf32, #tpu.memory_space<any>>) target(%213 : memref<128xf32, #tpu.memory_space<vmem>>) target_semaphore(%arg7 : memref<!tpu.dma_semaphore, #tpu.memory_space<semaphore_mem>>)
      %c29 = arith.constant 29 : index
      %214 = memref.load %arg1[%c29] : memref<32xi32, #tpu.memory_space<smem>>
      %c0_i32_175 = arith.constant 0 : i32
      %215 = arith.maxsi %214, %c0_i32_175 : i32
      %c499_i32_176 = arith.constant 499 : i32
      %216 = arith.minsi %215, %c499_i32_176 : i32
      %c5_i32_177 = arith.constant 5 : i32
      %c3_i32_178 = arith.constant 3 : i32
      %c0_i32_179 = arith.constant 0 : i32
      %217 = tpu.memref_slice %arg2[%216, %c0_i32_179] : memref<500x128xf32, #tpu.memory_space<any>> -> memref<1x128xf32, #tpu.memory_space<any>>
      %218 = tpu.memref_squeeze %217 : memref<1x128xf32, #tpu.memory_space<any>> -> memref<128xf32, #tpu.memory_space<any>>
      %c0_i32_180 = arith.constant 0 : i32
      %219 = tpu.memref_slice %arg6[%c5_i32_177, %c3_i32_178, %c0_i32_180] : memref<8x8x128xf32, #tpu.memory_space<vmem>> -> memref<1x1x128xf32, #tpu.memory_space<vmem>>
      %220 = tpu.memref_squeeze %219 : memref<1x1x128xf32, #tpu.memory_space<vmem>> -> memref<128xf32, #tpu.memory_space<vmem>>
      tpu.enqueue_dma source(%218 : memref<128xf32, #tpu.memory_space<any>>) target(%220 : memref<128xf32, #tpu.memory_space<vmem>>) target_semaphore(%arg7 : memref<!tpu.dma_semaphore, #tpu.memory_space<semaphore_mem>>)
      %c30 = arith.constant 30 : index
      %221 = memref.load %arg1[%c30] : memref<32xi32, #tpu.memory_space<smem>>
      %c0_i32_181 = arith.constant 0 : i32
      %222 = arith.maxsi %221, %c0_i32_181 : i32
      %c499_i32_182 = arith.constant 499 : i32
      %223 = arith.minsi %222, %c499_i32_182 : i32
      %c6_i32_183 = arith.constant 6 : i32
      %c3_i32_184 = arith.constant 3 : i32
      %c0_i32_185 = arith.constant 0 : i32
      %224 = tpu.memref_slice %arg2[%223, %c0_i32_185] : memref<500x128xf32, #tpu.memory_space<any>> -> memref<1x128xf32, #tpu.memory_space<any>>
      %225 = tpu.memref_squeeze %224 : memref<1x128xf32, #tpu.memory_space<any>> -> memref<128xf32, #tpu.memory_space<any>>
      %c0_i32_186 = arith.constant 0 : i32
      %226 = tpu.memref_slice %arg6[%c6_i32_183, %c3_i32_184, %c0_i32_186] : memref<8x8x128xf32, #tpu.memory_space<vmem>> -> memref<1x1x128xf32, #tpu.memory_space<vmem>>
      %227 = tpu.memref_squeeze %226 : memref<1x1x128xf32, #tpu.memory_space<vmem>> -> memref<128xf32, #tpu.memory_space<vmem>>
      tpu.enqueue_dma source(%225 : memref<128xf32, #tpu.memory_space<any>>) target(%227 : memref<128xf32, #tpu.memory_space<vmem>>) target_semaphore(%arg7 : memref<!tpu.dma_semaphore, #tpu.memory_space<semaphore_mem>>)
      %c31 = arith.constant 31 : index
      %228 = memref.load %arg1[%c31] : memref<32xi32, #tpu.memory_space<smem>>
      %c0_i32_187 = arith.constant 0 : i32
      %229 = arith.maxsi %228, %c0_i32_187 : i32
      %c499_i32_188 = arith.constant 499 : i32
      %230 = arith.minsi %229, %c499_i32_188 : i32
      %c7_i32_189 = arith.constant 7 : i32
      %c3_i32_190 = arith.constant 3 : i32
      %c0_i32_191 = arith.constant 0 : i32
      %231 = tpu.memref_slice %arg2[%230, %c0_i32_191] : memref<500x128xf32, #tpu.memory_space<any>> -> memref<1x128xf32, #tpu.memory_space<any>>
      %232 = tpu.memref_squeeze %231 : memref<1x128xf32, #tpu.memory_space<any>> -> memref<128xf32, #tpu.memory_space<any>>
      %c0_i32_192 = arith.constant 0 : i32
      %233 = tpu.memref_slice %arg6[%c7_i32_189, %c3_i32_190, %c0_i32_192] : memref<8x8x128xf32, #tpu.memory_space<vmem>> -> memref<1x1x128xf32, #tpu.memory_space<vmem>>
      %234 = tpu.memref_squeeze %233 : memref<1x1x128xf32, #tpu.memory_space<vmem>> -> memref<128xf32, #tpu.memory_space<vmem>>
      tpu.enqueue_dma source(%232 : memref<128xf32, #tpu.memory_space<any>>) target(%234 : memref<128xf32, #tpu.memory_space<vmem>>) target_semaphore(%arg7 : memref<!tpu.dma_semaphore, #tpu.memory_space<semaphore_mem>>)
      %c0_i32_193 = arith.constant 0 : i32
      %c0_i32_194 = arith.constant 0 : i32
      %c0_i32_195 = arith.constant 0 : i32
      %235 = tpu.memref_slice %arg2[%13, %c0_i32_195] : memref<500x128xf32, #tpu.memory_space<any>> -> memref<1x128xf32, #tpu.memory_space<any>>
      %236 = tpu.memref_squeeze %235 : memref<1x128xf32, #tpu.memory_space<any>> -> memref<128xf32, #tpu.memory_space<any>>
      %c0_i32_196 = arith.constant 0 : i32
      %237 = tpu.memref_slice %arg6[%c0_i32_193, %c0_i32_194, %c0_i32_196] : memref<8x8x128xf32, #tpu.memory_space<vmem>> -> memref<1x1x128xf32, #tpu.memory_space<vmem>>
      %238 = tpu.memref_squeeze %237 : memref<1x1x128xf32, #tpu.memory_space<vmem>> -> memref<128xf32, #tpu.memory_space<vmem>>
      tpu.wait_dma2 semaphore(%arg7 : memref<!tpu.dma_semaphore, #tpu.memory_space<semaphore_mem>>) src(%236 : memref<128xf32, #tpu.memory_space<any>>) dst(%238 : memref<128xf32, #tpu.memory_space<vmem>>)
      %c1_i32_197 = arith.constant 1 : i32
      %c0_i32_198 = arith.constant 0 : i32
      %c0_i32_199 = arith.constant 0 : i32
      %239 = tpu.memref_slice %arg2[%20, %c0_i32_199] : memref<500x128xf32, #tpu.memory_space<any>> -> memref<1x128xf32, #tpu.memory_space<any>>
      %240 = tpu.memref_squeeze %239 : memref<1x128xf32, #tpu.memory_space<any>> -> memref<128xf32, #tpu.memory_space<any>>
      %c0_i32_200 = arith.constant 0 : i32
      %241 = tpu.memref_slice %arg6[%c1_i32_197, %c0_i32_198, %c0_i32_200] : memref<8x8x128xf32, #tpu.memory_space<vmem>> -> memref<1x1x128xf32, #tpu.memory_space<vmem>>
      %242 = tpu.memref_squeeze %241 : memref<1x1x128xf32, #tpu.memory_space<vmem>> -> memref<128xf32, #tpu.memory_space<vmem>>
      tpu.wait_dma2 semaphore(%arg7 : memref<!tpu.dma_semaphore, #tpu.memory_space<semaphore_mem>>) src(%240 : memref<128xf32, #tpu.memory_space<any>>) dst(%242 : memref<128xf32, #tpu.memory_space<vmem>>)
      %c2_i32_201 = arith.constant 2 : i32
      %c0_i32_202 = arith.constant 0 : i32
      %c0_i32_203 = arith.constant 0 : i32
      %243 = tpu.memref_slice %arg2[%27, %c0_i32_203] : memref<500x128xf32, #tpu.memory_space<any>> -> memref<1x128xf32, #tpu.memory_space<any>>
      %244 = tpu.memref_squeeze %243 : memref<1x128xf32, #tpu.memory_space<any>> -> memref<128xf32, #tpu.memory_space<any>>
      %c0_i32_204 = arith.constant 0 : i32
      %245 = tpu.memref_slice %arg6[%c2_i32_201, %c0_i32_202, %c0_i32_204] : memref<8x8x128xf32, #tpu.memory_space<vmem>> -> memref<1x1x128xf32, #tpu.memory_space<vmem>>
      %246 = tpu.memref_squeeze %245 : memref<1x1x128xf32, #tpu.memory_space<vmem>> -> memref<128xf32, #tpu.memory_space<vmem>>
      tpu.wait_dma2 semaphore(%arg7 : memref<!tpu.dma_semaphore, #tpu.memory_space<semaphore_mem>>) src(%244 : memref<128xf32, #tpu.memory_space<any>>) dst(%246 : memref<128xf32, #tpu.memory_space<vmem>>)
      %c3_i32_205 = arith.constant 3 : i32
      %c0_i32_206 = arith.constant 0 : i32
      %c0_i32_207 = arith.constant 0 : i32
      %247 = tpu.memref_slice %arg2[%34, %c0_i32_207] : memref<500x128xf32, #tpu.memory_space<any>> -> memref<1x128xf32, #tpu.memory_space<any>>
      %248 = tpu.memref_squeeze %247 : memref<1x128xf32, #tpu.memory_space<any>> -> memref<128xf32, #tpu.memory_space<any>>
      %c0_i32_208 = arith.constant 0 : i32
      %249 = tpu.memref_slice %arg6[%c3_i32_205, %c0_i32_206, %c0_i32_208] : memref<8x8x128xf32, #tpu.memory_space<vmem>> -> memref<1x1x128xf32, #tpu.memory_space<vmem>>
      %250 = tpu.memref_squeeze %249 : memref<1x1x128xf32, #tpu.memory_space<vmem>> -> memref<128xf32, #tpu.memory_space<vmem>>
      tpu.wait_dma2 semaphore(%arg7 : memref<!tpu.dma_semaphore, #tpu.memory_space<semaphore_mem>>) src(%248 : memref<128xf32, #tpu.memory_space<any>>) dst(%250 : memref<128xf32, #tpu.memory_space<vmem>>)
      %c4_i32_209 = arith.constant 4 : i32
      %c0_i32_210 = arith.constant 0 : i32
      %c0_i32_211 = arith.constant 0 : i32
      %251 = tpu.memref_slice %arg2[%41, %c0_i32_211] : memref<500x128xf32, #tpu.memory_space<any>> -> memref<1x128xf32, #tpu.memory_space<any>>
      %252 = tpu.memref_squeeze %251 : memref<1x128xf32, #tpu.memory_space<any>> -> memref<128xf32, #tpu.memory_space<any>>
      %c0_i32_212 = arith.constant 0 : i32
      %253 = tpu.memref_slice %arg6[%c4_i32_209, %c0_i32_210, %c0_i32_212] : memref<8x8x128xf32, #tpu.memory_space<vmem>> -> memref<1x1x128xf32, #tpu.memory_space<vmem>>
      %254 = tpu.memref_squeeze %253 : memref<1x1x128xf32, #tpu.memory_space<vmem>> -> memref<128xf32, #tpu.memory_space<vmem>>
      tpu.wait_dma2 semaphore(%arg7 : memref<!tpu.dma_semaphore, #tpu.memory_space<semaphore_mem>>) src(%252 : memref<128xf32, #tpu.memory_space<any>>) dst(%254 : memref<128xf32, #tpu.memory_space<vmem>>)
      %c5_i32_213 = arith.constant 5 : i32
      %c0_i32_214 = arith.constant 0 : i32
      %c0_i32_215 = arith.constant 0 : i32
      %255 = tpu.memref_slice %arg2[%48, %c0_i32_215] : memref<500x128xf32, #tpu.memory_space<any>> -> memref<1x128xf32, #tpu.memory_space<any>>
      %256 = tpu.memref_squeeze %255 : memref<1x128xf32, #tpu.memory_space<any>> -> memref<128xf32, #tpu.memory_space<any>>
      %c0_i32_216 = arith.constant 0 : i32
      %257 = tpu.memref_slice %arg6[%c5_i32_213, %c0_i32_214, %c0_i32_216] : memref<8x8x128xf32, #tpu.memory_space<vmem>> -> memref<1x1x128xf32, #tpu.memory_space<vmem>>
      %258 = tpu.memref_squeeze %257 : memref<1x1x128xf32, #tpu.memory_space<vmem>> -> memref<128xf32, #tpu.memory_space<vmem>>
      tpu.wait_dma2 semaphore(%arg7 : memref<!tpu.dma_semaphore, #tpu.memory_space<semaphore_mem>>) src(%256 : memref<128xf32, #tpu.memory_space<any>>) dst(%258 : memref<128xf32, #tpu.memory_space<vmem>>)
      %c6_i32_217 = arith.constant 6 : i32
      %c0_i32_218 = arith.constant 0 : i32
      %c0_i32_219 = arith.constant 0 : i32
      %259 = tpu.memref_slice %arg2[%55, %c0_i32_219] : memref<500x128xf32, #tpu.memory_space<any>> -> memref<1x128xf32, #tpu.memory_space<any>>
      %260 = tpu.memref_squeeze %259 : memref<1x128xf32, #tpu.memory_space<any>> -> memref<128xf32, #tpu.memory_space<any>>
      %c0_i32_220 = arith.constant 0 : i32
      %261 = tpu.memref_slice %arg6[%c6_i32_217, %c0_i32_218, %c0_i32_220] : memref<8x8x128xf32, #tpu.memory_space<vmem>> -> memref<1x1x128xf32, #tpu.memory_space<vmem>>
      %262 = tpu.memref_squeeze %261 : memref<1x1x128xf32, #tpu.memory_space<vmem>> -> memref<128xf32, #tpu.memory_space<vmem>>
      tpu.wait_dma2 semaphore(%arg7 : memref<!tpu.dma_semaphore, #tpu.memory_space<semaphore_mem>>) src(%260 : memref<128xf32, #tpu.memory_space<any>>) dst(%262 : memref<128xf32, #tpu.memory_space<vmem>>)
      %c7_i32_221 = arith.constant 7 : i32
      %c0_i32_222 = arith.constant 0 : i32
      %c0_i32_223 = arith.constant 0 : i32
      %263 = tpu.memref_slice %arg2[%62, %c0_i32_223] : memref<500x128xf32, #tpu.memory_space<any>> -> memref<1x128xf32, #tpu.memory_space<any>>
      %264 = tpu.memref_squeeze %263 : memref<1x128xf32, #tpu.memory_space<any>> -> memref<128xf32, #tpu.memory_space<any>>
      %c0_i32_224 = arith.constant 0 : i32
      %265 = tpu.memref_slice %arg6[%c7_i32_221, %c0_i32_222, %c0_i32_224] : memref<8x8x128xf32, #tpu.memory_space<vmem>> -> memref<1x1x128xf32, #tpu.memory_space<vmem>>
      %266 = tpu.memref_squeeze %265 : memref<1x1x128xf32, #tpu.memory_space<vmem>> -> memref<128xf32, #tpu.memory_space<vmem>>
      tpu.wait_dma2 semaphore(%arg7 : memref<!tpu.dma_semaphore, #tpu.memory_space<semaphore_mem>>) src(%264 : memref<128xf32, #tpu.memory_space<any>>) dst(%266 : memref<128xf32, #tpu.memory_space<vmem>>)
      %c0_i32_225 = arith.constant 0 : i32
      %c1_i32_226 = arith.constant 1 : i32
      %c0_i32_227 = arith.constant 0 : i32
      %267 = tpu.memref_slice %arg2[%69, %c0_i32_227] : memref<500x128xf32, #tpu.memory_space<any>> -> memref<1x128xf32, #tpu.memory_space<any>>
      %268 = tpu.memref_squeeze %267 : memref<1x128xf32, #tpu.memory_space<any>> -> memref<128xf32, #tpu.memory_space<any>>
      %c0_i32_228 = arith.constant 0 : i32
      %269 = tpu.memref_slice %arg6[%c0_i32_225, %c1_i32_226, %c0_i32_228] : memref<8x8x128xf32, #tpu.memory_space<vmem>> -> memref<1x1x128xf32, #tpu.memory_space<vmem>>
      %270 = tpu.memref_squeeze %269 : memref<1x1x128xf32, #tpu.memory_space<vmem>> -> memref<128xf32, #tpu.memory_space<vmem>>
      tpu.wait_dma2 semaphore(%arg7 : memref<!tpu.dma_semaphore, #tpu.memory_space<semaphore_mem>>) src(%268 : memref<128xf32, #tpu.memory_space<any>>) dst(%270 : memref<128xf32, #tpu.memory_space<vmem>>)
      %c1_i32_229 = arith.constant 1 : i32
      %c1_i32_230 = arith.constant 1 : i32
      %c0_i32_231 = arith.constant 0 : i32
      %271 = tpu.memref_slice %arg2[%76, %c0_i32_231] : memref<500x128xf32, #tpu.memory_space<any>> -> memref<1x128xf32, #tpu.memory_space<any>>
      %272 = tpu.memref_squeeze %271 : memref<1x128xf32, #tpu.memory_space<any>> -> memref<128xf32, #tpu.memory_space<any>>
      %c0_i32_232 = arith.constant 0 : i32
      %273 = tpu.memref_slice %arg6[%c1_i32_229, %c1_i32_230, %c0_i32_232] : memref<8x8x128xf32, #tpu.memory_space<vmem>> -> memref<1x1x128xf32, #tpu.memory_space<vmem>>
      %274 = tpu.memref_squeeze %273 : memref<1x1x128xf32, #tpu.memory_space<vmem>> -> memref<128xf32, #tpu.memory_space<vmem>>
      tpu.wait_dma2 semaphore(%arg7 : memref<!tpu.dma_semaphore, #tpu.memory_space<semaphore_mem>>) src(%272 : memref<128xf32, #tpu.memory_space<any>>) dst(%274 : memref<128xf32, #tpu.memory_space<vmem>>)
      %c2_i32_233 = arith.constant 2 : i32
      %c1_i32_234 = arith.constant 1 : i32
      %c0_i32_235 = arith.constant 0 : i32
      %275 = tpu.memref_slice %arg2[%83, %c0_i32_235] : memref<500x128xf32, #tpu.memory_space<any>> -> memref<1x128xf32, #tpu.memory_space<any>>
      %276 = tpu.memref_squeeze %275 : memref<1x128xf32, #tpu.memory_space<any>> -> memref<128xf32, #tpu.memory_space<any>>
      %c0_i32_236 = arith.constant 0 : i32
      %277 = tpu.memref_slice %arg6[%c2_i32_233, %c1_i32_234, %c0_i32_236] : memref<8x8x128xf32, #tpu.memory_space<vmem>> -> memref<1x1x128xf32, #tpu.memory_space<vmem>>
      %278 = tpu.memref_squeeze %277 : memref<1x1x128xf32, #tpu.memory_space<vmem>> -> memref<128xf32, #tpu.memory_space<vmem>>
      tpu.wait_dma2 semaphore(%arg7 : memref<!tpu.dma_semaphore, #tpu.memory_space<semaphore_mem>>) src(%276 : memref<128xf32, #tpu.memory_space<any>>) dst(%278 : memref<128xf32, #tpu.memory_space<vmem>>)
      %c3_i32_237 = arith.constant 3 : i32
      %c1_i32_238 = arith.constant 1 : i32
      %c0_i32_239 = arith.constant 0 : i32
      %279 = tpu.memref_slice %arg2[%90, %c0_i32_239] : memref<500x128xf32, #tpu.memory_space<any>> -> memref<1x128xf32, #tpu.memory_space<any>>
      %280 = tpu.memref_squeeze %279 : memref<1x128xf32, #tpu.memory_space<any>> -> memref<128xf32, #tpu.memory_space<any>>
      %c0_i32_240 = arith.constant 0 : i32
      %281 = tpu.memref_slice %arg6[%c3_i32_237, %c1_i32_238, %c0_i32_240] : memref<8x8x128xf32, #tpu.memory_space<vmem>> -> memref<1x1x128xf32, #tpu.memory_space<vmem>>
      %282 = tpu.memref_squeeze %281 : memref<1x1x128xf32, #tpu.memory_space<vmem>> -> memref<128xf32, #tpu.memory_space<vmem>>
      tpu.wait_dma2 semaphore(%arg7 : memref<!tpu.dma_semaphore, #tpu.memory_space<semaphore_mem>>) src(%280 : memref<128xf32, #tpu.memory_space<any>>) dst(%282 : memref<128xf32, #tpu.memory_space<vmem>>)
      %c4_i32_241 = arith.constant 4 : i32
      %c1_i32_242 = arith.constant 1 : i32
      %c0_i32_243 = arith.constant 0 : i32
      %283 = tpu.memref_slice %arg2[%97, %c0_i32_243] : memref<500x128xf32, #tpu.memory_space<any>> -> memref<1x128xf32, #tpu.memory_space<any>>
      %284 = tpu.memref_squeeze %283 : memref<1x128xf32, #tpu.memory_space<any>> -> memref<128xf32, #tpu.memory_space<any>>
      %c0_i32_244 = arith.constant 0 : i32
      %285 = tpu.memref_slice %arg6[%c4_i32_241, %c1_i32_242, %c0_i32_244] : memref<8x8x128xf32, #tpu.memory_space<vmem>> -> memref<1x1x128xf32, #tpu.memory_space<vmem>>
      %286 = tpu.memref_squeeze %285 : memref<1x1x128xf32, #tpu.memory_space<vmem>> -> memref<128xf32, #tpu.memory_space<vmem>>
      tpu.wait_dma2 semaphore(%arg7 : memref<!tpu.dma_semaphore, #tpu.memory_space<semaphore_mem>>) src(%284 : memref<128xf32, #tpu.memory_space<any>>) dst(%286 : memref<128xf32, #tpu.memory_space<vmem>>)
      %c5_i32_245 = arith.constant 5 : i32
      %c1_i32_246 = arith.constant 1 : i32
      %c0_i32_247 = arith.constant 0 : i32
      %287 = tpu.memref_slice %arg2[%104, %c0_i32_247] : memref<500x128xf32, #tpu.memory_space<any>> -> memref<1x128xf32, #tpu.memory_space<any>>
      %288 = tpu.memref_squeeze %287 : memref<1x128xf32, #tpu.memory_space<any>> -> memref<128xf32, #tpu.memory_space<any>>
      %c0_i32_248 = arith.constant 0 : i32
      %289 = tpu.memref_slice %arg6[%c5_i32_245, %c1_i32_246, %c0_i32_248] : memref<8x8x128xf32, #tpu.memory_space<vmem>> -> memref<1x1x128xf32, #tpu.memory_space<vmem>>
      %290 = tpu.memref_squeeze %289 : memref<1x1x128xf32, #tpu.memory_space<vmem>> -> memref<128xf32, #tpu.memory_space<vmem>>
      tpu.wait_dma2 semaphore(%arg7 : memref<!tpu.dma_semaphore, #tpu.memory_space<semaphore_mem>>) src(%288 : memref<128xf32, #tpu.memory_space<any>>) dst(%290 : memref<128xf32, #tpu.memory_space<vmem>>)
      %c6_i32_249 = arith.constant 6 : i32
      %c1_i32_250 = arith.constant 1 : i32
      %c0_i32_251 = arith.constant 0 : i32
      %291 = tpu.memref_slice %arg2[%111, %c0_i32_251] : memref<500x128xf32, #tpu.memory_space<any>> -> memref<1x128xf32, #tpu.memory_space<any>>
      %292 = tpu.memref_squeeze %291 : memref<1x128xf32, #tpu.memory_space<any>> -> memref<128xf32, #tpu.memory_space<any>>
      %c0_i32_252 = arith.constant 0 : i32
      %293 = tpu.memref_slice %arg6[%c6_i32_249, %c1_i32_250, %c0_i32_252] : memref<8x8x128xf32, #tpu.memory_space<vmem>> -> memref<1x1x128xf32, #tpu.memory_space<vmem>>
      %294 = tpu.memref_squeeze %293 : memref<1x1x128xf32, #tpu.memory_space<vmem>> -> memref<128xf32, #tpu.memory_space<vmem>>
      tpu.wait_dma2 semaphore(%arg7 : memref<!tpu.dma_semaphore, #tpu.memory_space<semaphore_mem>>) src(%292 : memref<128xf32, #tpu.memory_space<any>>) dst(%294 : memref<128xf32, #tpu.memory_space<vmem>>)
      %c7_i32_253 = arith.constant 7 : i32
      %c1_i32_254 = arith.constant 1 : i32
      %c0_i32_255 = arith.constant 0 : i32
      %295 = tpu.memref_slice %arg2[%118, %c0_i32_255] : memref<500x128xf32, #tpu.memory_space<any>> -> memref<1x128xf32, #tpu.memory_space<any>>
      %296 = tpu.memref_squeeze %295 : memref<1x128xf32, #tpu.memory_space<any>> -> memref<128xf32, #tpu.memory_space<any>>
      %c0_i32_256 = arith.constant 0 : i32
      %297 = tpu.memref_slice %arg6[%c7_i32_253, %c1_i32_254, %c0_i32_256] : memref<8x8x128xf32, #tpu.memory_space<vmem>> -> memref<1x1x128xf32, #tpu.memory_space<vmem>>
      %298 = tpu.memref_squeeze %297 : memref<1x1x128xf32, #tpu.memory_space<vmem>> -> memref<128xf32, #tpu.memory_space<vmem>>
      tpu.wait_dma2 semaphore(%arg7 : memref<!tpu.dma_semaphore, #tpu.memory_space<semaphore_mem>>) src(%296 : memref<128xf32, #tpu.memory_space<any>>) dst(%298 : memref<128xf32, #tpu.memory_space<vmem>>)
      %c0_i32_257 = arith.constant 0 : i32
      %c2_i32_258 = arith.constant 2 : i32
      %c0_i32_259 = arith.constant 0 : i32
      %299 = tpu.memref_slice %arg2[%125, %c0_i32_259] : memref<500x128xf32, #tpu.memory_space<any>> -> memref<1x128xf32, #tpu.memory_space<any>>
      %300 = tpu.memref_squeeze %299 : memref<1x128xf32, #tpu.memory_space<any>> -> memref<128xf32, #tpu.memory_space<any>>
      %c0_i32_260 = arith.constant 0 : i32
      %301 = tpu.memref_slice %arg6[%c0_i32_257, %c2_i32_258, %c0_i32_260] : memref<8x8x128xf32, #tpu.memory_space<vmem>> -> memref<1x1x128xf32, #tpu.memory_space<vmem>>
      %302 = tpu.memref_squeeze %301 : memref<1x1x128xf32, #tpu.memory_space<vmem>> -> memref<128xf32, #tpu.memory_space<vmem>>
      tpu.wait_dma2 semaphore(%arg7 : memref<!tpu.dma_semaphore, #tpu.memory_space<semaphore_mem>>) src(%300 : memref<128xf32, #tpu.memory_space<any>>) dst(%302 : memref<128xf32, #tpu.memory_space<vmem>>)
      %c1_i32_261 = arith.constant 1 : i32
      %c2_i32_262 = arith.constant 2 : i32
      %c0_i32_263 = arith.constant 0 : i32
      %303 = tpu.memref_slice %arg2[%132, %c0_i32_263] : memref<500x128xf32, #tpu.memory_space<any>> -> memref<1x128xf32, #tpu.memory_space<any>>
      %304 = tpu.memref_squeeze %303 : memref<1x128xf32, #tpu.memory_space<any>> -> memref<128xf32, #tpu.memory_space<any>>
      %c0_i32_264 = arith.constant 0 : i32
      %305 = tpu.memref_slice %arg6[%c1_i32_261, %c2_i32_262, %c0_i32_264] : memref<8x8x128xf32, #tpu.memory_space<vmem>> -> memref<1x1x128xf32, #tpu.memory_space<vmem>>
      %306 = tpu.memref_squeeze %305 : memref<1x1x128xf32, #tpu.memory_space<vmem>> -> memref<128xf32, #tpu.memory_space<vmem>>
      tpu.wait_dma2 semaphore(%arg7 : memref<!tpu.dma_semaphore, #tpu.memory_space<semaphore_mem>>) src(%304 : memref<128xf32, #tpu.memory_space<any>>) dst(%306 : memref<128xf32, #tpu.memory_space<vmem>>)
      %c2_i32_265 = arith.constant 2 : i32
      %c2_i32_266 = arith.constant 2 : i32
      %c0_i32_267 = arith.constant 0 : i32
      %307 = tpu.memref_slice %arg2[%139, %c0_i32_267] : memref<500x128xf32, #tpu.memory_space<any>> -> memref<1x128xf32, #tpu.memory_space<any>>
      %308 = tpu.memref_squeeze %307 : memref<1x128xf32, #tpu.memory_space<any>> -> memref<128xf32, #tpu.memory_space<any>>
      %c0_i32_268 = arith.constant 0 : i32
      %309 = tpu.memref_slice %arg6[%c2_i32_265, %c2_i32_266, %c0_i32_268] : memref<8x8x128xf32, #tpu.memory_space<vmem>> -> memref<1x1x128xf32, #tpu.memory_space<vmem>>
      %310 = tpu.memref_squeeze %309 : memref<1x1x128xf32, #tpu.memory_space<vmem>> -> memref<128xf32, #tpu.memory_space<vmem>>
      tpu.wait_dma2 semaphore(%arg7 : memref<!tpu.dma_semaphore, #tpu.memory_space<semaphore_mem>>) src(%308 : memref<128xf32, #tpu.memory_space<any>>) dst(%310 : memref<128xf32, #tpu.memory_space<vmem>>)
      %c3_i32_269 = arith.constant 3 : i32
      %c2_i32_270 = arith.constant 2 : i32
      %c0_i32_271 = arith.constant 0 : i32
      %311 = tpu.memref_slice %arg2[%146, %c0_i32_271] : memref<500x128xf32, #tpu.memory_space<any>> -> memref<1x128xf32, #tpu.memory_space<any>>
      %312 = tpu.memref_squeeze %311 : memref<1x128xf32, #tpu.memory_space<any>> -> memref<128xf32, #tpu.memory_space<any>>
      %c0_i32_272 = arith.constant 0 : i32
      %313 = tpu.memref_slice %arg6[%c3_i32_269, %c2_i32_270, %c0_i32_272] : memref<8x8x128xf32, #tpu.memory_space<vmem>> -> memref<1x1x128xf32, #tpu.memory_space<vmem>>
      %314 = tpu.memref_squeeze %313 : memref<1x1x128xf32, #tpu.memory_space<vmem>> -> memref<128xf32, #tpu.memory_space<vmem>>
      tpu.wait_dma2 semaphore(%arg7 : memref<!tpu.dma_semaphore, #tpu.memory_space<semaphore_mem>>) src(%312 : memref<128xf32, #tpu.memory_space<any>>) dst(%314 : memref<128xf32, #tpu.memory_space<vmem>>)
      %c4_i32_273 = arith.constant 4 : i32
      %c2_i32_274 = arith.constant 2 : i32
      %c0_i32_275 = arith.constant 0 : i32
      %315 = tpu.memref_slice %arg2[%153, %c0_i32_275] : memref<500x128xf32, #tpu.memory_space<any>> -> memref<1x128xf32, #tpu.memory_space<any>>
      %316 = tpu.memref_squeeze %315 : memref<1x128xf32, #tpu.memory_space<any>> -> memref<128xf32, #tpu.memory_space<any>>
      %c0_i32_276 = arith.constant 0 : i32
      %317 = tpu.memref_slice %arg6[%c4_i32_273, %c2_i32_274, %c0_i32_276] : memref<8x8x128xf32, #tpu.memory_space<vmem>> -> memref<1x1x128xf32, #tpu.memory_space<vmem>>
      %318 = tpu.memref_squeeze %317 : memref<1x1x128xf32, #tpu.memory_space<vmem>> -> memref<128xf32, #tpu.memory_space<vmem>>
      tpu.wait_dma2 semaphore(%arg7 : memref<!tpu.dma_semaphore, #tpu.memory_space<semaphore_mem>>) src(%316 : memref<128xf32, #tpu.memory_space<any>>) dst(%318 : memref<128xf32, #tpu.memory_space<vmem>>)
      %c5_i32_277 = arith.constant 5 : i32
      %c2_i32_278 = arith.constant 2 : i32
      %c0_i32_279 = arith.constant 0 : i32
      %319 = tpu.memref_slice %arg2[%160, %c0_i32_279] : memref<500x128xf32, #tpu.memory_space<any>> -> memref<1x128xf32, #tpu.memory_space<any>>
      %320 = tpu.memref_squeeze %319 : memref<1x128xf32, #tpu.memory_space<any>> -> memref<128xf32, #tpu.memory_space<any>>
      %c0_i32_280 = arith.constant 0 : i32
      %321 = tpu.memref_slice %arg6[%c5_i32_277, %c2_i32_278, %c0_i32_280] : memref<8x8x128xf32, #tpu.memory_space<vmem>> -> memref<1x1x128xf32, #tpu.memory_space<vmem>>
      %322 = tpu.memref_squeeze %321 : memref<1x1x128xf32, #tpu.memory_space<vmem>> -> memref<128xf32, #tpu.memory_space<vmem>>
      tpu.wait_dma2 semaphore(%arg7 : memref<!tpu.dma_semaphore, #tpu.memory_space<semaphore_mem>>) src(%320 : memref<128xf32, #tpu.memory_space<any>>) dst(%322 : memref<128xf32, #tpu.memory_space<vmem>>)
      %c6_i32_281 = arith.constant 6 : i32
      %c2_i32_282 = arith.constant 2 : i32
      %c0_i32_283 = arith.constant 0 : i32
      %323 = tpu.memref_slice %arg2[%167, %c0_i32_283] : memref<500x128xf32, #tpu.memory_space<any>> -> memref<1x128xf32, #tpu.memory_space<any>>
      %324 = tpu.memref_squeeze %323 : memref<1x128xf32, #tpu.memory_space<any>> -> memref<128xf32, #tpu.memory_space<any>>
      %c0_i32_284 = arith.constant 0 : i32
      %325 = tpu.memref_slice %arg6[%c6_i32_281, %c2_i32_282, %c0_i32_284] : memref<8x8x128xf32, #tpu.memory_space<vmem>> -> memref<1x1x128xf32, #tpu.memory_space<vmem>>
      %326 = tpu.memref_squeeze %325 : memref<1x1x128xf32, #tpu.memory_space<vmem>> -> memref<128xf32, #tpu.memory_space<vmem>>
      tpu.wait_dma2 semaphore(%arg7 : memref<!tpu.dma_semaphore, #tpu.memory_space<semaphore_mem>>) src(%324 : memref<128xf32, #tpu.memory_space<any>>) dst(%326 : memref<128xf32, #tpu.memory_space<vmem>>)
      %c7_i32_285 = arith.constant 7 : i32
      %c2_i32_286 = arith.constant 2 : i32
      %c0_i32_287 = arith.constant 0 : i32
      %327 = tpu.memref_slice %arg2[%174, %c0_i32_287] : memref<500x128xf32, #tpu.memory_space<any>> -> memref<1x128xf32, #tpu.memory_space<any>>
      %328 = tpu.memref_squeeze %327 : memref<1x128xf32, #tpu.memory_space<any>> -> memref<128xf32, #tpu.memory_space<any>>
      %c0_i32_288 = arith.constant 0 : i32
      %329 = tpu.memref_slice %arg6[%c7_i32_285, %c2_i32_286, %c0_i32_288] : memref<8x8x128xf32, #tpu.memory_space<vmem>> -> memref<1x1x128xf32, #tpu.memory_space<vmem>>
      %330 = tpu.memref_squeeze %329 : memref<1x1x128xf32, #tpu.memory_space<vmem>> -> memref<128xf32, #tpu.memory_space<vmem>>
      tpu.wait_dma2 semaphore(%arg7 : memref<!tpu.dma_semaphore, #tpu.memory_space<semaphore_mem>>) src(%328 : memref<128xf32, #tpu.memory_space<any>>) dst(%330 : memref<128xf32, #tpu.memory_space<vmem>>)
      %c0_i32_289 = arith.constant 0 : i32
      %c3_i32_290 = arith.constant 3 : i32
      %c0_i32_291 = arith.constant 0 : i32
      %331 = tpu.memref_slice %arg2[%181, %c0_i32_291] : memref<500x128xf32, #tpu.memory_space<any>> -> memref<1x128xf32, #tpu.memory_space<any>>
      %332 = tpu.memref_squeeze %331 : memref<1x128xf32, #tpu.memory_space<any>> -> memref<128xf32, #tpu.memory_space<any>>
      %c0_i32_292 = arith.constant 0 : i32
      %333 = tpu.memref_slice %arg6[%c0_i32_289, %c3_i32_290, %c0_i32_292] : memref<8x8x128xf32, #tpu.memory_space<vmem>> -> memref<1x1x128xf32, #tpu.memory_space<vmem>>
      %334 = tpu.memref_squeeze %333 : memref<1x1x128xf32, #tpu.memory_space<vmem>> -> memref<128xf32, #tpu.memory_space<vmem>>
      tpu.wait_dma2 semaphore(%arg7 : memref<!tpu.dma_semaphore, #tpu.memory_space<semaphore_mem>>) src(%332 : memref<128xf32, #tpu.memory_space<any>>) dst(%334 : memref<128xf32, #tpu.memory_space<vmem>>)
      %c1_i32_293 = arith.constant 1 : i32
      %c3_i32_294 = arith.constant 3 : i32
      %c0_i32_295 = arith.constant 0 : i32
      %335 = tpu.memref_slice %arg2[%188, %c0_i32_295] : memref<500x128xf32, #tpu.memory_space<any>> -> memref<1x128xf32, #tpu.memory_space<any>>
      %336 = tpu.memref_squeeze %335 : memref<1x128xf32, #tpu.memory_space<any>> -> memref<128xf32, #tpu.memory_space<any>>
      %c0_i32_296 = arith.constant 0 : i32
      %337 = tpu.memref_slice %arg6[%c1_i32_293, %c3_i32_294, %c0_i32_296] : memref<8x8x128xf32, #tpu.memory_space<vmem>> -> memref<1x1x128xf32, #tpu.memory_space<vmem>>
      %338 = tpu.memref_squeeze %337 : memref<1x1x128xf32, #tpu.memory_space<vmem>> -> memref<128xf32, #tpu.memory_space<vmem>>
      tpu.wait_dma2 semaphore(%arg7 : memref<!tpu.dma_semaphore, #tpu.memory_space<semaphore_mem>>) src(%336 : memref<128xf32, #tpu.memory_space<any>>) dst(%338 : memref<128xf32, #tpu.memory_space<vmem>>)
      %c2_i32_297 = arith.constant 2 : i32
      %c3_i32_298 = arith.constant 3 : i32
      %c0_i32_299 = arith.constant 0 : i32
      %339 = tpu.memref_slice %arg2[%195, %c0_i32_299] : memref<500x128xf32, #tpu.memory_space<any>> -> memref<1x128xf32, #tpu.memory_space<any>>
      %340 = tpu.memref_squeeze %339 : memref<1x128xf32, #tpu.memory_space<any>> -> memref<128xf32, #tpu.memory_space<any>>
      %c0_i32_300 = arith.constant 0 : i32
      %341 = tpu.memref_slice %arg6[%c2_i32_297, %c3_i32_298, %c0_i32_300] : memref<8x8x128xf32, #tpu.memory_space<vmem>> -> memref<1x1x128xf32, #tpu.memory_space<vmem>>
      %342 = tpu.memref_squeeze %341 : memref<1x1x128xf32, #tpu.memory_space<vmem>> -> memref<128xf32, #tpu.memory_space<vmem>>
      tpu.wait_dma2 semaphore(%arg7 : memref<!tpu.dma_semaphore, #tpu.memory_space<semaphore_mem>>) src(%340 : memref<128xf32, #tpu.memory_space<any>>) dst(%342 : memref<128xf32, #tpu.memory_space<vmem>>)
      %c3_i32_301 = arith.constant 3 : i32
      %c3_i32_302 = arith.constant 3 : i32
      %c0_i32_303 = arith.constant 0 : i32
      %343 = tpu.memref_slice %arg2[%202, %c0_i32_303] : memref<500x128xf32, #tpu.memory_space<any>> -> memref<1x128xf32, #tpu.memory_space<any>>
      %344 = tpu.memref_squeeze %343 : memref<1x128xf32, #tpu.memory_space<any>> -> memref<128xf32, #tpu.memory_space<any>>
      %c0_i32_304 = arith.constant 0 : i32
      %345 = tpu.memref_slice %arg6[%c3_i32_301, %c3_i32_302, %c0_i32_304] : memref<8x8x128xf32, #tpu.memory_space<vmem>> -> memref<1x1x128xf32, #tpu.memory_space<vmem>>
      %346 = tpu.memref_squeeze %345 : memref<1x1x128xf32, #tpu.memory_space<vmem>> -> memref<128xf32, #tpu.memory_space<vmem>>
      tpu.wait_dma2 semaphore(%arg7 : memref<!tpu.dma_semaphore, #tpu.memory_space<semaphore_mem>>) src(%344 : memref<128xf32, #tpu.memory_space<any>>) dst(%346 : memref<128xf32, #tpu.memory_space<vmem>>)
      %c4_i32_305 = arith.constant 4 : i32
      %c3_i32_306 = arith.constant 3 : i32
      %c0_i32_307 = arith.constant 0 : i32
      %347 = tpu.memref_slice %arg2[%209, %c0_i32_307] : memref<500x128xf32, #tpu.memory_space<any>> -> memref<1x128xf32, #tpu.memory_space<any>>
      %348 = tpu.memref_squeeze %347 : memref<1x128xf32, #tpu.memory_space<any>> -> memref<128xf32, #tpu.memory_space<any>>
      %c0_i32_308 = arith.constant 0 : i32
      %349 = tpu.memref_slice %arg6[%c4_i32_305, %c3_i32_306, %c0_i32_308] : memref<8x8x128xf32, #tpu.memory_space<vmem>> -> memref<1x1x128xf32, #tpu.memory_space<vmem>>
      %350 = tpu.memref_squeeze %349 : memref<1x1x128xf32, #tpu.memory_space<vmem>> -> memref<128xf32, #tpu.memory_space<vmem>>
      tpu.wait_dma2 semaphore(%arg7 : memref<!tpu.dma_semaphore, #tpu.memory_space<semaphore_mem>>) src(%348 : memref<128xf32, #tpu.memory_space<any>>) dst(%350 : memref<128xf32, #tpu.memory_space<vmem>>)
      %c5_i32_309 = arith.constant 5 : i32
      %c3_i32_310 = arith.constant 3 : i32
      %c0_i32_311 = arith.constant 0 : i32
      %351 = tpu.memref_slice %arg2[%216, %c0_i32_311] : memref<500x128xf32, #tpu.memory_space<any>> -> memref<1x128xf32, #tpu.memory_space<any>>
      %352 = tpu.memref_squeeze %351 : memref<1x128xf32, #tpu.memory_space<any>> -> memref<128xf32, #tpu.memory_space<any>>
      %c0_i32_312 = arith.constant 0 : i32
      %353 = tpu.memref_slice %arg6[%c5_i32_309, %c3_i32_310, %c0_i32_312] : memref<8x8x128xf32, #tpu.memory_space<vmem>> -> memref<1x1x128xf32, #tpu.memory_space<vmem>>
      %354 = tpu.memref_squeeze %353 : memref<1x1x128xf32, #tpu.memory_space<vmem>> -> memref<128xf32, #tpu.memory_space<vmem>>
      tpu.wait_dma2 semaphore(%arg7 : memref<!tpu.dma_semaphore, #tpu.memory_space<semaphore_mem>>) src(%352 : memref<128xf32, #tpu.memory_space<any>>) dst(%354 : memref<128xf32, #tpu.memory_space<vmem>>)
      %c6_i32_313 = arith.constant 6 : i32
      %c3_i32_314 = arith.constant 3 : i32
      %c0_i32_315 = arith.constant 0 : i32
      %355 = tpu.memref_slice %arg2[%223, %c0_i32_315] : memref<500x128xf32, #tpu.memory_space<any>> -> memref<1x128xf32, #tpu.memory_space<any>>
      %356 = tpu.memref_squeeze %355 : memref<1x128xf32, #tpu.memory_space<any>> -> memref<128xf32, #tpu.memory_space<any>>
      %c0_i32_316 = arith.constant 0 : i32
      %357 = tpu.memref_slice %arg6[%c6_i32_313, %c3_i32_314, %c0_i32_316] : memref<8x8x128xf32, #tpu.memory_space<vmem>> -> memref<1x1x128xf32, #tpu.memory_space<vmem>>
      %358 = tpu.memref_squeeze %357 : memref<1x1x128xf32, #tpu.memory_space<vmem>> -> memref<128xf32, #tpu.memory_space<vmem>>
      tpu.wait_dma2 semaphore(%arg7 : memref<!tpu.dma_semaphore, #tpu.memory_space<semaphore_mem>>) src(%356 : memref<128xf32, #tpu.memory_space<any>>) dst(%358 : memref<128xf32, #tpu.memory_space<vmem>>)
      %c7_i32_317 = arith.constant 7 : i32
      %c3_i32_318 = arith.constant 3 : i32
      %c0_i32_319 = arith.constant 0 : i32
      %359 = tpu.memref_slice %arg2[%230, %c0_i32_319] : memref<500x128xf32, #tpu.memory_space<any>> -> memref<1x128xf32, #tpu.memory_space<any>>
      %360 = tpu.memref_squeeze %359 : memref<1x128xf32, #tpu.memory_space<any>> -> memref<128xf32, #tpu.memory_space<any>>
      %c0_i32_320 = arith.constant 0 : i32
      %361 = tpu.memref_slice %arg6[%c7_i32_317, %c3_i32_318, %c0_i32_320] : memref<8x8x128xf32, #tpu.memory_space<vmem>> -> memref<1x1x128xf32, #tpu.memory_space<vmem>>
      %362 = tpu.memref_squeeze %361 : memref<1x1x128xf32, #tpu.memory_space<vmem>> -> memref<128xf32, #tpu.memory_space<vmem>>
      tpu.wait_dma2 semaphore(%arg7 : memref<!tpu.dma_semaphore, #tpu.memory_space<semaphore_mem>>) src(%360 : memref<128xf32, #tpu.memory_space<any>>) dst(%362 : memref<128xf32, #tpu.memory_space<vmem>>)
      %c0_321 = arith.constant 0 : index
      %c0_322 = arith.constant 0 : index
      %c0_323 = arith.constant 0 : index
      %363 = vector.load %arg6[%c0_321, %c0_322, %c0_323] : memref<8x8x128xf32, #tpu.memory_space<vmem>>, vector<8x8x128xf32>
      %cst_324 = arith.constant dense<0.000000e+00> : vector<8x128xf32>
      %364 = vector.multi_reduction <add>, %363, %cst_324 [0] : vector<8x8x128xf32> to vector<8x128xf32>
      %365 = tpu.iota {dimensions = array<i32: 0>} : vector<8x128xi32>
      %c4_i32_325 = arith.constant 4 : i32
      %366 = vector.broadcast %c4_i32_325 : i32 to vector<8x128xi32>
      %367 = arith.cmpi slt, %365, %366 : vector<8x128xi32>
      %cst_326 = arith.constant 1.250000e-01 : f32
      %368 = vector.broadcast %cst_326 : f32 to vector<8x128xf32>
      %369 = arith.mulf %364, %368 : vector<8x128xf32>
      %cst_327 = arith.constant 0.000000e+00 : f32
      %370 = vector.broadcast %cst_327 : f32 to vector<8x128xf32>
      %371 = arith.select %367, %369, %370 : vector<8x128xi1>, vector<8x128xf32>
      %c0_328 = arith.constant 0 : index
      %c0_329 = arith.constant 0 : index
      %372 = vector.load %arg8[%c0_328, %c0_329] : memref<8x128xf32, #tpu.memory_space<vmem>>, vector<8x128xf32>
      tpu.vector_store %arg8[%c0_328, %c0_329], %371 {strides = array<i32>} : memref<8x128xf32, #tpu.memory_space<vmem>>, vector<8x128xf32>,
    } else {
    }
    %c0 = arith.constant 0 : index
    %c0_1 = arith.constant 0 : index
    %3 = vector.load %arg8[%c0, %c0_1] : memref<8x128xf32, #tpu.memory_space<vmem>>, vector<8x128xf32>
    %4 = arith.truncf %3 : vector<8x128xf32> to vector<8x128xbf16>
    %c0_2 = arith.constant 0 : index
    %c0_3 = arith.constant 0 : index
    %5 = vector.load %arg3[%c0_2, %c0_3] : memref<128x512xbf16, #tpu.memory_space<vmem>>, vector<128x512xbf16>
    %cst = arith.constant dense<0.000000e+00> : vector<8x512xf32>
    %6 = tpu.matmul %4, %5, %cst {dimension_numbers = #tpu.dot_dimension_numbers<[1], [0], [0], [1], [0, 0, 1, 1], [], []>} : vector<8x128xbf16>, vector<128x512xbf16>, vector<8x512xf32> -> vector<8x512xf32>
    %c0_4 = arith.constant 0 : index
    %c0_5 = arith.constant 0 : index
    %7 = vector.load %arg4[%c0_4, %c0_5] : memref<1x512xf32, #tpu.memory_space<vmem>>, vector<1x512xf32>
    %8 = vector.broadcast %7 : vector<1x512xf32> to vector<8x512xf32>
    %9 = arith.addf %6, %8 : vector<8x512xf32>
    %c0_6 = arith.constant 0 : index
    %c0_7 = arith.constant 0 : index
    %10 = vector.load %arg5[%c0_6, %c0_7] : memref<8x512xf32, #tpu.memory_space<vmem>>, vector<8x512xf32>
    tpu.vector_store %arg5[%c0_6, %c0_7], %9 {strides = array<i32>} : memref<8x512xf32, #tpu.memory_space<vmem>>, vector<8x512xf32>,
    return
  }
  func.func @transform_1(%arg0: i32, %arg1: memref<32xi32, #tpu.memory_space<smem>>) -> (i32, i32) {
    %c0_i32 = arith.constant 0 : i32
    %c0_i32_0 = arith.constant 0 : i32
    return %c0_i32, %arg0 : i32, i32
  }
  func.func @transform_2(%arg0: i32, %arg1: memref<32xi32, #tpu.memory_space<smem>>) -> (i32, i32) {
    %c0_i32 = arith.constant 0 : i32
    %c0_i32_0 = arith.constant 0 : i32
    return %c0_i32, %arg0 : i32, i32
  }
  func.func @transform_3(%arg0: i32, %arg1: memref<32xi32, #tpu.memory_space<smem>>) -> (i32, i32) {
    %c0_i32 = arith.constant 0 : i32
    %c0_i32_0 = arith.constant 0 : i32
    return %c0_i32, %arg0 : i32, i32
  }
}

</mosaic_0001>

<bundles_post_ra>
// kernel: _word2vec_forward.1
= control target key start
LH: loop header
LB: loop body
LE: loop exit
PB: predicated region body
PF: predicated region fallthrough
CT: control target
= control target key end

     0   :  { %s3090_s0 = inlined_call_operand.vmem [shape: s32[32], index: 0, kind: input, shape index: {}]   ;;  %s3091_s1 = inlined_call_operand.hbm [shape: f32[500,128], index: 1, kind: input, shape index: {}]   ;;  %s3092_s2 = inlined_call_operand.hbm [shape: bf16[128,512], index: 2, kind: input, shape index: {}]   ;;  %s3093_s3 = inlined_call_operand.vmem [shape: f32[1,512], index: 3, kind: input, shape index: {}]   ;;  %s3094_s4 = inlined_call_operand.vmem [shape: f32[8,512], index: 4, kind: output, shape index: {}]  }
   0x1   :  { %s9_s17 = sshll.u32 %s3090_s0, 4  ;;  %s10_s17 = int_to_ptr.vmem [resolvable:$true] %s9_s17 }
   0x2   :  { %s1518_s18 = scalar_lea.vmem %s10_s17, 16  ;;  %p1523_p1 = scmp.lt.s32.totalorder %s10_s17, %s10_s17 }
   0x3   :  { %p1519_p0 = scmp.ne.s32.totalorder %s10_s17, %s1518_s18  ;;  %p1524_p2 = scmp.lt.s32.totalorder %s1518_s18, %s1518_s18 }
   0x5   :  { %p1525_p3 = por %p1524_p2, %p1523_p1 }
   0x7   :  { %p1526_p4 = pnand %p1525_p3, %p1519_p0 }
   0x9   :  { %1529 = shalt.err (!%p1526_p4)  }
   0xa   :  { %s2326_s19 = smov [#allocation6]  }
   0xb   :  { %12 = dma.vmem_to_smem %s10_s17, 16, %s2326_s19, [#allocation5] }
   0xc   :  { %2320 = dma.done.wait [#allocation5], 16 }
   0xd   :  { %2321 = vsyncadd [#allocation5], 4294967280 }
   0xe   :  { %14 = sfence }
   0xf   :  { %15 = vsyncpa [#allocation8], 0  ;;  %s2327_s20 = smov [#allocation7]   ;;  %s1530_s0 = scalar_lea.hbm %s3092_s2, 4096 }
  0x10   :  { %s21_s21 = sshll.u32 %s2327_s20, 4  ;;  %p1531_p5 = scmp.ne.s32.totalorder %s3092_s2, %s1530_s0  ;;  %s22_s21 = int_to_ptr.vmem [resolvable:$true] %s21_s21 }
  0x11   :  { %p1534_p6 = scmp.lt.u32.totalorder %s1530_s0, %s3092_s2 }
  0x13   :  { %p1536_p7 = pnand %p1534_p6, %p1531_p5 }
  0x15   :  { %1539 = shalt.err (!%p1536_p7)
}
  0x16   :  { %s1540_s28 = scalar_lea.vmem %s22_s21, 4096  ;;  %p1545_p9 = scmp.lt.s32.totalorder %s22_s21, %s22_s21 }
  0x17   :  { %p1541_p8 = scmp.ne.s32.totalorder %s22_s21, %s1540_s28  ;;  %p1546_p10 = scmp.lt.s32.totalorder %s1540_s28, %s1540_s28 }
  0x19   :  { %p1547_p11 = por %p1546_p10, %p1545_p9 }
  0x1b   :  { %p1548_p12 = pnand %p1547_p11, %p1541_p8 }
  0x1d   :  { %1551 = shalt.err (!%p1548_p12)
}
  0x1e   :  { %s2328_s29 = smov 256   ;;  %s2329_s30 = smov 16  }
  0x1f   :  { %27 = dma.hbm_to_vmem [thread:$0]  %s3092_s2, 4096, %s22_s21, [#allocation8], %s2328_s29, %s2328_s29, %s2329_s30  }
  0x20   :  { %2322 = dma.done.wait [#allocation8], 4096  }
  0x21   :  { %2323 = vsyncadd [#allocation8], 4294963200  ;;  %s38_s7 = sld [smem:[#allocation6]]  ;;  %s2330_s8 = smov [#allocation2]  }
  0x22   :  { %s52_s9 = sshll.u32 %s2330_s8, 4  ;;  %s1113_s10 = sld [smem:[#allocation6 + $0x1]]  ;;  %s2403_s9 = int_to_ptr.vmem [resolvable:$true] %s52_s9 }
  0x23   :  { %s2331_s11 = smov [#allocation2 + $0x8]   ;;  %s2405_s13 = sld [smem:[#allocation6 + $0x2]] }
  0x24   :  { %s71_s12 = sshll.u32 %s2331_s11, 4  ;;  %s2332_s14 = smov [#allocation2 + $0x10]   ;;  %s2407_s12 = int_to_ptr.vmem [resolvable:$true] %s71_s12 }
  0x25   :  { %s90_s15 = sshll.u32 %s2332_s14, 4  ;;  %s2409_s16 = sld [smem:[#allocation6 + $0x3]]  ;;  %s2411_s15 = int_to_ptr.vmem [resolvable:$true] %s90_s15 }
  0x26   :  { %s2420_s0 = scalar_lea.hbm %s3091_s1, 8064 }
  0x27   :  { %p39_p13 = scmp.gt.s32.totalorder %s38_s7, 0  ;;  %p1107_p0 = scmp.lt.s32.totalorder %s38_s7, 499 }
  0x28   :  { %p57_p1 = scmp.gt.s32.totalorder %s1113_s10, 0  ;;  %p1114_p2 = scmp.lt.s32.totalorder %s1113_s10, 499 }
  0x29   :  { %s3102_s7 = smov (!%p39_p13, %s38_s7), 0  ;;  %p76_p3 = scmp.gt.s32.totalorder %s2405_s13, 0 }
  0x2a   :  { %s3104_s10 = smov (!%p57_p1, %s1113_s10), 0  ;;  %s3106_s7 = smov (!%p1107_p0, %s3102_s7), 499 }
  0x2b   :  { %s3108_s10 = smov (!%p1114_p2, %s3104_s10), 499  ;;  %s1112_s2 = sshll.u32 %s3106_s7, 4 }
  0x2c   :  { %s44_s19 = scalar_lea.hbm %s3091_s1, %s1112_s2  ;;  %s1119_s20 = sshll.u32 %s3108_s10, 4 }
  0x2d   :  { %s1552_s21 = scalar_lea.hbm %s44_s19, 16  ;;  %p1555_p5 = scmp.lt.u32.totalorder %s44_s19, %s3091_s1 }
  0x2e   :  { %p1553_p4 = scmp.ne.s32.totalorder %s44_s19, %s1552_s21  ;;  %p1556_p6 = scmp.lt.u32.totalorder %s2420_s0, %s1552_s21 }
  0x2f   :  { %p1558_p8 = scmp.lt.u32.totalorder %s1552_s21, %s44_s19 }
  0x30   :  { %p1557_p7 = por %p1556_p6, %p1555_p5 }
  0x32   :  { %p1559_p9 = por %p1558_p8, %p1557_p7 }
  0x34   :  { %p1560_p10 = pnand %p1559_p9, %p1553_p4 }
  0x36   :  { %1563 = shalt.err (!%p1560_p10)  }
  0x37   :  { %s1564_s26 = scalar_lea.vmem %s2403_s9, 16  ;;  %s2429_s27 = scalar_lea.vmem %s2403_s9, 1024 }
  0x38   :  { %p1565_p11 = scmp.ne.s32.totalorder %s2403_s9, %s1564_s26  ;;  %p1569_p12 = scmp.lt.s32.totalorder %s2403_s9, %s2403_s9 }
  0x39   :  { %p1570_p13 = scmp.lt.s32.totalorder %s2429_s27, %s1564_s26 }
  0x3b   :  { %p1571_p0 = por %p1570_p13, %p1569_p12 }
  0x3d   :  { %p1572_p1 = pnand %p1571_p0, %p1565_p11 }
  0x3f   :  { %1575 = shalt.err (!%p1572_p1)  }
  0x40   :  { %55 = dma.hbm_to_vmem [thread:$0]  %s44_s19, 16, %s2403_s9, [#allocation3] }
  0x41   :  { %s62_s30 = scalar_lea.hbm %s3091_s1, %s1119_s20  ;;  %p1121_p2 = scmp.lt.s32.totalorder %s2405_s13, 499 }
  0x42   :  { %s1576_s5 = scalar_lea.hbm %s62_s30, 16  ;;  %p1579_p5 = scmp.lt.u32.totalorder %s62_s30, %s3091_s1 }
  0x43   :  { %p1577_p4 = scmp.ne.s32.totalorder %s62_s30, %s1576_s5  ;;  %p1580_p6 = scmp.lt.u32.totalorder %s2420_s0, %s1576_s5 }
  0x44   :  { %p1582_p8 = scmp.lt.u32.totalorder %s1576_s5, %s62_s30 }
  0x45   :  { %p1581_p7 = por %p1580_p6, %p1579_p5 }
  0x47   :  { %p1583_p9 = por %p1582_p8, %p1581_p7 }
  0x49   :  { %p1584_p10 = pnand %p1583_p9, %p1577_p4 }
  0x4b   :  { %1587 = shalt.err (!%p1584_p10)  }
  0x4c   :  { %s1588_s8 = scalar_lea.vmem %s2407_s12, 16  ;;  %p1593_p12 = scmp.lt.s32.totalorder %s2407_s12, %s2403_s9 }
  0x4d   :  { %p1589_p11 = scmp.ne.s32.totalorder %s2407_s12, %s1588_s8  ;;  %p1594_p13 = scmp.lt.s32.totalorder %s2429_s27, %s1588_s8 }
  0x4f   :  { %p1595_p0 = por %p1594_p13, %p1593_p12 }
  0x51   :  { %p1596_p1 = pnand %p1595_p0, %p1589_p11 }
  0x53   :  { %1599 = shalt.err (!%p1596_p1)  }
  0x54   :  { %74 = dma.hbm_to_vmem [thread:$0]  %s62_s30, 16, %s2407_s12, [#allocation3] }
  0x55   :  { %s77_s10 = scalar_select %p76_p3, %s2405_s13, 0 }
  0x56   :  { %p95_p4 = scmp.gt.s32.totalorder %s2409_s16, 0  ;;  %p1128_p5 = scmp.lt.s32.totalorder %s2409_s16, 499 }
  0x57   :  { %s3110_s10 = smov (!%p1121_p2, %s77_s10), 499  ;;  %s2333_s2 = smov [#allocation2 + $0x18]  }
  0x58   :  { %s96_s11 = scalar_select %p95_p4, %s2409_s16, 0 }
  0x59   :  { %s1126_s14 = sshll.u32 %s3110_s10, 4  ;;  %s109_s17 = sshll.u32 %s2333_s2, 4  ;;  %s2460_s17 = int_to_ptr.vmem [resolvable:$true] %s109_s17 }
  0x5a   :  { %s81_s20 = scalar_lea.hbm %s3091_s1, %s1126_s14 }
  0x5b   :  { %s1600_s21 = scalar_lea.hbm %s81_s20, 16  ;;  %p1603_p3 = scmp.lt.u32.totalorder %s81_s20, %s3091_s1 }
  0x5c   :  { %p1601_p6 = scmp.ne.s32.totalorder %s81_s20, %s1600_s21  ;;  %p1604_p7 = scmp.lt.u32.totalorder %s2420_s0, %s1600_s21 }
  0x5d   :  { %p1606_p9 = scmp.lt.u32.totalorder %s1600_s21, %s81_s20 }
  0x5e   :  { %p1605_p8 = por %p1604_p7, %p1603_p3 }
  0x60   :  { %p1607_p2 = por %p1606_p9, %p1605_p8 }
  0x62   :  { %p1608_p10 = pnand %p1607_p2, %p1601_p6 }
  0x64   :  { %1611 = shalt.err (!%p1608_p10)  }
  0x65   :  { %s1612_s13 = scalar_lea.vmem %s2411_s15, 16  ;;  %p1617_p12 = scmp.lt.s32.totalorder %s2411_s15, %s2403_s9 }
  0x66   :  { %p1613_p11 = scmp.ne.s32.totalorder %s2411_s15, %s1612_s13  ;;  %p1618_p13 = scmp.lt.s32.totalorder %s2429_s27, %s1612_s13 }
  0x68   :  { %p1619_p0 = por %p1618_p13, %p1617_p12 }
  0x6a   :  { %p1620_p1 = pnand %p1619_p0, %p1613_p11 }
  0x6c   :  { %1623 = shalt.err (!%p1620_p1)  }
  0x6d   :  { %93 = dma.hbm_to_vmem [thread:$0]  %s81_s20, 16, %s2411_s15, [#allocation3] }
  0x6e   :  { %s3112_s11 = smov (!%p1128_p5, %s96_s11), 499  ;;  %s2474_s23 = sld [smem:[#allocation6 + $0x4]] }
  0x6f   :  { %s1133_s24 = sshll.u32 %s3112_s11, 4  ;;  %s2334_s25 = smov [#allocation2 + $0x20]  }
  0x70   :  { %s128_s26 = sshll.u32 %s2334_s25, 4  ;;  %s100_s30 = scalar_lea.hbm %s3091_s1, %s1133_s24  ;;  %s2479_s26 = int_to_ptr.vmem [resolvable:$true] %s128_s26 }
  0x71   :  { %s1624_s5 = scalar_lea.hbm %s100_s30, 16  ;;  %p1627_p6 = scmp.lt.u32.totalorder %s100_s30, %s3091_s1 }
  0x72   :  { %p1625_p4 = scmp.ne.s32.totalorder %s100_s30, %s1624_s5  ;;  %p1628_p3 = scmp.lt.u32.totalorder %s2420_s0, %s1624_s5 }
  0x73   :  { %p1630_p5 = scmp.lt.u32.totalorder %s1624_s5, %s100_s30 }
  0x74   :  { %p1629_p7 = por %p1628_p3, %p1627_p6 }
  0x76   :  { %p1631_p8 = por %p1630_p5, %p1629_p7 }
  0x78   :  { %p1632_p9 = pnand %p1631_p8, %p1625_p4 }
  0x7a   :  { %1635 = shalt.err (!%p1632_p9)  }
  0x7b   :  { %s1636_s15 = scalar_lea.vmem %s2460_s17, 16  ;;  %p1641_p10 = scmp.lt.s32.totalorder %s2460_s17, %s2403_s9 }
  0x7c   :  { %p1637_p2 = scmp.ne.s32.totalorder %s2460_s17, %s1636_s15  ;;  %p1642_p11 = scmp.lt.s32.totalorder %s2429_s27, %s1636_s15 }
  0x7e   :  { %p1643_p12 = por %p1642_p11, %p1641_p10 }
  0x80   :  { %p1644_p13 = pnand %p1643_p12, %p1637_p2 }
  0x82   :  { %1647 = shalt.err (!%p1644_p13)  }
  0x83   :  { %112 = dma.hbm_to_vmem [thread:$0]  %s100_s30, 16, %s2460_s17, [#allocation3] }
  0x84   :  { %s2491_s16 = sld [smem:[#allocation6 + $0x5]]  ;;  %s2335_s8 = smov [#allocation2 + $0x28]  }
  0x85   :  { %s147_s10 = sshll.u32 %s2335_s8, 4  ;;  %s2493_s11 = sld [smem:[#allocation6 + $0x6]]  ;;  %s2497_s10 = int_to_ptr.vmem [resolvable:$true] %s147_s10 }
  0x86   :  { %p114_p0 = scmp.gt.s32.totalorder %s2474_s23, 0  ;;  %p1135_p1 = scmp.lt.s32.totalorder %s2474_s23, 499 }
  0x87   :  { %s2336_s14 = smov [#allocation2 + $0x30]   ;;  %s2502_s17 = sld [smem:[#allocation6 + $0x7]] }
  0x88   :  { %s3114_s23 = smov (!%p114_p0, %s2474_s23), 0  ;;  %s2500_s2 = sshll.u32 %s2336_s14, 4  ;;  %s2532_s2 = int_to_ptr.vmem [resolvable:$true] %s2500_s2 }
  0x89   :  { %s3116_s23 = smov (!%p1135_p1, %s3114_s23), 499 }
  0x8a   :  { %p133_p4 = scmp.gt.s32.totalorder %s2491_s16, 0  ;;  %s1140_s18 = sshll.u32 %s3116_s23, 4 }
  0x8b   :  { %p152_p3 = scmp.gt.s32.totalorder %s2493_s11, 0  ;;  %s119_s21 = scalar_lea.hbm %s3091_s1, %s1140_s18 }
  0x8c   :  { %s1648_s22 = scalar_lea.hbm %s119_s21, 16  ;;  %p1651_p8 = scmp.lt.u32.totalorder %s119_s21, %s3091_s1 }
  0x8d   :  { %p1649_p5 = scmp.ne.s32.totalorder %s119_s21, %s1648_s22  ;;  %p1652_p9 = scmp.lt.u32.totalorder %s2420_s0, %s1648_s22 }
  0x8e   :  { %p1654_p10 = scmp.lt.u32.totalorder %s1648_s22, %s119_s21 }
  0x8f   :  { %p1653_p2 = por %p1652_p9, %p1651_p8 }
  0x91   :  { %p1655_p11 = por %p1654_p10, %p1653_p2 }
  0x93   :  { %p1656_p12 = pnand %p1655_p11, %p1649_p5 }
  0x95   :  { %1659 = shalt.err (!%p1656_p12)  }
  0x96   :  { %s1660_s23 = scalar_lea.vmem %s2479_s26, 16  ;;  %p1665_p0 = scmp.lt.s32.totalorder %s2479_s26, %s2403_s9 }
  0x97   :  { %p1661_p13 = scmp.ne.s32.totalorder %s2479_s26, %s1660_s23  ;;  %p1666_p1 = scmp.lt.s32.totalorder %s2429_s27, %s1660_s23 }
  0x99   :  { %p1667_p7 = por %p1666_p1, %p1665_p0 }
  0x9b   :  { %p1668_p6 = pnand %p1667_p7, %p1661_p13 }
  0x9d   :  { %1671 = shalt.err (!%p1668_p6)  }
  0x9e   :  { %131 = dma.hbm_to_vmem [thread:$0]  %s119_s21, 16, %s2479_s26, [#allocation3] }
  0x9f   :  { %s134_s24 = scalar_select %p133_p4, %s2491_s16, 0 }
  0xa0   :  { %s153_s25 = scalar_select %p152_p3, %s2493_s11, 0 }
  0xa1   :  { %p3095_p5 = scmp.lt.s32.totalorder %s2491_s16, 499  ;;  %p3096_p8 = scmp.lt.s32.totalorder %s2493_s11, 499 }
  0xa3   :  { %s3118_s24 = smov (!%p3095_p5, %s134_s24), 499  ;;  %s3120_s25 = smov (!%p3096_p8, %s153_s25), 499 }
  0xa4   :  { %s1147_s28 = sshll.u32 %s3118_s24, 4  ;;  %s1154_s6 = sshll.u32 %s3120_s25, 4 }
  0xa5   :  { %s138_s5 = scalar_lea.hbm %s3091_s1, %s1147_s28 }
  0xa6   :  { %s1672_s7 = scalar_lea.hbm %s138_s5, 16  ;;  %p1675_p4 = scmp.lt.u32.totalorder %s138_s5, %s3091_s1 }
  0xa7   :  { %p1673_p6 = scmp.ne.s32.totalorder %s138_s5, %s1672_s7  ;;  %p1676_p7 = scmp.lt.u32.totalorder %s2420_s0, %s1672_s7 }
  0xa8   :  { %p1678_p9 = scmp.lt.u32.totalorder %s1672_s7, %s138_s5 }
  0xa9   :  { %p1677_p3 = por %p1676_p7, %p1675_p4 }
  0xab   :  { %p1679_p2 = por %p1678_p9, %p1677_p3 }
  0xad   :  { %p1680_p10 = pnand %p1679_p2, %p1673_p6 }
  0xaf   :  { %1683 = shalt.err (!%p1680_p10)  }
  0xb0   :  { %s1684_s16 = scalar_lea.vmem %s2497_s10, 16  ;;  %p1689_p12 = scmp.lt.s32.totalorder %s2497_s10, %s2403_s9 }
  0xb1   :  { %p1685_p11 = scmp.ne.s32.totalorder %s2497_s10, %s1684_s16  ;;  %p1690_p13 = scmp.lt.s32.totalorder %s2429_s27, %s1684_s16 }
  0xb3   :  { %p1691_p0 = por %p1690_p13, %p1689_p12 }
  0xb5   :  { %p1692_p1 = pnand %p1691_p0, %p1685_p11 }
  0xb7   :  { %1695 = shalt.err (!%p1692_p1)  }
  0xb8   :  { %150 = dma.hbm_to_vmem [thread:$0]  %s138_s5, 16, %s2497_s10, [#allocation3] }
  0xb9   :  { %s157_s14 = scalar_lea.hbm %s3091_s1, %s1154_s6  ;;  %p171_p5 = scmp.gt.s32.totalorder %s2502_s17, 0 }
  0xba   :  { %s1696_s18 = scalar_lea.hbm %s157_s14, 16  ;;  %p1699_p6 = scmp.lt.u32.totalorder %s157_s14, %s3091_s1 }
  0xbb   :  { %p1697_p8 = scmp.ne.s32.totalorder %s157_s14, %s1696_s18  ;;  %p1700_p4 = scmp.lt.u32.totalorder %s2420_s0, %s1696_s18 }
  0xbc   :  { %p1702_p3 = scmp.lt.u32.totalorder %s1696_s18, %s157_s14 }
  0xbd   :  { %p1701_p7 = por %p1700_p4, %p1699_p6 }
  0xbf   :  { %p1703_p9 = por %p1702_p3, %p1701_p7 }
  0xc1   :  { %p1704_p2 = pnand %p1703_p9, %p1697_p8 }
  0xc3   :  { %1707 = shalt.err (!%p1704_p2)  }
  0xc4   :  { %s1708_s10 = scalar_lea.vmem %s2532_s2, 16  ;;  %p1713_p11 = scmp.lt.s32.totalorder %s2532_s2, %s2403_s9 }
  0xc5   :  { %p1709_p10 = scmp.ne.s32.totalorder %s2532_s2, %s1708_s10  ;;  %p1714_p12 = scmp.lt.s32.totalorder %s2429_s27, %s1708_s10 }
  0xc7   :  { %p1715_p13 = por %p1714_p12, %p1713_p11 }
  0xc9   :  { %p1716_p0 = pnand %p1715_p13, %p1709_p10 }
  0xcb   :  { %1719 = shalt.err (!%p1716_p0)  }
  0xcc   :  { %169 = dma.hbm_to_vmem [thread:$0]  %s157_s14, 16, %s2532_s2, [#allocation3] }
  0xcd   :  { %s172_s21 = scalar_select %p171_p5, %s2502_s17, 0 }
  0xce   :  { %p1156_p1 = scmp.lt.s32.totalorder %s2502_s17, 499  ;;  %s2337_s22 = smov [#allocation2 + $0x38]  }
  0xcf   :  { %s185_s12 = sshll.u32 %s2337_s22, 4  ;;  %s2565_s13 = sld [smem:[#allocation6 + $0x8]]  ;;  %s186_s12 = int_to_ptr.vmem [resolvable:$true] %s185_s12 }
  0xd0   :  { %s3122_s21 = smov (!%p1156_p1, %s172_s21), 499  ;;  %s2338_s24 = smov [#allocation2 + $0x1]  }
  0xd1   :  { %s1161_s23 = sshll.u32 %s3122_s21, 4  ;;  %s204_s25 = sshll.u32 %s2338_s24, 4  ;;  %s2570_s25 = int_to_ptr.vmem [resolvable:$true] %s204_s25 }
  0xd2   :  { %s176_s30 = scalar_lea.hbm %s3091_s1, %s1161_s23 }
  0xd3   :  { %s1720_s2 = scalar_lea.hbm %s176_s30, 16  ;;  %p1723_p5 = scmp.lt.u32.totalorder %s176_s30, %s3091_s1 }
  0xd4   :  { %p1721_p8 = scmp.ne.s32.totalorder %s176_s30, %s1720_s2  ;;  %p1724_p6 = scmp.lt.u32.totalorder %s2420_s0, %s1720_s2 }
  0xd5   :  { %p1726_p7 = scmp.lt.u32.totalorder %s1720_s2, %s176_s30 }
  0xd6   :  { %p1725_p4 = por %p1724_p6, %p1723_p5 }
  0xd8   :  { %p1727_p3 = por %p1726_p7, %p1725_p4 }
  0xda   :  { %p1728_p9 = pnand %p1727_p3, %p1721_p8 }
  0xdc   :  { %1731 = shalt.err (!%p1728_p9)  }
  0xdd   :  { %s1732_s17 = scalar_lea.vmem %s186_s12, 16  ;;  %p1737_p10 = scmp.lt.s32.totalorder %s186_s12, %s2403_s9 }
  0xde   :  { %p1733_p2 = scmp.ne.s32.totalorder %s186_s12, %s1732_s17  ;;  %p1738_p11 = scmp.lt.s32.totalorder %s2429_s27, %s1732_s17 }
  0xe0   :  { %p1739_p12 = por %p1738_p11, %p1737_p10 }
  0xe2   :  { %p1740_p13 = pnand %p1739_p12, %p1733_p2 }
  0xe4   :  { %1743 = shalt.err (!%p1740_p13)  }
  0xe5   :  { %188 = dma.hbm_to_vmem [thread:$0]  %s176_s30, 16, %s186_s12, [#allocation3] }
  0xe6   :  { %p190_p0 = scmp.gt.s32.totalorder %s2565_s13, 0  ;;  %p1163_p1 = scmp.lt.s32.totalorder %s2565_s13, 499 }
  0xe7   :  { %s2580_s7 = sld [smem:[#allocation6 + $0x9]]  ;;  %s2339_s15 = smov [#allocation2 + $0x9]  }
  0xe8   :  { %s3124_s13 = smov (!%p190_p0, %s2565_s13), 0  ;;  %s223_s26 = sshll.u32 %s2339_s15, 4  ;;  %s2585_s26 = int_to_ptr.vmem [resolvable:$true] %s223_s26 }
  0xe9   :  { %s2583_s16 = sld [smem:[#allocation6 + $0xa]]  ;;  %s3126_s13 = smov (!%p1163_p1, %s3124_s13), 499 }
  0xea   :  { %s1168_s8 = sshll.u32 %s3126_s13, 4  ;;  %s2340_s11 = smov [#allocation2 + $0x11]  }
  0xeb   :  { %s242_s14 = sshll.u32 %s2340_s11, 4  ;;  %s195_s20 = scalar_lea.hbm %s3091_s1, %s1168_s8  ;;  %s2607_s14 = int_to_ptr.vmem [resolvable:$true] %s242_s14 }
  0xec   :  { %s1744_s10 = scalar_lea.hbm %s195_s20, 16  ;;  %p1747_p6 = scmp.lt.u32.totalorder %s195_s20, %s3091_s1 }
  0xed   :  { %p209_p8 = scmp.gt.s32.totalorder %s2580_s7, 0  ;;  %p1745_p5 = scmp.ne.s32.totalorder %s195_s20, %s1744_s10 }
  0xee   :  { %p1748_p4 = scmp.lt.u32.totalorder %s2420_s0, %s1744_s10  ;;  %p1750_p3 = scmp.lt.u32.totalorder %s1744_s10, %s195_s20 }
  0xf0   :  { %p1749_p7 = por %p1748_p4, %p1747_p6 }
  0xf2   :  { %p1751_p9 = por %p1750_p3, %p1749_p7 }
  0xf4   :  { %p1752_p2 = pnand %p1751_p9, %p1745_p5 }
  0xf6   :  { %1755 = shalt.err (!%p1752_p2)  }
  0xf7   :  { %s1756_s12 = scalar_lea.vmem %s2570_s25, 16  ;;  %p1761_p11 = scmp.lt.s32.totalorder %s2570_s25, %s2403_s9 }
  0xf8   :  { %p1757_p10 = scmp.ne.s32.totalorder %s2570_s25, %s1756_s12  ;;  %p1762_p12 = scmp.lt.s32.totalorder %s2429_s27, %s1756_s12 }
  0xfa   :  { %p1763_p13 = por %p1762_p12, %p1761_p11 }
  0xfc   :  { %p1764_p0 = pnand %p1763_p13, %p1757_p10 }
  0xfe   :  { %1767 = shalt.err (!%p1764_p0)  }
  0xff   :  { %207 = dma.hbm_to_vmem [thread:$0]  %s195_s20, 16, %s2570_s25, [#allocation3] }
 0x100   :  { %s210_s13 = scalar_select %p209_p8, %s2580_s7, 0 }
 0x101   :  { %p1170_p1 = scmp.lt.s32.totalorder %s2580_s7, 499  ;;  %p228_p5 = scmp.gt.s32.totalorder %s2583_s16, 0 }
 0x102   :  { %p1177_p6 = scmp.lt.s32.totalorder %s2583_s16, 499  ;;  %s2610_s28 = sld [smem:[#allocation6 + $0xb]] }
 0x103   :  { %s3128_s13 = smov (!%p1170_p1, %s210_s13), 499 }
 0x104   :  { %s229_s23 = scalar_select %p228_p5, %s2583_s16, 0 }
 0x105   :  { %s1175_s24 = sshll.u32 %s3128_s13, 4 }
 0x106   :  { %s214_s2 = scalar_lea.hbm %s3091_s1, %s1175_s24 }
 0x107   :  { %s1768_s5 = scalar_lea.hbm %s214_s2, 16  ;;  %p1771_p8 = scmp.lt.u32.totalorder %s214_s2, %s3091_s1 }
 0x108   :  { %p1769_p4 = scmp.ne.s32.totalorder %s214_s2, %s1768_s5  ;;  %p1772_p7 = scmp.lt.u32.totalorder %s2420_s0, %s1768_s5 }
 0x109   :  { %p1774_p9 = scmp.lt.u32.totalorder %s1768_s5, %s214_s2 }
 0x10a   :  { %p1773_p3 = por %p1772_p7, %p1771_p8 }
 0x10c   :  { %p1775_p2 = por %p1774_p9, %p1773_p3 }
 0x10e   :  { %p1776_p10 = pnand %p1775_p2, %p1769_p4 }
 0x110   :  { %1779 = shalt.err (!%p1776_p10)  }
 0x111   :  { %s1780_s17 = scalar_lea.vmem %s2585_s26, 16  ;;  %p1785_p12 = scmp.lt.s32.totalorder %s2585_s26, %s2403_s9 }
 0x112   :  { %p1781_p11 = scmp.ne.s32.totalorder %s2585_s26, %s1780_s17  ;;  %p1786_p13 = scmp.lt.s32.totalorder %s2429_s27, %s1780_s17 }
 0x114   :  { %p1787_p0 = por %p1786_p13, %p1785_p12 }
 0x116   :  { %p1788_p1 = pnand %p1787_p0, %p1781_p11 }
 0x118   :  { %1791 = shalt.err (!%p1788_p1)  }
 0x119   :  { %226 = dma.hbm_to_vmem [thread:$0]  %s214_s2, 16, %s2585_s26, [#allocation3] }
 0x11a   :  { %s3130_s23 = smov (!%p1177_p6, %s229_s23), 499  ;;  %s2341_s7 = smov [#allocation2 + $0x19]  }
 0x11b   :  { %s261_s15 = sshll.u32 %s2341_s7, 4  ;;  %s2627_s8 = sld [smem:[#allocation6 + $0xc]]  ;;  %s2629_s15 = int_to_ptr.vmem [resolvable:$true] %s261_s15 }
 0x11c   :  { %s1182_s11 = sshll.u32 %s3130_s23, 4  ;;  %p247_p5 = scmp.gt.s32.totalorder %s2610_s28, 0 }
 0x11d   :  { %s233_s20 = scalar_lea.hbm %s3091_s1, %s1182_s11 }
 0x11e   :  { %s1792_s10 = scalar_lea.hbm %s233_s20, 16  ;;  %p1795_p8 = scmp.lt.u32.totalorder %s233_s20, %s3091_s1 }
 0x11f   :  { %p1793_p4 = scmp.ne.s32.totalorder %s233_s20, %s1792_s10  ;;  %p1796_p7 = scmp.lt.u32.totalorder %s2420_s0, %s1792_s10 }
 0x120   :  { %p1798_p3 = scmp.lt.u32.totalorder %s1792_s10, %s233_s20 }
 0x121   :  { %p1797_p6 = por %p1796_p7, %p1795_p8 }
 0x123   :  { %p1799_p9 = por %p1798_p3, %p1797_p6 }
 0x125   :  { %p1800_p2 = pnand %p1799_p9, %p1793_p4 }
 0x127   :  { %1803 = shalt.err (!%p1800_p2)  }
 0x128   :  { %s1804_s26 = scalar_lea.vmem %s2607_s14, 16  ;;  %p1809_p11 = scmp.lt.s32.totalorder %s2607_s14, %s2403_s9 }
 0x129   :  { %p1805_p10 = scmp.ne.s32.totalorder %s2607_s14, %s1804_s26  ;;  %p1810_p12 = scmp.lt.s32.totalorder %s2429_s27, %s1804_s26 }
 0x12b   :  { %p1811_p13 = por %p1810_p12, %p1809_p11 }
 0x12d   :  { %p1812_p0 = pnand %p1811_p13, %p1805_p10 }
 0x12f   :  { %1815 = shalt.err (!%p1812_p0)  }
 0x130   :  { %245 = dma.hbm_to_vmem [thread:$0]  %s233_s20, 16, %s2607_s14, [#allocation3] }
 0x131   :  { %s248_s16 = scalar_select %p247_p5, %s2610_s28, 0 }
 0x132   :  { %p1184_p1 = scmp.lt.s32.totalorder %s2610_s28, 499  ;;  %p266_p4 = scmp.gt.s32.totalorder %s2627_s8, 0 }
 0x133   :  { %p1191_p8 = scmp.lt.s32.totalorder %s2627_s8, 499  ;;  %s2342_s23 = smov [#allocation2 + $0x21]  }
 0x134   :  { %s3132_s16 = smov (!%p1184_p1, %s248_s16), 499  ;;  %s280_s24 = sshll.u32 %s2342_s23, 4  ;;  %s2655_s24 = int_to_ptr.vmem [resolvable:$true] %s280_s24 }
 0x135   :  { %s267_s12 = scalar_select %p266_p4, %s2627_s8, 0 }
 0x136   :  { %s1189_s13 = sshll.u32 %s3132_s16, 4 }
 0x137   :  { %s252_s2 = scalar_lea.hbm %s3091_s1, %s1189_s13 }
 0x138   :  { %s1816_s5 = scalar_lea.hbm %s252_s2, 16  ;;  %p1819_p5 = scmp.lt.u32.totalorder %s252_s2, %s3091_s1 }
 0x139   :  { %p1817_p7 = scmp.ne.s32.totalorder %s252_s2, %s1816_s5  ;;  %p1820_p6 = scmp.lt.u32.totalorder %s2420_s0, %s1816_s5 }
 0x13a   :  { %p1822_p9 = scmp.lt.u32.totalorder %s1816_s5, %s252_s2 }
 0x13b   :  { %p1821_p3 = por %p1820_p6, %p1819_p5 }
 0x13d   :  { %p1823_p2 = por %p1822_p9, %p1821_p3 }
 0x13f   :  { %p1824_p10 = pnand %p1823_p2, %p1817_p7 }
 0x141   :  { %1827 = shalt.err (!%p1824_p10)  }
 0x142   :  { %s1828_s28 = scalar_lea.vmem %s2629_s15, 16  ;;  %p1833_p12 = scmp.lt.s32.totalorder %s2629_s15, %s2403_s9 }
 0x143   :  { %p1829_p11 = scmp.ne.s32.totalorder %s2629_s15, %s1828_s28  ;;  %p1834_p13 = scmp.lt.s32.totalorder %s2429_s27, %s1828_s28 }
 0x145   :  { %p1835_p0 = por %p1834_p13, %p1833_p12 }
 0x147   :  { %p1836_p1 = pnand %p1835_p0, %p1829_p11 }
 0x149   :  { %1839 = shalt.err (!%p1836_p1)  }
 0x14a   :  { %264 = dma.hbm_to_vmem [thread:$0]  %s252_s2, 16, %s2629_s15, [#allocation3] }
 0x14b   :  { %s3134_s12 = smov (!%p1191_p8, %s267_s12), 499  ;;  %s2669_s25 = sld [smem:[#allocation6 + $0xd]] }
 0x14c   :  { %s1196_s17 = sshll.u32 %s3134_s12, 4  ;;  %s2343_s7 = smov [#allocation2 + $0x29]  }
 0x14d   :  { %s299_s11 = sshll.u32 %s2343_s7, 4  ;;  %s271_s20 = scalar_lea.hbm %s3091_s1, %s1196_s17  ;;  %s2674_s11 = int_to_ptr.vmem [resolvable:$true] %s299_s11 }
 0x14e   :  { %s1840_s10 = scalar_lea.hbm %s271_s20, 16  ;;  %p1843_p7 = scmp.lt.u32.totalorder %s271_s20, %s3091_s1 }
 0x14f   :  { %p1841_p4 = scmp.ne.s32.totalorder %s271_s20, %s1840_s10  ;;  %p1844_p5 = scmp.lt.u32.totalorder %s2420_s0, %s1840_s10 }
 0x150   :  { %p1846_p8 = scmp.lt.u32.totalorder %s1840_s10, %s271_s20 }
 0x151   :  { %p1845_p6 = por %p1844_p5, %p1843_p7 }
 0x153   :  { %p1847_p3 = por %p1846_p8, %p1845_p6 }
 0x155   :  { %p1848_p9 = pnand %p1847_p3, %p1841_p4 }
 0x157   :  { %1851 = shalt.err (!%p1848_p9)  }
 0x158   :  { %s1852_s15 = scalar_lea.vmem %s2655_s24, 16  ;;  %p1857_p10 = scmp.lt.s32.totalorder %s2655_s24, %s2403_s9 }
 0x159   :  { %p1853_p2 = scmp.ne.s32.totalorder %s2655_s24, %s1852_s15  ;;  %p1858_p11 = scmp.lt.s32.totalorder %s2429_s27, %s1852_s15 }
 0x15b   :  { %p1859_p12 = por %p1858_p11, %p1857_p10 }
 0x15d   :  { %p1860_p13 = pnand %p1859_p12, %p1853_p2 }
 0x15f   :  { %1863 = shalt.err (!%p1860_p13)  }
 0x160   :  { %283 = dma.hbm_to_vmem [thread:$0]  %s271_s20, 16, %s2655_s24, [#allocation3] }
 0x161   :  { %s2686_s8 = sld [smem:[#allocation6 + $0xe]]  ;;  %s2344_s26 = smov [#allocation2 + $0x31]  }
 0x162   :  { %s318_s16 = sshll.u32 %s2344_s26, 4  ;;  %s2688_s12 = sld [smem:[#allocation6 + $0xf]]  ;;  %s2692_s16 = int_to_ptr.vmem [resolvable:$true] %s318_s16 }
 0x163   :  { %p285_p0 = scmp.gt.s32.totalorder %s2669_s25, 0  ;;  %p1198_p1 = scmp.lt.s32.totalorder %s2669_s25, 499 }
 0x164   :  { %s2345_s13 = smov [#allocation2 + $0x39]   ;;  %s2697_s24 = sld [smem:[#allocation6 + $0x10]] }
 0x165   :  { %s3136_s25 = smov (!%p285_p0, %s2669_s25), 0  ;;  %s2695_s23 = sshll.u32 %s2345_s13, 4  ;;  %s2727_s23 = int_to_ptr.vmem [resolvable:$true] %s2695_s23 }
 0x166   :  { %s3138_s25 = smov (!%p1198_p1, %s3136_s25), 499 }
 0x167   :  { %p304_p4 = scmp.gt.s32.totalorder %s2686_s8, 0  ;;  %s1203_s29 = sshll.u32 %s3138_s25, 4 }
 0x168   :  { %p323_p5 = scmp.gt.s32.totalorder %s2688_s12, 0  ;;  %s290_s5 = scalar_lea.hbm %s3091_s1, %s1203_s29 }
 0x169   :  { %s1864_s6 = scalar_lea.hbm %s290_s5, 16  ;;  %p1867_p3 = scmp.lt.u32.totalorder %s290_s5, %s3091_s1 }
 0x16a   :  { %p1865_p8 = scmp.ne.s32.totalorder %s290_s5, %s1864_s6  ;;  %p1868_p9 = scmp.lt.u32.totalorder %s2420_s0, %s1864_s6 }
 0x16b   :  { %p1870_p10 = scmp.lt.u32.totalorder %s1864_s6, %s290_s5 }
 0x16c   :  { %p1869_p2 = por %p1868_p9, %p1867_p3 }
 0x16e   :  { %p1871_p11 = por %p1870_p10, %p1869_p2 }
 0x170   :  { %p1872_p12 = pnand %p1871_p11, %p1865_p8 }
 0x172   :  { %1875 = shalt.err (!%p1872_p12)  }
 0x173   :  { %s1876_s25 = scalar_lea.vmem %s2674_s11, 16  ;;  %p1881_p0 = scmp.lt.s32.totalorder %s2674_s11, %s2403_s9 }
 0x174   :  { %p1877_p13 = scmp.ne.s32.totalorder %s2674_s11, %s1876_s25  ;;  %p1882_p1 = scmp.lt.s32.totalorder %s2429_s27, %s1876_s25 }
 0x176   :  { %p1883_p6 = por %p1882_p1, %p1881_p0 }
 0x178   :  { %p1884_p7 = pnand %p1883_p6, %p1877_p13 }
 0x17a   :  { %1887 = shalt.err (!%p1884_p7)  }
 0x17b   :  { %302 = dma.hbm_to_vmem [thread:$0]  %s290_s5, 16, %s2674_s11, [#allocation3] }
 0x17c   :  { %s305_s17 = scalar_select %p304_p4, %s2686_s8, 0 }
 0x17d   :  { %s324_s7 = scalar_select %p323_p5, %s2688_s12, 0 }
 0x17e   :  { %p3097_p8 = scmp.lt.s32.totalorder %s2686_s8, 499  ;;  %p3098_p3 = scmp.lt.s32.totalorder %s2688_s12, 499 }
 0x180   :  { %s3140_s17 = smov (!%p3097_p8, %s305_s17), 499  ;;  %s3142_s7 = smov (!%p3098_p3, %s324_s7), 499 }
 0x181   :  { %s1210_s18 = sshll.u32 %s3140_s17, 4  ;;  %s1217_s21 = sshll.u32 %s3142_s7, 4 }
 0x182   :  { %s309_s10 = scalar_lea.hbm %s3091_s1, %s1210_s18 }
 0x183   :  { %s1888_s22 = scalar_lea.hbm %s309_s10, 16  ;;  %p1891_p4 = scmp.lt.u32.totalorder %s309_s10, %s3091_s1 }
 0x184   :  { %p1889_p7 = scmp.ne.s32.totalorder %s309_s10, %s1888_s22  ;;  %p1892_p6 = scmp.lt.u32.totalorder %s2420_s0, %s1888_s22 }
 0x185   :  { %p1894_p9 = scmp.lt.u32.totalorder %s1888_s22, %s309_s10 }
 0x186   :  { %p1893_p5 = por %p1892_p6, %p1891_p4 }
 0x188   :  { %p1895_p2 = por %p1894_p9, %p1893_p5 }
 0x18a   :  { %p1896_p10 = pnand %p1895_p2, %p1889_p7 }
 0x18c   :  { %1899 = shalt.err (!%p1896_p10)  }
 0x18d   :  { %s1900_s8 = scalar_lea.vmem %s2692_s16, 16  ;;  %p1905_p12 = scmp.lt.s32.totalorder %s2692_s16, %s2403_s9 }
 0x18e   :  { %p1901_p11 = scmp.ne.s32.totalorder %s2692_s16, %s1900_s8  ;;  %p1906_p13 = scmp.lt.s32.totalorder %s2429_s27, %s1900_s8 }
 0x190   :  { %p1907_p0 = por %p1906_p13, %p1905_p12 }
 0x192   :  { %p1908_p1 = pnand %p1907_p0, %p1901_p11 }
 0x194   :  { %1911 = shalt.err (!%p1908_p1)  }
 0x195   :  { %321 = dma.hbm_to_vmem [thread:$0]  %s309_s10, 16, %s2692_s16, [#allocation3] }
 0x196   :  { %s328_s13 = scalar_lea.hbm %s3091_s1, %s1217_s21  ;;  %p342_p8 = scmp.gt.s32.totalorder %s2697_s24, 0 }
 0x197   :  { %s1912_s29 = scalar_lea.hbm %s328_s13, 16  ;;  %p1915_p7 = scmp.lt.u32.totalorder %s328_s13, %s3091_s1 }
 0x198   :  { %p1913_p3 = scmp.ne.s32.totalorder %s328_s13, %s1912_s29  ;;  %p1916_p4 = scmp.lt.u32.totalorder %s2420_s0, %s1912_s29 }
 0x199   :  { %p1918_p5 = scmp.lt.u32.totalorder %s1912_s29, %s328_s13 }
 0x19a   :  { %p1917_p6 = por %p1916_p4, %p1915_p7 }
 0x19c   :  { %p1919_p9 = por %p1918_p5, %p1917_p6 }
 0x19e   :  { %p1920_p2 = pnand %p1919_p9, %p1913_p3 }
 0x1a0   :  { %1923 = shalt.err (!%p1920_p2)  }
 0x1a1   :  { %s1924_s16 = scalar_lea.vmem %s2727_s23, 16  ;;  %p1929_p11 = scmp.lt.s32.totalorder %s2727_s23, %s2403_s9 }
 0x1a2   :  { %p1925_p10 = scmp.ne.s32.totalorder %s2727_s23, %s1924_s16  ;;  %p1930_p12 = scmp.lt.s32.totalorder %s2429_s27, %s1924_s16 }
 0x1a4   :  { %p1931_p13 = por %p1930_p12, %p1929_p11 }
 0x1a6   :  { %p1932_p0 = pnand %p1931_p13, %p1925_p10 }
 0x1a8   :  { %1935 = shalt.err (!%p1932_p0)  }
 0x1a9   :  { %340 = dma.hbm_to_vmem [thread:$0]  %s328_s13, 16, %s2727_s23, [#allocation3] }
 0x1aa   :  { %s343_s5 = scalar_select %p342_p8, %s2697_s24, 0 }
 0x1ab   :  { %p1219_p1 = scmp.lt.s32.totalorder %s2697_s24, 499  ;;  %s2346_s6 = smov [#allocation2 + $0x2]  }
 0x1ac   :  { %s356_s14 = sshll.u32 %s2346_s6, 4  ;;  %s2760_s28 = sld [smem:[#allocation6 + $0x11]]  ;;  %s357_s14 = int_to_ptr.vmem [resolvable:$true] %s356_s14 }
 0x1ad   :  { %s3144_s5 = smov (!%p1219_p1, %s343_s5), 499  ;;  %s2347_s17 = smov [#allocation2 + $0xa]  }
 0x1ae   :  { %s1224_s25 = sshll.u32 %s3144_s5, 4  ;;  %s375_s7 = sshll.u32 %s2347_s17, 4  ;;  %s2765_s7 = int_to_ptr.vmem [resolvable:$true] %s375_s7 }
 0x1af   :  { %s347_s20 = scalar_lea.hbm %s3091_s1, %s1224_s25 }
 0x1b0   :  { %s1936_s23 = scalar_lea.hbm %s347_s20, 16  ;;  %p1939_p8 = scmp.lt.u32.totalorder %s347_s20, %s3091_s1 }
 0x1b1   :  { %p1937_p3 = scmp.ne.s32.totalorder %s347_s20, %s1936_s23  ;;  %p1940_p7 = scmp.lt.u32.totalorder %s2420_s0, %s1936_s23 }
 0x1b2   :  { %p1942_p6 = scmp.lt.u32.totalorder %s1936_s23, %s347_s20 }
 0x1b3   :  { %p1941_p4 = por %p1940_p7, %p1939_p8 }
 0x1b5   :  { %p1943_p5 = por %p1942_p6, %p1941_p4 }
 0x1b7   :  { %p1944_p9 = pnand %p1943_p5, %p1937_p3 }
 0x1b9   :  { %1947 = shalt.err (!%p1944_p9)  }
 0x1ba   :  { %s1948_s24 = scalar_lea.vmem %s357_s14, 16  ;;  %p1953_p10 = scmp.lt.s32.totalorder %s357_s14, %s2403_s9 }
 0x1bb   :  { %p1949_p2 = scmp.ne.s32.totalorder %s357_s14, %s1948_s24  ;;  %p1954_p11 = scmp.lt.s32.totalorder %s2429_s27, %s1948_s24 }
 0x1bd   :  { %p1955_p12 = por %p1954_p11, %p1953_p10 }
 0x1bf   :  { %p1956_p13 = pnand %p1955_p12, %p1949_p2 }
 0x1c1   :  { %1959 = shalt.err (!%p1956_p13)  }
 0x1c2   :  { %359 = dma.hbm_to_vmem [thread:$0]  %s347_s20, 16, %s357_s14, [#allocation3] }
 0x1c3   :  { %p361_p0 = scmp.gt.s32.totalorder %s2760_s28, 0  ;;  %p1226_p1 = scmp.lt.s32.totalorder %s2760_s28, 499 }
 0x1c4   :  { %s2775_s22 = sld [smem:[#allocation6 + $0x12]]  ;;  %s2348_s15 = smov [#allocation2 + $0x12]  }
 0x1c5   :  { %s3146_s28 = smov (!%p361_p0, %s2760_s28), 0  ;;  %s394_s11 = sshll.u32 %s2348_s15, 4  ;;  %s2780_s11 = int_to_ptr.vmem [resolvable:$true] %s394_s11 }
 0x1c6   :  { %s2778_s8 = sld [smem:[#allocation6 + $0x13]]  ;;  %s3148_s28 = smov (!%p1226_p1, %s3146_s28), 499 }
 0x1c7   :  { %s1231_s26 = sshll.u32 %s3148_s28, 4  ;;  %s2349_s12 = smov [#allocation2 + $0x1a]  }
 0x1c8   :  { %s413_s13 = sshll.u32 %s2349_s12, 4  ;;  %s366_s2 = scalar_lea.hbm %s3091_s1, %s1231_s26  ;;  %s2802_s13 = int_to_ptr.vmem [resolvable:$true] %s413_s13 }
 0x1c9   :  { %s1960_s16 = scalar_lea.hbm %s366_s2, 16  ;;  %p1963_p7 = scmp.lt.u32.totalorder %s366_s2, %s3091_s1 }
 0x1ca   :  { %p380_p3 = scmp.gt.s32.totalorder %s2775_s22, 0  ;;  %p1961_p8 = scmp.ne.s32.totalorder %s366_s2, %s1960_s16 }
 0x1cb   :  { %p1964_p4 = scmp.lt.u32.totalorder %s2420_s0, %s1960_s16  ;;  %p1966_p5 = scmp.lt.u32.totalorder %s1960_s16, %s366_s2 }
 0x1cd   :  { %p1965_p6 = por %p1964_p4, %p1963_p7 }
 0x1cf   :  { %p1967_p9 = por %p1966_p5, %p1965_p6 }
 0x1d1   :  { %p1968_p2 = pnand %p1967_p9, %p1961_p8 }
 0x1d3   :  { %1971 = shalt.err (!%p1968_p2)  }
 0x1d4   :  { %s1972_s14 = scalar_lea.vmem %s2765_s7, 16  ;;  %p1977_p11 = scmp.lt.s32.totalorder %s2765_s7, %s2403_s9 }
 0x1d5   :  { %p1973_p10 = scmp.ne.s32.totalorder %s2765_s7, %s1972_s14  ;;  %p1978_p12 = scmp.lt.s32.totalorder %s2429_s27, %s1972_s14 }
 0x1d7   :  { %p1979_p13 = por %p1978_p12, %p1977_p11 }
 0x1d9   :  { %p1980_p0 = pnand %p1979_p13, %p1973_p10 }
 0x1db   :  { %1983 = shalt.err (!%p1980_p0)  }
 0x1dc   :  { %378 = dma.hbm_to_vmem [thread:$0]  %s366_s2, 16, %s2765_s7, [#allocation3] }
 0x1dd   :  { %s381_s28 = scalar_select %p380_p3, %s2775_s22, 0 }
 0x1de   :  { %p1233_p1 = scmp.lt.s32.totalorder %s2775_s22, 499  ;;  %p399_p8 = scmp.gt.s32.totalorder %s2778_s8, 0 }
 0x1df   :  { %p1240_p7 = scmp.lt.s32.totalorder %s2778_s8, 499  ;;  %s2805_s18 = sld [smem:[#allocation6 + $0x14]] }
 0x1e0   :  { %s3150_s28 = smov (!%p1233_p1, %s381_s28), 499 }
 0x1e1   :  { %s400_s25 = scalar_select %p399_p8, %s2778_s8, 0 }
 0x1e2   :  { %s1238_s17 = sshll.u32 %s3150_s28, 4 }
 0x1e3   :  { %s385_s23 = scalar_lea.hbm %s3091_s1, %s1238_s17 }
 0x1e4   :  { %s1984_s10 = scalar_lea.hbm %s385_s23, 16  ;;  %p1987_p3 = scmp.lt.u32.totalorder %s385_s23, %s3091_s1 }
 0x1e5   :  { %p1985_p4 = scmp.ne.s32.totalorder %s385_s23, %s1984_s10  ;;  %p1988_p6 = scmp.lt.u32.totalorder %s2420_s0, %s1984_s10 }
 0x1e6   :  { %p1990_p9 = scmp.lt.u32.totalorder %s1984_s10, %s385_s23 }
 0x1e7   :  { %p1989_p5 = por %p1988_p6, %p1987_p3 }
 0x1e9   :  { %p1991_p2 = por %p1990_p9, %p1989_p5 }
 0x1eb   :  { %p1992_p10 = pnand %p1991_p2, %p1985_p4 }
 0x1ed   :  { %1995 = shalt.err (!%p1992_p10)  }
 0x1ee   :  { %s1996_s24 = scalar_lea.vmem %s2780_s11, 16  ;;  %p2001_p12 = scmp.lt.s32.totalorder %s2780_s11, %s2403_s9 }
 0x1ef   :  { %p1997_p11 = scmp.ne.s32.totalorder %s2780_s11, %s1996_s24  ;;  %p2002_p13 = scmp.lt.s32.totalorder %s2429_s27, %s1996_s24 }
 0x1f1   :  { %p2003_p0 = por %p2002_p13, %p2001_p12 }
 0x1f3   :  { %p2004_p1 = pnand %p2003_p0, %p1997_p11 }
 0x1f5   :  { %2007 = shalt.err (!%p2004_p1)  }
 0x1f6   :  { %397 = dma.hbm_to_vmem [thread:$0]  %s385_s23, 16, %s2780_s11, [#allocation3] }
 0x1f7   :  { %s3152_s25 = smov (!%p1240_p7, %s400_s25), 499  ;;  %s2350_s22 = smov [#allocation2 + $0x22]  }
 0x1f8   :  { %s432_s15 = sshll.u32 %s2350_s22, 4  ;;  %s2822_s26 = sld [smem:[#allocation6 + $0x15]]  ;;  %s2824_s15 = int_to_ptr.vmem [resolvable:$true] %s432_s15 }
 0x1f9   :  { %s1245_s12 = sshll.u32 %s3152_s25, 4  ;;  %p418_p8 = scmp.gt.s32.totalorder %s2805_s18, 0 }
 0x1fa   :  { %s404_s2 = scalar_lea.hbm %s3091_s1, %s1245_s12 }
 0x1fb   :  { %s2008_s16 = scalar_lea.hbm %s404_s2, 16  ;;  %p2011_p3 = scmp.lt.u32.totalorder %s404_s2, %s3091_s1 }
 0x1fc   :  { %p2009_p4 = scmp.ne.s32.totalorder %s404_s2, %s2008_s16  ;;  %p2012_p6 = scmp.lt.u32.totalorder %s2420_s0, %s2008_s16 }
 0x1fd   :  { %p2014_p5 = scmp.lt.u32.totalorder %s2008_s16, %s404_s2 }
 0x1fe   :  { %p2013_p7 = por %p2012_p6, %p2011_p3 }
 0x200   :  { %p2015_p9 = por %p2014_p5, %p2013_p7 }
 0x202   :  { %p2016_p2 = pnand %p2015_p9, %p2009_p4 }
 0x204   :  { %2019 = shalt.err (!%p2016_p2)  }
 0x205   :  { %s2020_s11 = scalar_lea.vmem %s2802_s13, 16  ;;  %p2025_p11 = scmp.lt.s32.totalorder %s2802_s13, %s2403_s9 }
 0x206   :  { %p2021_p10 = scmp.ne.s32.totalorder %s2802_s13, %s2020_s11  ;;  %p2026_p12 = scmp.lt.s32.totalorder %s2429_s27, %s2020_s11 }
 0x208   :  { %p2027_p13 = por %p2026_p12, %p2025_p11 }
 0x20a   :  { %p2028_p0 = pnand %p2027_p13, %p2021_p10 }
 0x20c   :  { %2031 = shalt.err (!%p2028_p0)  }
 0x20d   :  { %416 = dma.hbm_to_vmem [thread:$0]  %s404_s2, 16, %s2802_s13, [#allocation3] }
 0x20e   :  { %s419_s8 = scalar_select %p418_p8, %s2805_s18, 0 }
 0x20f   :  { %p1247_p1 = scmp.lt.s32.totalorder %s2805_s18, 499  ;;  %p437_p4 = scmp.gt.s32.totalorder %s2822_s26, 0 }
 0x210   :  { %p1254_p3 = scmp.lt.s32.totalorder %s2822_s26, 499  ;;  %s2351_s25 = smov [#allocation2 + $0x2a]  }
 0x211   :  { %s3154_s8 = smov (!%p1247_p1, %s419_s8), 499  ;;  %s451_s17 = sshll.u32 %s2351_s25, 4  ;;  %s2850_s17 = int_to_ptr.vmem [resolvable:$true] %s451_s17 }
 0x212   :  { %s438_s14 = scalar_select %p437_p4, %s2822_s26, 0 }
 0x213   :  { %s1252_s28 = sshll.u32 %s3154_s8, 4 }
 0x214   :  { %s423_s23 = scalar_lea.hbm %s3091_s1, %s1252_s28 }
 0x215   :  { %s2032_s10 = scalar_lea.hbm %s423_s23, 16  ;;  %p2035_p8 = scmp.lt.u32.totalorder %s423_s23, %s3091_s1 }
 0x216   :  { %p2033_p6 = scmp.ne.s32.totalorder %s423_s23, %s2032_s10  ;;  %p2036_p7 = scmp.lt.u32.totalorder %s2420_s0, %s2032_s10 }
 0x217   :  { %p2038_p9 = scmp.lt.u32.totalorder %s2032_s10, %s423_s23 }
 0x218   :  { %p2037_p5 = por %p2036_p7, %p2035_p8 }
 0x21a   :  { %p2039_p2 = por %p2038_p9, %p2037_p5 }
 0x21c   :  { %p2040_p10 = pnand %p2039_p2, %p2033_p6 }
 0x21e   :  { %2043 = shalt.err (!%p2040_p10)  }
 0x21f   :  { %s2044_s18 = scalar_lea.vmem %s2824_s15, 16  ;;  %p2049_p12 = scmp.lt.s32.totalorder %s2824_s15, %s2403_s9 }
 0x220   :  { %p2045_p11 = scmp.ne.s32.totalorder %s2824_s15, %s2044_s18  ;;  %p2050_p13 = scmp.lt.s32.totalorder %s2429_s27, %s2044_s18 }
 0x222   :  { %p2051_p0 = por %p2050_p13, %p2049_p12 }
 0x224   :  { %p2052_p1 = pnand %p2051_p0, %p2045_p11 }
 0x226   :  { %2055 = shalt.err (!%p2052_p1)  }
 0x227   :  { %435 = dma.hbm_to_vmem [thread:$0]  %s423_s23, 16, %s2824_s15, [#allocation3] }
 0x228   :  { %s3156_s14 = smov (!%p1254_p3, %s438_s14), 499  ;;  %s2864_s7 = sld [smem:[#allocation6 + $0x16]] }
 0x229   :  { %s1259_s24 = sshll.u32 %s3156_s14, 4  ;;  %s2352_s22 = smov [#allocation2 + $0x32]  }
 0x22a   :  { %s470_s12 = sshll.u32 %s2352_s22, 4  ;;  %s442_s2 = scalar_lea.hbm %s3091_s1, %s1259_s24  ;;  %s2869_s12 = int_to_ptr.vmem [resolvable:$true] %s470_s12 }
 0x22b   :  { %s2056_s16 = scalar_lea.hbm %s442_s2, 16  ;;  %p2059_p6 = scmp.lt.u32.totalorder %s442_s2, %s3091_s1 }
 0x22c   :  { %p2057_p4 = scmp.ne.s32.totalorder %s442_s2, %s2056_s16  ;;  %p2060_p8 = scmp.lt.u32.totalorder %s2420_s0, %s2056_s16 }
 0x22d   :  { %p2062_p3 = scmp.lt.u32.totalorder %s2056_s16, %s442_s2 }
 0x22e   :  { %p2061_p7 = por %p2060_p8, %p2059_p6 }
 0x230   :  { %p2063_p5 = por %p2062_p3, %p2061_p7 }
 0x232   :  { %p2064_p9 = pnand %p2063_p5, %p2057_p4 }
 0x234   :  { %2067 = shalt.err (!%p2064_p9)  }
 0x235   :  { %s2068_s15 = scalar_lea.vmem %s2850_s17, 16  ;;  %p2073_p10 = scmp.lt.s32.totalorder %s2850_s17, %s2403_s9 }
 0x236   :  { %p2069_p2 = scmp.ne.s32.totalorder %s2850_s17, %s2068_s15  ;;  %p2074_p11 = scmp.lt.s32.totalorder %s2429_s27, %s2068_s15 }
 0x238   :  { %p2075_p12 = por %p2074_p11, %p2073_p10 }
 0x23a   :  { %p2076_p13 = pnand %p2075_p12, %p2069_p2 }
 0x23c   :  { %2079 = shalt.err (!%p2076_p13)  }
 0x23d   :  { %454 = dma.hbm_to_vmem [thread:$0]  %s442_s2, 16, %s2850_s17, [#allocation3] }
 0x23e   :  { %s2881_s26 = sld [smem:[#allocation6 + $0x17]]  ;;  %s2353_s11 = smov [#allocation2 + $0x3a]  }
 0x23f   :  { %s489_s8 = sshll.u32 %s2353_s11, 4  ;;  %s2883_s14 = sld [smem:[#allocation6 + $0x18]]  ;;  %s2887_s8 = int_to_ptr.vmem [resolvable:$true] %s489_s8 }
 0x240   :  { %p456_p0 = scmp.gt.s32.totalorder %s2864_s7, 0  ;;  %p1261_p1 = scmp.lt.s32.totalorder %s2864_s7, 499 }
 0x241   :  { %s2354_s28 = smov [#allocation2 + $0x3]   ;;  %s2892_s17 = sld [smem:[#allocation6 + $0x19]] }
 0x242   :  { %s3158_s7 = smov (!%p456_p0, %s2864_s7), 0  ;;  %s2890_s25 = sshll.u32 %s2354_s28, 4  ;;  %s2922_s25 = int_to_ptr.vmem [resolvable:$true] %s2890_s25 }
 0x243   :  { %s3160_s7 = smov (!%p1261_p1, %s3158_s7), 499 }
 0x244   :  { %p475_p4 = scmp.gt.s32.totalorder %s2881_s26, 0  ;;  %s1266_s19 = sshll.u32 %s3160_s7, 4 }
 0x245   :  { %p494_p8 = scmp.gt.s32.totalorder %s2883_s14, 0  ;;  %s461_s10 = scalar_lea.hbm %s3091_s1, %s1266_s19 }
 0x246   :  { %s2080_s21 = scalar_lea.hbm %s461_s10, 16  ;;  %p2083_p5 = scmp.lt.u32.totalorder %s461_s10, %s3091_s1 }
 0x247   :  { %p2081_p3 = scmp.ne.s32.totalorder %s461_s10, %s2080_s21  ;;  %p2084_p9 = scmp.lt.u32.totalorder %s2420_s0, %s2080_s21 }
 0x248   :  { %p2086_p10 = scmp.lt.u32.totalorder %s2080_s21, %s461_s10 }
 0x249   :  { %p2085_p2 = por %p2084_p9, %p2083_p5 }
 0x24b   :  { %p2087_p11 = por %p2086_p10, %p2085_p2 }
 0x24d   :  { %p2088_p12 = pnand %p2087_p11, %p2081_p3 }
 0x24f   :  { %2091 = shalt.err (!%p2088_p12)  }
 0x250   :  { %s2092_s7 = scalar_lea.vmem %s2869_s12, 16  ;;  %p2097_p0 = scmp.lt.s32.totalorder %s2869_s12, %s2403_s9 }
 0x251   :  { %p2093_p13 = scmp.ne.s32.totalorder %s2869_s12, %s2092_s7  ;;  %p2098_p1 = scmp.lt.s32.totalorder %s2429_s27, %s2092_s7 }
 0x253   :  { %p2099_p7 = por %p2098_p1, %p2097_p0 }
 0x255   :  { %p2100_p6 = pnand %p2099_p7, %p2093_p13 }
 0x257   :  { %2103 = shalt.err (!%p2100_p6)  }
 0x258   :  { %473 = dma.hbm_to_vmem [thread:$0]  %s461_s10, 16, %s2869_s12, [#allocation3] }
 0x259   :  { %s476_s24 = scalar_select %p475_p4, %s2881_s26, 0 }
 0x25a   :  { %s495_s22 = scalar_select %p494_p8, %s2883_s14, 0 }
 0x25b   :  { %p3099_p3 = scmp.lt.s32.totalorder %s2881_s26, 499  ;;  %p3100_p5 = scmp.lt.s32.totalorder %s2883_s14, 499 }
 0x25d   :  { %s3162_s24 = smov (!%p3099_p3, %s476_s24), 499  ;;  %s3164_s22 = smov (!%p3100_p5, %s495_s22), 499 }
 0x25e   :  { %s1273_s29 = sshll.u32 %s3162_s24, 4  ;;  %s1280_s5 = sshll.u32 %s3164_s22, 4 }
 0x25f   :  { %s480_s16 = scalar_lea.hbm %s3091_s1, %s1273_s29 }
 0x260   :  { %s2104_s6 = scalar_lea.hbm %s480_s16, 16  ;;  %p2107_p4 = scmp.lt.u32.totalorder %s480_s16, %s3091_s1 }
 0x261   :  { %p2105_p6 = scmp.ne.s32.totalorder %s480_s16, %s2104_s6  ;;  %p2108_p7 = scmp.lt.u32.totalorder %s2420_s0, %s2104_s6 }
 0x262   :  { %p2110_p9 = scmp.lt.u32.totalorder %s2104_s6, %s480_s16 }
 0x263   :  { %p2109_p8 = por %p2108_p7, %p2107_p4 }
 0x265   :  { %p2111_p2 = por %p2110_p9, %p2109_p8 }
 0x267   :  { %p2112_p10 = pnand %p2111_p2, %p2105_p6 }
 0x269   :  { %2115 = shalt.err (!%p2112_p10)  }
 0x26a   :  { %s2116_s26 = scalar_lea.vmem %s2887_s8, 16  ;;  %p2121_p12 = scmp.lt.s32.totalorder %s2887_s8, %s2403_s9 }
 0x26b   :  { %p2117_p11 = scmp.ne.s32.totalorder %s2887_s8, %s2116_s26  ;;  %p2122_p13 = scmp.lt.s32.totalorder %s2429_s27, %s2116_s26 }
 0x26d   :  { %p2123_p0 = por %p2122_p13, %p2121_p12 }
 0x26f   :  { %p2124_p1 = pnand %p2123_p0, %p2117_p11 }
 0x271   :  { %2127 = shalt.err (!%p2124_p1)  }
 0x272   :  { %492 = dma.hbm_to_vmem [thread:$0]  %s480_s16, 16, %s2887_s8, [#allocation3] }
 0x273   :  { %s499_s28 = scalar_lea.hbm %s3091_s1, %s1280_s5  ;;  %p513_p3 = scmp.gt.s32.totalorder %s2892_s17, 0 }
 0x274   :  { %s2128_s19 = scalar_lea.hbm %s499_s28, 16  ;;  %p2131_p6 = scmp.lt.u32.totalorder %s499_s28, %s3091_s1 }
 0x275   :  { %p2129_p5 = scmp.ne.s32.totalorder %s499_s28, %s2128_s19  ;;  %p2132_p4 = scmp.lt.u32.totalorder %s2420_s0, %s2128_s19 }
 0x276   :  { %p2134_p8 = scmp.lt.u32.totalorder %s2128_s19, %s499_s28 }
 0x277   :  { %p2133_p7 = por %p2132_p4, %p2131_p6 }
 0x279   :  { %p2135_p9 = por %p2134_p8, %p2133_p7 }
 0x27b   :  { %p2136_p2 = pnand %p2135_p9, %p2129_p5 }
 0x27d   :  { %2139 = shalt.err (!%p2136_p2)  }
 0x27e   :  { %s2140_s8 = scalar_lea.vmem %s2922_s25, 16  ;;  %p2145_p11 = scmp.lt.s32.totalorder %s2922_s25, %s2403_s9 }
 0x27f   :  { %p2141_p10 = scmp.ne.s32.totalorder %s2922_s25, %s2140_s8  ;;  %p2146_p12 = scmp.lt.s32.totalorder %s2429_s27, %s2140_s8 }
 0x281   :  { %p2147_p13 = por %p2146_p12, %p2145_p11 }
 0x283   :  { %p2148_p0 = pnand %p2147_p13, %p2141_p10 }
 0x285   :  { %2151 = shalt.err (!%p2148_p0)  }
 0x286   :  { %511 = dma.hbm_to_vmem [thread:$0]  %s499_s28, 16, %s2922_s25, [#allocation3] }
 0x287   :  { %s514_s10 = scalar_select %p513_p3, %s2892_s17, 0 }
 0x288   :  { %p1282_p1 = scmp.lt.s32.totalorder %s2892_s17, 499  ;;  %s2355_s21 = smov [#allocation2 + $0xb]  }
 0x289   :  { %s527_s13 = sshll.u32 %s2355_s21, 4  ;;  %s2955_s18 = sld [smem:[#allocation6 + $0x1a]]  ;;  %s528_s13 = int_to_ptr.vmem [resolvable:$true] %s527_s13 }
 0x28a   :  { %s3166_s10 = smov (!%p1282_p1, %s514_s10), 499  ;;  %s2356_s24 = smov [#allocation2 + $0x13]  }
 0x28b   :  { %s1287_s7 = sshll.u32 %s3166_s10, 4  ;;  %s546_s22 = sshll.u32 %s2356_s24, 4  ;;  %s2960_s22 = int_to_ptr.vmem [resolvable:$true] %s546_s22 }
 0x28c   :  { %s518_s2 = scalar_lea.hbm %s3091_s1, %s1287_s7 }
 0x28d   :  { %s2152_s25 = scalar_lea.hbm %s518_s2, 16  ;;  %p2155_p3 = scmp.lt.u32.totalorder %s518_s2, %s3091_s1 }
 0x28e   :  { %p2153_p5 = scmp.ne.s32.totalorder %s518_s2, %s2152_s25  ;;  %p2156_p6 = scmp.lt.u32.totalorder %s2420_s0, %s2152_s25 }
 0x28f   :  { %p2158_p7 = scmp.lt.u32.totalorder %s2152_s25, %s518_s2 }
 0x290   :  { %p2157_p4 = por %p2156_p6, %p2155_p3 }
 0x292   :  { %p2159_p8 = por %p2158_p7, %p2157_p4 }
 0x294   :  { %p2160_p9 = pnand %p2159_p8, %p2153_p5 }
 0x296   :  { %2163 = shalt.err (!%p2160_p9)  }
 0x297   :  { %s2164_s17 = scalar_lea.vmem %s528_s13, 16  ;;  %p2169_p10 = scmp.lt.s32.totalorder %s528_s13, %s2403_s9 }
 0x298   :  { %p2165_p2 = scmp.ne.s32.totalorder %s528_s13, %s2164_s17  ;;  %p2170_p11 = scmp.lt.s32.totalorder %s2429_s27, %s2164_s17 }
 0x29a   :  { %p2171_p12 = por %p2170_p11, %p2169_p10 }
 0x29c   :  { %p2172_p13 = pnand %p2171_p12, %p2165_p2 }
 0x29e   :  { %2175 = shalt.err (!%p2172_p13)  }
 0x29f   :  { %530 = dma.hbm_to_vmem [thread:$0]  %s518_s2, 16, %s528_s13, [#allocation3] }
 0x2a0   :  { %p532_p0 = scmp.gt.s32.totalorder %s2955_s18, 0  ;;  %p1289_p1 = scmp.lt.s32.totalorder %s2955_s18, 499 }
 0x2a1   :  { %s2970_s6 = sld [smem:[#allocation6 + $0x1b]]  ;;  %s2357_s15 = smov [#allocation2 + $0x1b]  }
 0x2a2   :  { %s3168_s18 = smov (!%p532_p0, %s2955_s18), 0  ;;  %s565_s12 = sshll.u32 %s2357_s15, 4  ;;  %s2975_s12 = int_to_ptr.vmem [resolvable:$true] %s565_s12 }
 0x2a3   :  { %s2973_s26 = sld [smem:[#allocation6 + $0x1c]]  ;;  %s3170_s18 = smov (!%p1289_p1, %s3168_s18), 499 }
 0x2a4   :  { %s1294_s11 = sshll.u32 %s3170_s18, 4  ;;  %s2358_s14 = smov [#allocation2 + $0x23]  }
 0x2a5   :  { %s584_s28 = sshll.u32 %s2358_s14, 4  ;;  %s537_s23 = scalar_lea.hbm %s3091_s1, %s1294_s11  ;;  %s2997_s28 = int_to_ptr.vmem [resolvable:$true] %s584_s28 }
 0x2a6   :  { %s2176_s8 = scalar_lea.hbm %s537_s23, 16  ;;  %p2179_p6 = scmp.lt.u32.totalorder %s537_s23, %s3091_s1 }
 0x2a7   :  { %p551_p5 = scmp.gt.s32.totalorder %s2970_s6, 0  ;;  %p2177_p3 = scmp.ne.s32.totalorder %s537_s23, %s2176_s8 }
 0x2a8   :  { %p2180_p4 = scmp.lt.u32.totalorder %s2420_s0, %s2176_s8  ;;  %p2182_p8 = scmp.lt.u32.totalorder %s2176_s8, %s537_s23 }
 0x2aa   :  { %p2181_p7 = por %p2180_p4, %p2179_p6 }
 0x2ac   :  { %p2183_p9 = por %p2182_p8, %p2181_p7 }
 0x2ae   :  { %p2184_p2 = pnand %p2183_p9, %p2177_p3 }
 0x2b0   :  { %2187 = shalt.err (!%p2184_p2)  }
 0x2b1   :  { %s2188_s13 = scalar_lea.vmem %s2960_s22, 16  ;;  %p2193_p11 = scmp.lt.s32.totalorder %s2960_s22, %s2403_s9 }
 0x2b2   :  { %p2189_p10 = scmp.ne.s32.totalorder %s2960_s22, %s2188_s13  ;;  %p2194_p12 = scmp.lt.s32.totalorder %s2429_s27, %s2188_s13 }
 0x2b4   :  { %p2195_p13 = por %p2194_p12, %p2193_p11 }
 0x2b6   :  { %p2196_p0 = pnand %p2195_p13, %p2189_p10 }
 0x2b8   :  { %2199 = shalt.err (!%p2196_p0)  }
 0x2b9   :  { %549 = dma.hbm_to_vmem [thread:$0]  %s537_s23, 16, %s2960_s22, [#allocation3] }
 0x2ba   :  { %s552_s18 = scalar_select %p551_p5, %s2970_s6, 0 }
 0x2bb   :  { %p1296_p1 = scmp.lt.s32.totalorder %s2970_s6, 499  ;;  %p570_p3 = scmp.gt.s32.totalorder %s2973_s26, 0 }
 0x2bc   :  { %p1303_p6 = scmp.lt.s32.totalorder %s2973_s26, 499  ;;  %s3000_s29 = sld [smem:[#allocation6 + $0x1d]] }
 0x2bd   :  { %s3172_s18 = smov (!%p1296_p1, %s552_s18), 499 }
 0x2be   :  { %s571_s7 = scalar_select %p570_p3, %s2973_s26, 0 }
 0x2bf   :  { %s1301_s24 = sshll.u32 %s3172_s18, 4 }
 0x2c0   :  { %s556_s25 = scalar_lea.hbm %s3091_s1, %s1301_s24 }
 0x2c1   :  { %s2200_s16 = scalar_lea.hbm %s556_s25, 16  ;;  %p2203_p5 = scmp.lt.u32.totalorder %s556_s25, %s3091_s1 }
 0x2c2   :  { %p2201_p4 = scmp.ne.s32.totalorder %s556_s25, %s2200_s16  ;;  %p2204_p7 = scmp.lt.u32.totalorder %s2420_s0, %s2200_s16 }
 0x2c3   :  { %p2206_p9 = scmp.lt.u32.totalorder %s2200_s16, %s556_s25 }
 0x2c4   :  { %p2205_p8 = por %p2204_p7, %p2203_p5 }
 0x2c6   :  { %p2207_p2 = por %p2206_p9, %p2205_p8 }
 0x2c8   :  { %p2208_p10 = pnand %p2207_p2, %p2201_p4 }
 0x2ca   :  { %2211 = shalt.err (!%p2208_p10)  }
 0x2cb   :  { %s2212_s17 = scalar_lea.vmem %s2975_s12, 16  ;;  %p2217_p12 = scmp.lt.s32.totalorder %s2975_s12, %s2403_s9 }
 0x2cc   :  { %p2213_p11 = scmp.ne.s32.totalorder %s2975_s12, %s2212_s17  ;;  %p2218_p13 = scmp.lt.s32.totalorder %s2429_s27, %s2212_s17 }
 0x2ce   :  { %p2219_p0 = por %p2218_p13, %p2217_p12 }
 0x2d0   :  { %p2220_p1 = pnand %p2219_p0, %p2213_p11 }
 0x2d2   :  { %2223 = shalt.err (!%p2220_p1)  }
 0x2d3   :  { %568 = dma.hbm_to_vmem [thread:$0]  %s556_s25, 16, %s2975_s12, [#allocation3] }
 0x2d4   :  { %s3174_s7 = smov (!%p1303_p6, %s571_s7), 499  ;;  %s2359_s6 = smov [#allocation2 + $0x2b]  }
 0x2d5   :  { %s603_s15 = sshll.u32 %s2359_s6, 4  ;;  %s3017_s11 = sld [smem:[#allocation6 + $0x1e]]  ;;  %s3019_s15 = int_to_ptr.vmem [resolvable:$true] %s603_s15 }
 0x2d6   :  { %s1308_s14 = sshll.u32 %s3174_s7, 4  ;;  %p589_p3 = scmp.gt.s32.totalorder %s3000_s29, 0 }
 0x2d7   :  { %s575_s23 = scalar_lea.hbm %s3091_s1, %s1308_s14 }
 0x2d8   :  { %s2224_s8 = scalar_lea.hbm %s575_s23, 16  ;;  %p2227_p5 = scmp.lt.u32.totalorder %s575_s23, %s3091_s1 }
 0x2d9   :  { %p2225_p4 = scmp.ne.s32.totalorder %s575_s23, %s2224_s8  ;;  %p2228_p7 = scmp.lt.u32.totalorder %s2420_s0, %s2224_s8 }
 0x2da   :  { %p2230_p8 = scmp.lt.u32.totalorder %s2224_s8, %s575_s23 }
 0x2db   :  { %p2229_p6 = por %p2228_p7, %p2227_p5 }
 0x2dd   :  { %p2231_p9 = por %p2230_p8, %p2229_p6 }
 0x2df   :  { %p2232_p2 = pnand %p2231_p9, %p2225_p4 }
 0x2e1   :  { %2235 = shalt.err (!%p2232_p2)  }
 0x2e2   :  { %s2236_s12 = scalar_lea.vmem %s2997_s28, 16  ;;  %p2241_p11 = scmp.lt.s32.totalorder %s2997_s28, %s2403_s9 }
 0x2e3   :  { %p2237_p10 = scmp.ne.s32.totalorder %s2997_s28, %s2236_s12  ;;  %p2242_p12 = scmp.lt.s32.totalorder %s2429_s27, %s2236_s12 }
 0x2e5   :  { %p2243_p13 = por %p2242_p12, %p2241_p11 }
 0x2e7   :  { %p2244_p0 = pnand %p2243_p13, %p2237_p10 }
 0x2e9   :  { %2247 = shalt.err (!%p2244_p0)  }
 0x2ea   :  { %587 = dma.hbm_to_vmem [thread:$0]  %s575_s23, 16, %s2997_s28, [#allocation3] }
 0x2eb   :  { %s590_s26 = scalar_select %p589_p3, %s3000_s29, 0 }
 0x2ec   :  { %p1310_p1 = scmp.lt.s32.totalorder %s3000_s29, 499  ;;  %p608_p4 = scmp.gt.s32.totalorder %s3017_s11, 0 }
 0x2ed   :  { %p1317_p5 = scmp.lt.s32.totalorder %s3017_s11, 499  ;;  %s2360_s2 = smov [#allocation2 + $0x33]  }
 0x2ee   :  { %s3176_s26 = smov (!%p1310_p1, %s590_s26), 499  ;;  %s622_s25 = sshll.u32 %s2360_s2, 4  ;;  %s623_s25 = int_to_ptr.vmem [resolvable:$true] %s622_s25 }
 0x2ef   :  { %s609_s13 = scalar_select %p608_p4, %s3017_s11, 0 }
 0x2f0   :  { %s1315_s18 = sshll.u32 %s3176_s26, 4 }
 0x2f1   :  { %s594_s30 = scalar_lea.hbm %s3091_s1, %s1315_s18 }
 0x2f2   :  { %s2248_s16 = scalar_lea.hbm %s594_s30, 16  ;;  %p2251_p6 = scmp.lt.u32.totalorder %s594_s30, %s3091_s1 }
 0x2f3   :  { %p2249_p7 = scmp.ne.s32.totalorder %s594_s30, %s2248_s16  ;;  %p2252_p8 = scmp.lt.u32.totalorder %s2420_s0, %s2248_s16 }
 0x2f4   :  { %p2254_p9 = scmp.lt.u32.totalorder %s2248_s16, %s594_s30 }
 0x2f5   :  { %p2253_p3 = por %p2252_p8, %p2251_p6 }
 0x2f7   :  { %p2255_p2 = por %p2254_p9, %p2253_p3 }
 0x2f9   :  { %p2256_p10 = pnand %p2255_p2, %p2249_p7 }
 0x2fb   :  { %2259 = shalt.err (!%p2256_p10)  }
 0x2fc   :  { %s2260_s28 = scalar_lea.vmem %s3019_s15, 16  ;;  %p2265_p12 = scmp.lt.s32.totalorder %s3019_s15, %s2403_s9 }
 0x2fd   :  { %p2261_p11 = scmp.ne.s32.totalorder %s3019_s15, %s2260_s28  ;;  %p2266_p13 = scmp.lt.s32.totalorder %s2429_s27, %s2260_s28 }
 0x2ff   :  { %p2267_p0 = por %p2266_p13, %p2265_p12 }
 0x301   :  { %p2268_p1 = pnand %p2267_p0, %p2261_p11 }
 0x303   :  { %2271 = shalt.err (!%p2268_p1)  }
 0x304   :  { %606 = dma.hbm_to_vmem [thread:$0]  %s594_s30, 16, %s3019_s15, [#allocation3] }
 0x305   :  { %s3178_s13 = smov (!%p1317_p5, %s609_s13), 499  ;;  %s1323_s29 = sld [smem:[#allocation6 + $0x1f]] }
 0x306   :  { %s1322_s17 = sshll.u32 %s3178_s13, 4 }
 0x307   :  { %s613_s19 = scalar_lea.hbm %s3091_s1, %s1322_s17 }
 0x308   :  { %s2272_s20 = scalar_lea.hbm %s613_s19, 16  ;;  %p2275_p7 = scmp.lt.u32.totalorder %s613_s19, %s3091_s1 }
 0x309   :  { %p2273_p4 = scmp.ne.s32.totalorder %s613_s19, %s2272_s20  ;;  %p2276_p6 = scmp.lt.u32.totalorder %s2420_s0, %s2272_s20 }
 0x30a   :  { %p2278_p3 = scmp.lt.u32.totalorder %s2272_s20, %s613_s19 }
 0x30b   :  { %p2277_p8 = por %p2276_p6, %p2275_p7 }
 0x30d   :  { %p2279_p9 = por %p2278_p3, %p2277_p8 }
 0x30f   :  { %p2280_p2 = pnand %p2279_p9, %p2273_p4 }
 0x311   :  { %2283 = shalt.err (!%p2280_p2)  }
 0x312   :  { %s2284_s15 = scalar_lea.vmem %s623_s25, 16  ;;  %p2289_p10 = scmp.lt.s32.totalorder %s623_s25, %s2403_s9 }
 0x313   :  { %p2285_p5 = scmp.ne.s32.totalorder %s623_s25, %s2284_s15  ;;  %p2290_p11 = scmp.lt.s32.totalorder %s2429_s27, %s2284_s15 }
 0x315   :  { %p2291_p12 = por %p2290_p11, %p2289_p10 }
 0x317   :  { %p2292_p13 = pnand %p2291_p12, %p2285_p5 }
 0x319   :  { %2295 = shalt.err (!%p2292_p13)  }
 0x31a   :  { %625 = dma.hbm_to_vmem [thread:$0]  %s613_s19, 16, %s623_s25, [#allocation3] }
 0x31b   :  { %p627_p0 = scmp.gt.s32.totalorder %s1323_s29, 0  ;;  %p1324_p1 = scmp.lt.s32.totalorder %s1323_s29, 499 }
 0x31c   :  { %s2361_s11 = smov [#allocation2 + $0x3b]  }
 0x31d   :  { %s641_s10 = sshll.u32 %s2361_s11, 4  ;;  %s3180_s29 = smov (!%p627_p0, %s1323_s29), 0  ;;  %s642_s10 = int_to_ptr.vmem [resolvable:$true] %s641_s10 }
 0x31e   :  { %s3182_s29 = smov (!%p1324_p1, %s3180_s29), 499 }
 0x31f   :  { %s1329_s21 = sshll.u32 %s3182_s29, 4 }
 0x320   :  { %s632_s13 = scalar_lea.hbm %s3091_s1, %s1329_s21 }
 0x321   :  { %s2296_s18 = scalar_lea.hbm %s632_s13, 16  ;;  %p2299_p7 = scmp.lt.u32.totalorder %s632_s13, %s3091_s1 }
 0x322   :  { %p2297_p4 = scmp.ne.s32.totalorder %s632_s13, %s2296_s18  ;;  %p2300_p6 = scmp.lt.u32.totalorder %s2420_s0, %s2296_s18 }
 0x323   :  { %p2302_p3 = scmp.lt.u32.totalorder %s2296_s18, %s632_s13 }
 0x324   :  { %p2301_p8 = por %p2300_p6, %p2299_p7 }
 0x326   :  { %p2303_p9 = por %p2302_p3, %p2301_p8 }
 0x328   :  { %p2304_p2 = pnand %p2303_p9, %p2297_p4 }
 0x32a   :  { %2307 = shalt.err (!%p2304_p2)  }
 0x32b   :  { %s2308_s30 = scalar_lea.vmem %s642_s10, 16  ;;  %p2313_p10 = scmp.lt.s32.totalorder %s642_s10, %s2403_s9 }
 0x32c   :  { %p2309_p5 = scmp.ne.s32.totalorder %s642_s10, %s2308_s30  ;;  %p2314_p11 = scmp.lt.s32.totalorder %s2429_s27, %s2308_s30 }
 0x32e   :  { %p2315_p12 = por %p2314_p11, %p2313_p10 }
 0x330   :  { %p2316_p13 = pnand %p2315_p12, %p2309_p5 }
 0x332   :  { %2319 = shalt.err (!%p2316_p13)  }
 0x333   :  { %644 = dma.hbm_to_vmem [thread:$0]  %s632_s13, 16, %s642_s10, [#allocation3] }
 0x334   :  { %2324 = dma.done.wait [#allocation3], 512 }
 0x335   :  { %2325 = vsyncadd [#allocation3], 4294966784  ;;  %v2362_v0 = vmov 0   ;;  %v1470_v1 = vld [vmem:[#allocation7 + $0x4] ss:$16 sps:$4 sm:$0xff]   ;;  %v710_v28 = vld [vmem:[#allocation2 + $0x8] sm:$0xff]  ;;  %v724_v39 = vlaneseq }
 0x336   :  { %978 = vmatprep.mubr.bf16.mxu0 %v2362_v0  ;;  %1019 = vmatprep.mubr.bf16.mxu1 %v2362_v0  ;;  %v1472_v2 = vld [vmem:[#allocation7 + $0xc] ss:$16 sps:$4 sm:$0xff]   ;;  %v1474_v3 = vld [vmem:[#allocation7] ss:$16 sps:$4 sm:$0xff]   ;;  %v1475_v4 = vld [vmem:[#allocation7 + $0x8] ss:$16 sps:$4 sm:$0xff]  }
 0x337   :  { %946 = vmatprep.subr.bf16.mxu0 %v1470_v1  ;;  %987 = vmatprep.subr.bf16.mxu1 %v1472_v2  ;;  %v1476_v5 = vld [vmem:[#allocation7 + $0x24] ss:$16 sps:$4 sm:$0xff]   ;;  %v1478_v6 = vld [vmem:[#allocation7 + $0x2c] ss:$16 sps:$4 sm:$0xff]   ;;  %v1480_v7 = vld [vmem:[#allocation7 + $0x20] ss:$16 sps:$4 sm:$0xff]  }
 0x338   :  { %947 = vmatpush1.bf16.msra.mxu0 %v1474_v3  ;;  %988 = vmatpush1.bf16.msra.mxu1 %v1475_v4  ;;  %v1481_v8 = vld [vmem:[#allocation7 + $0x28] ss:$16 sps:$4 sm:$0xff]   ;;  %v1482_v9 = vld [vmem:[#allocation7 + $0x44] ss:$16 sps:$4 sm:$0xff]   ;;  %v1484_v10 = vld [vmem:[#allocation7 + $0x4c] ss:$16 sps:$4 sm:$0xff]  }
 0x339   :  { %948 = vmatprep.subr.bf16.mxu0 %v1476_v5  ;;  %989 = vmatprep.subr.bf16.mxu1 %v1478_v6  ;;  %v1486_v11 = vld [vmem:[#allocation7 + $0x40] ss:$16 sps:$4 sm:$0xff]   ;;  %v1487_v12 = vld [vmem:[#allocation7 + $0x48] ss:$16 sps:$4 sm:$0xff]   ;;  %v1488_v13 = vld [vmem:[#allocation7 + $0x64] ss:$16 sps:$4 sm:$0xff]  }
 0x33a   :  { %v1490_v14 = vld [vmem:[#allocation7 + $0x6c] ss:$16 sps:$4 sm:$0xff]   ;;  %v1492_v15 = vld [vmem:[#allocation7 + $0x60] ss:$16 sps:$4 sm:$0xff]   ;;  %v1493_v16 = vld [vmem:[#allocation7 + $0x68] ss:$16 sps:$4 sm:$0xff]  }
 0x33b   :  { %v1494_v17 = vld [vmem:[#allocation7 + $0x84] ss:$16 sps:$4 sm:$0xff]   ;;  %v1496_v18 = vld [vmem:[#allocation7 + $0x8c] ss:$16 sps:$4 sm:$0xff]   ;;  %v1498_v19 = vld [vmem:[#allocation7 + $0x80] ss:$16 sps:$4 sm:$0xff]  }
 0x33c   :  { %949 = vmatpush1.bf16.msra.mxu0 %v1480_v7  ;;  %990 = vmatpush1.bf16.msra.mxu1 %v1481_v8  ;;  %v1499_v20 = vld [vmem:[#allocation7 + $0x88] ss:$16 sps:$4 sm:$0xff]   ;;  %v1500_v21 = vld [vmem:[#allocation7 + $0xa4] ss:$16 sps:$4 sm:$0xff]   ;;  %v1502_v22 = vld [vmem:[#allocation7 + $0xac] ss:$16 sps:$4 sm:$0xff]  }
 0x33d   :  { %950 = vmatprep.subr.bf16.mxu0 %v1482_v9  ;;  %991 = vmatprep.subr.bf16.mxu1 %v1484_v10  ;;  %v1504_v23 = vld [vmem:[#allocation7 + $0xa0] ss:$16 sps:$4 sm:$0xff]   ;;  %v1505_v24 = vld [vmem:[#allocation7 + $0xa8] ss:$16 sps:$4 sm:$0xff]   ;;  %v1506_v25 = vld [vmem:[#allocation7 + $0xc4] ss:$16 sps:$4 sm:$0xff]  }
 0x33e   :  { %v1508_v26 = vld [vmem:[#allocation7 + $0xcc] ss:$16 sps:$4 sm:$0xff]   ;;  %v709_v27 = vld [vmem:[#allocation2] sm:$0xff]  ;;  %v711_v29 = vld [vmem:[#allocation2 + $0x10] sm:$0xff]  ;;  %v725_v46 = vshrl.u32 %v724_v39, 7 }
 0x33f   :  { %v717_v30 = vadd.f32 %v710_v28, %v709_v27  ;;  %v712_v31 = vld [vmem:[#allocation2 + $0x18] sm:$0xff]  ;;  %v1510_v32 = vld [vmem:[#allocation7 + $0xc0] ss:$16 sps:$4 sm:$0xff]   ;;  %v1512_v35 = vld [vmem:[#allocation7 + $0xe4] ss:$16 sps:$4 sm:$0xff]  }
 0x340   :  { %951 = vmatpush1.bf16.msra.mxu0 %v1486_v11  ;;  %992 = vmatpush1.bf16.msra.mxu1 %v1487_v12  ;;  %v1511_v33 = vld [vmem:[#allocation7 + $0xc8] ss:$16 sps:$4 sm:$0xff]   ;;  %v1514_v36 = vld [vmem:[#allocation7 + $0xec] ss:$16 sps:$4 sm:$0xff]   ;;  %v713_v37 = vld [vmem:[#allocation2 + $0x20] sm:$0xff]  ;;  %vm726_vm0 = vcmp.lt.s32.totalorder %v725_v46, 4 }
 0x341   :  { %952 = vmatprep.subr.bf16.mxu0 %v1488_v13  ;;  %993 = vmatprep.subr.bf16.mxu1 %v1490_v14  ;;  %v718_v34 = vadd.f32 %v717_v30, %v711_v29  ;;  %v714_v40 = vld [vmem:[#allocation2 + $0x28] sm:$0xff]  ;;  %v1516_v41 = vld [vmem:[#allocation7 + $0xe0] ss:$16 sps:$4 sm:$0xff]   ;;  %v716_v47 = vld [vmem:[#allocation2 + $0x38] sm:$0xff]  ;;  %v768_v52 = vsub.s32 0, %v725_v46  ;;  %v776_v53 = vsub.s32 2, %v725_v46 }
 0x342   :  { %v1517_v42 = vld [vmem:[#allocation7 + $0xe8] ss:$16 sps:$4 sm:$0xff]   ;;  %v715_v44 = vld [vmem:[#allocation2 + $0x30] sm:$0xff]  ;;  %vm1427_vm1 = vmpackc.low %vm726_vm0, %vm726_vm0  ;;  %v772_v55 = vsub.s32 1, %v725_v46  ;;  %v780_v56 = vsub.s32 3, %v725_v46 }
 0x343   :  { %v719_v38 = vadd.f32 %v718_v34, %v712_v31  ;;  %v764_v54 = vld [vmem:[%s3093_s3] sm:$0xf] }
 0x344   :  { %953 = vmatpush1.bf16.msra.mxu0 %v1492_v15  ;;  %994 = vmatpush1.bf16.msra.mxu1 %v1493_v16  ;;  %v769_v57 = vrot.slane %v764_v54, %v768_v52  ;;  %v777_v58 = vrot.slane %v764_v54, %v776_v53  ;;  %v773_v59 = vrot.slane %v764_v54, %v772_v55 }
 0x345   :  { %954 = vmatprep.subr.bf16.mxu0 %v1494_v17  ;;  %995 = vmatprep.subr.bf16.mxu1 %v1496_v18  ;;  %v720_v43 = vadd.f32 %v719_v38, %v713_v37  ;;  %v781_v60 = vrot.slane %v764_v54, %v780_v56 }
 0x347   :  { %v721_v45 = vadd.f32 %v720_v43, %v714_v40 }
 0x348   :  { %955 = vmatpush1.bf16.msra.mxu0 %v1498_v19  ;;  %996 = vmatpush1.bf16.msra.mxu1 %v1499_v20 }
 0x349   :  { %956 = vmatprep.subr.bf16.mxu0 %v1500_v21  ;;  %997 = vmatprep.subr.bf16.mxu1 %v1502_v22  ;;  %v722_v48 = vadd.f32 %v721_v45, %v715_v44 }
 0x34b   :  { %v723_v49 = vadd.f32 %v722_v48, %v716_v47 }
 0x34c   :  { %957 = vmatpush1.bf16.msra.mxu0 %v1504_v23  ;;  %998 = vmatpush1.bf16.msra.mxu1 %v1505_v24 }
 0x34d   :  { %958 = vmatprep.subr.bf16.mxu0 %v1506_v25  ;;  %999 = vmatprep.subr.bf16.mxu1 %v1508_v26  ;;  %v727_v50 = vmul.f32 0.125, %v723_v49 }
 0x34f   :  { %v1428_v51 = vpack.c.bf16 %v727_v50, %v727_v50 }
 0x350   :  { %959 = vmatpush1.bf16.msra.mxu0 %v1510_v32  ;;  %1000 = vmatpush1.bf16.msra.mxu1 %v1511_v33 }
 0x351   :  { %960 = vmatprep.subr.bf16.mxu0 %v1512_v35  ;;  %1001 = vmatprep.subr.bf16.mxu1 %v1514_v36 }
 0x354   :  { %961 = vmatpush1.bf16.msra.mxu0 %v1516_v41  ;;  %1002 = vmatpush1.bf16.msra.mxu1 %v1517_v42 }
 0x357   :  { %1429 = vmatmul.mubr.msk.bf16.vlgmr.msra.gmra.mrb[0].mxu0 %vm1427_vm1, %v1428_v51  ;;  %1432 = vmatmul.mubr.msk.bf16.vlgmr.msra.gmra.mrb[0].mxu1 %vm1427_vm1, %v1428_v51 }
 0x42a   :  { %v980_v61 = vpop.f32.mrb[0].mxu0  ;;  %v1021_v62 = vpop.f32.mrb[0].mxu1 }
 0x42b   :  { %v981_v63 = vadd.f32 %v980_v61, %v769_v57  ;;  %v1022_v0 = vadd.f32 %v1021_v62, %v777_v58  ;;  %v982_v1 = vpop.f32.mrb[1].mxu0  ;;  %v1023_v2 = vpop.f32.mrb[1].mxu1 }
 0x42c   :  { %v983_v3 = vadd.f32 %v982_v1, %v773_v59  ;;  %v1024_v4 = vadd.f32 %v1023_v2, %v781_v60  ;;  %v984_v5 = vpop.f32.mrb[2].mxu0  ;;  %v1025_v6 = vpop.f32.mrb[2].mxu1 }
 0x42d   :  { %1028 = vst [vmem:[%s3094_s4] sm:$0xff] %v981_v63  ;;  %1030 = vst [vmem:[%s3094_s4 + $0x10] sm:$0xff] %v1022_v0  ;;  %v985_v7 = vpop.f32.mrb[3].mxu0  ;;  %v1026_v8 = vpop.f32.mrb[3].mxu1 }
 0x42e   :  { %1029 = vst [vmem:[%s3094_s4 + $0x8] sm:$0xff] %v983_v3  ;;  %1031 = vst [vmem:[%s3094_s4 + $0x18] sm:$0xff] %v1024_v4 }
 0x42f   :  { %1036 = vsyncpa [#allocation8], 1 }
 0x430   :  { %1037 = vsyncmov [#allocation3] }
 0x433   :  { %s1038_s28 = vpop.sfrf %1037 }
 0x434   :  { %p1362_p0 = scmp.ne.s32.totalorder %s1038_s28, 0 }
 0x436   :  { %1042 = shalt.err (%p1362_p0)  }

</bundles_post_ra>
